<compile_context>
chip_gen: v7x
topology: tpu7x:2x2x1
jax: 0.10.0
libtpu: 0.0.40
codegen_flags: <defaults>
</compile_context>

<pallas_src>
import functools

import jax
import jax.numpy as jnp
from jax.experimental import pallas as pl
from jax.experimental.pallas import tpu as pltpu


def _round_up(n, m):
    return ((n + m - 1) // m) * m


def _pick_tile(m, max_tile, align):
    """Biggest tile <= max_tile covering m; prefer >=2 grid steps (v7x 2 TCs)."""
    t = min(max_tile, _round_up(m, align))
    if m > 2 * align and _round_up(m, t) // t < 2:
        t = _round_up((m + 1) // 2, align)
    return t


# ---------------------------------------------------------------------------
# Kernel 1: fused 3x3-conv (as 9-tap matmul) + bias + ReLU + 3x3/3 max-pool,
# fed by the minimal 5x5 super-window gather.
# ---------------------------------------------------------------------------
def conv_relu_pool_kernel(g_ref, w_ref, b_ref, o_ref, *, cin):
    # g_ref: (25*cin, tile_m) bf16, row (t*5+s)*cin + c = input[c, 3p+s, 3q+t]
    #        at column m = (b, p, q)
    # w_ref: (cout, 9*cin) bf16, column (dj*3 + di)*cin + c
    # b_ref: (cout, 1) f32;  o_ref: (cout, tile_m)
    w = w_ref[...]
    acc = None
    for u in range(3):
        for v in range(3):
            # re-expand the tap matrix for pool offset (u, v): rows
            # (dj*3 + di)*cin + c  <-  g row ((v+dj)*5 + (u+di))*cin + c
            taps = jnp.concatenate(
                [g_ref[pl.ds(((v + dj) * 5 + u) * cin, 3 * cin), :]
                 for dj in range(3)],
                axis=0)                                          # (9*cin, tile_m)
            z = jnp.dot(w, taps, preferred_element_type=jnp.float32)
            acc = z if acc is None else jnp.maximum(acc, z)      # pool max
    # bias/ReLU commute with the pool max (bias constant, ReLU monotone)
    o_ref[...] = jnp.maximum(acc + b_ref[...], 0.0).astype(o_ref.dtype)


def conv_relu_pool(g, w, b, *, cin, out_dtype, max_tile_m):
    """g: (25*cin, M) bf16, w: (cout, 9*cin) bf16, b: (cout, 1) f32 -> (cout, M)."""
    rows, m_total = g.shape
    cout = w.shape[0]
    tile_m = _pick_tile(m_total, max_tile_m, 128)
    m_pad = _round_up(m_total, tile_m)
    if m_pad != m_total:
        g = jnp.pad(g, ((0, 0), (0, m_pad - m_total)))

    out = pl.pallas_call(
        functools.partial(conv_relu_pool_kernel, cin=cin),
        out_shape=jax.ShapeDtypeStruct((cout, m_pad), out_dtype),
        grid_spec=pltpu.PrefetchScalarGridSpec(
            num_scalar_prefetch=0,
            grid=(m_pad // tile_m,),
            in_specs=[
                pl.BlockSpec((rows, tile_m), lambda i: (0, i)),
                pl.BlockSpec((cout, 9 * cin), lambda i: (0, 0)),
                pl.BlockSpec((cout, 1), lambda i: (0, 0)),
            ],
            out_specs=pl.BlockSpec((cout, tile_m), lambda i: (0, i)),
        ),
        compiler_params=pltpu.CompilerParams(
            dimension_semantics=("parallel",),
            vmem_limit_bytes=32 * 1024 * 1024),
    )(g, w, b)
    return out[:, :m_total]


# ---------------------------------------------------------------------------
# Kernel 2: fused FC head 1536 -> 128(120) -> 128(84) -> 128(5), f32
# ---------------------------------------------------------------------------
def mlp_kernel(x_ref, w1_ref, b1_ref, w2_ref, b2_ref, w3_ref, b3_ref, o_ref):
    h = jnp.dot(x_ref[...], w1_ref[...],
                preferred_element_type=jnp.float32) + b1_ref[...]
    h = jnp.maximum(h, 0.0)
    h = jnp.dot(h, w2_ref[...],
                preferred_element_type=jnp.float32) + b2_ref[...]
    h = jnp.maximum(h, 0.0)
    o_ref[...] = jnp.dot(h, w3_ref[...],
                         preferred_element_type=jnp.float32) + b3_ref[...]


def mlp_head(feats, fc1, fc2, fc3, *, max_tile_b=512):
    """feats: (B, 1536) f32 -> logits (B, 5)."""
    w1, b1 = fc1
    w2, b2 = fc2
    w3, b3 = fc3
    B, d_in = feats.shape
    n_out = w3.shape[1]

    # zero-pad every hidden/output dim to full 128 lanes; exact because
    # ReLU(0)=0 and the corresponding rows of the next weight are zero.
    def pad_to(a, rows, cols):
        return jnp.pad(a, ((0, rows - a.shape[0]), (0, cols - a.shape[1])))

    h1 = _round_up(w1.shape[1], 128)      # 120 -> 128
    h2 = _round_up(w2.shape[1], 128)      # 84  -> 128
    n_pad = _round_up(n_out, 128)         # 5   -> 128
    w1p, b1p = pad_to(w1, d_in, h1), pad_to(b1, 1, h1)
    w2p, b2p = pad_to(w2, h1, h2), pad_to(b2, 1, h2)
    w3p, b3p = pad_to(w3, h2, n_pad), pad_to(b3, 1, n_pad)

    tile_b = _pick_tile(B, max_tile_b, 8)
    b_pad = _round_up(B, tile_b)
    if b_pad != B:
        feats = jnp.pad(feats, ((0, b_pad - B), (0, 0)))

    def rep(shape):
        return pl.BlockSpec(shape, lambda i: (0, 0))

    out = pl.pallas_call(
        mlp_kernel,
        out_shape=jax.ShapeDtypeStruct((b_pad, n_pad), jnp.float32),
        grid_spec=pltpu.PrefetchScalarGridSpec(
            num_scalar_prefetch=0,
            grid=(b_pad // tile_b,),
            in_specs=[
                pl.BlockSpec((tile_b, d_in), lambda i: (i, 0)),
                rep(w1p.shape), rep(b1p.shape),
                rep(w2p.shape), rep(b2p.shape),
                rep(w3p.shape), rep(b3p.shape),
            ],
            out_specs=pl.BlockSpec((tile_b, n_pad), lambda i: (i, 0)),
        ),
        compiler_params=pltpu.CompilerParams(
            dimension_semantics=("parallel",),
            vmem_limit_bytes=32 * 1024 * 1024),
    )(feats, w1p, b1p, w2p, b2p, w3p, b3p)
    return out[:B, :n_out]


# ---------------------------------------------------------------------------
# Wrapper-side minimal 5x5 pool+conv window gather (pure layout glue)
# ---------------------------------------------------------------------------
def _pool_conv_window_1ch(x_p, h_out, w_out):
    """x_p: (B, H, W).  Returns (25, B*h_out*w_out); row t*5+s holds
    x_p[b, 3p+s, 3q+t] at column (b, p, q)."""
    win = [x_p[:, s:s + 3 * h_out:3, t:t + 3 * w_out:3]
           for t in range(5) for s in range(5)]                  # each (B,h,w)
    return jnp.stack(win, axis=0).reshape(25, -1)


def _pool_conv_window_multich(x, h_out, w_out):
    """x: (B, C, H, W).  Returns (25*C, B*h_out*w_out); row (t*5+s)*C + c holds
    x[b, c, 3p+s, 3q+t] at column (b, p, q)."""
    c = x.shape[1]
    win = [x[:, :, s:s + 3 * h_out:3, t:t + 3 * w_out:3]
           for t in range(5) for s in range(5)]                  # each (B,C,h,w)
    win = jnp.stack(win, axis=0)                                 # (25,B,C,h,w)
    return win.transpose(0, 2, 1, 3, 4).reshape(25 * c, -1)


def _conv_weight_rows(w):
    """(Cout, Cin, 3, 3) -> (Cout, 9*Cin), column order (dj, di, c)."""
    return w.transpose(0, 3, 2, 1).reshape(w.shape[0], -1)


# ---------------------------------------------------------------------------
# Full forward pass
# ---------------------------------------------------------------------------
def pc_discriminator_forward(x, params):
    """x: (B, 1, 300, 3) float32 -> logits (B, 5)."""
    c1w, c1b = params["conv1"]
    c2w, c2b = params["conv2"]
    B = x.shape[0]
    assert x.shape[1:] == (1, 300, 3), x.shape

    # conv weights / window gathers in bf16 (HBM-bound stream); f32 accumulation.
    w1 = _conv_weight_rows(c1w).astype(jnp.bfloat16)             # (6, 9)
    w2 = _conv_weight_rows(c2w).astype(jnp.bfloat16)             # (16, 54)
    b1 = c1b.reshape(6, 1).astype(jnp.float32)
    b2 = c2b.reshape(16, 1).astype(jnp.float32)

    # stage 1: conv1 (width padded by 20) + ReLU + 3x3/3 max-pool -> (B,6,99,13)
    x_p = jnp.pad(x.reshape(B, 300, 3), ((0, 0), (0, 0), (20, 20)))
    x_p = x_p.astype(jnp.bfloat16)                               # (B, 300, 43)
    h1, w1sz = 99, 13
    g1 = _pool_conv_window_1ch(x_p, h1, w1sz)                    # (25, B*1287)
    o1 = conv_relu_pool(g1, w1, b1, cin=1,
                        out_dtype=jnp.bfloat16, max_tile_m=16384)  # (6, B*1287)
    pooled1 = o1.reshape(6, B, h1, w1sz).transpose(1, 0, 2, 3)   # (B,6,99,13)

    # stage 2: conv2 + ReLU + 3x3/3 max-pool -> (B,16,32,3)
    h2, w2sz = 32, 3
    g2 = _pool_conv_window_multich(pooled1, h2, w2sz)            # (150, B*96)
    o2 = conv_relu_pool(g2, w2, b2, cin=6,
                        out_dtype=jnp.float32, max_tile_m=8192)  # (16, B*96)
    feats = (o2.reshape(16, B, h2, w2sz).transpose(1, 0, 2, 3)
               .reshape(B, 16 * h2 * w2sz))                      # (B, 1536)

    # stage 3: fused FC head (f32, lane-padded hidden dims)
    return mlp_head(feats, params["fc1"], params["fc2"], params["fc3"])


# ---------------------------------------------------------------------------
# Deterministic parameters (same shapes/semantics as the PyTorch module;
# Linear weights stored as (in, out) = transpose of nn.Linear's (out, in)).
# ---------------------------------------------------------------------------
def init_params(key):
    def u(k, shape, fan_in):
        bound = 1.0 / float(fan_in) ** 0.5
        return jax.random.uniform(k, shape, jnp.float32, -bound, bound)

    ks = jax.random.split(key, 10)
    return {
        "conv1": (u(ks[0], (6, 1, 3, 3), 9),    u(ks[1], (6,), 9)),
        "conv2": (u(ks[2], (16, 6, 3, 3), 54),  u(ks[3], (16,), 54)),
        "fc1":   (u(ks[4], (1536, 120), 1536),  u(ks[5], (1, 120), 1536)),
        "fc2":   (u(ks[6], (120, 84), 120),     u(ks[7], (1, 84), 120)),
        "fc3":   (u(ks[8], (84, 5), 84),        u(ks[9], (1, 5), 84)),
    }


# ---------------------------------------------------------------------------
# Pure-JAX f32 reference (mirrors the PyTorch forward exactly)
# ---------------------------------------------------------------------------
def reference_forward(x, params):
    c1w, c1b = params["conv1"]
    c2w, c2b = params["conv2"]
    f1w, f1b = params["fc1"]
    f2w, f2b = params["fc2"]
    f3w, f3b = params["fc3"]
    dn = ("NCHW", "OIHW", "NCHW")
    hp = jax.lax.Precision.HIGHEST

    y = jax.lax.conv_general_dilated(x, c1w, (1, 1), ((0, 0), (20, 20)),
                                     dimension_numbers=dn, precision=hp)
    y = jnp.maximum(y + c1b.reshape(1, -1, 1, 1), 0.0)
    y = jax.lax.reduce_window(y, -jnp.inf, jax.lax.max,
                              (1, 1, 3, 3), (1, 1, 3, 3), "VALID")
    y = jax.lax.conv_general_dilated(y, c2w, (1, 1), ((0, 0), (0, 0)),
                                     dimension_numbers=dn, precision=hp)
    y = jnp.maximum(y + c2b.reshape(1, -1, 1, 1), 0.0)
    y = jax.lax.reduce_window(y, -jnp.inf, jax.lax.max,
                              (1, 1, 3, 3), (1, 1, 3, 3), "VALID")
    y = y.reshape(y.shape[0], -1)                                # (B, 1536)
    y = jnp.maximum(jnp.dot(y, f1w, precision=hp) + f1b, 0.0)
    y = jnp.maximum(jnp.dot(y, f2w, precision=hp) + f2b, 0.0)
    return jnp.dot(y, f3w, precision=hp) + f3b


if __name__ == "__main__":
    key = jax.random.PRNGKey(0)
    key, kx = jax.random.split(key)

    B = 2
    x = jax.random.normal(kx, (B, 1, 300, 3), jnp.float32)
    params = init_params(key)

    fwd = jax.jit(pc_discriminator_forward)
    out = jax.block_until_ready(fwd(x, params))
    assert out.shape == (B, 5), out.shape

    ref = jax.block_until_ready(reference_forward(x, params))
    # bf16 conv inputs/weights (f32 accumulation) -> relaxed but meaningful tol
    max_err = float(jnp.max(jnp.abs(out - ref)))
    assert jnp.allclose(out, ref, atol=2e-2, rtol=2e-2), max_err

    print("KERNEL_OK")
</pallas_src>

<mosaic_0001>
module attributes {stable_mosaic.version = 11 : i64} {
  func.func @conv_relu_pool_kernel(%arg0: i32, %arg1: memref<25x1408xbf16, #tpu.memory_space<vmem>>, %arg2: memref<6x9xbf16, #tpu.memory_space<vmem>>, %arg3: memref<6x1xf32, #tpu.memory_space<vmem>>, %arg4: memref<6x1408xbf16, #tpu.memory_space<vmem>>) attributes {dimension_semantics = [#tpu.dimension_semantics<parallel>], iteration_bounds = array<i64: 2>, scalar_prefetch = 0 : i64, scratch_operands = 0 : i64, tpu.core_type = #tpu.core_type<tc>, window_params = [{transform_indices = @transform_0, window_bounds = array<i64: 25, 1408>}, {pipeline_mode = #tpu.pipeline_mode<synchronous>, transform_indices = @transform_1, window_bounds = array<i64: 6, 9>}, {pipeline_mode = #tpu.pipeline_mode<synchronous>, transform_indices = @transform_2, window_bounds = array<i64: 6, 1>}, {transform_indices = @transform_3, window_bounds = array<i64: 6, 1408>}]} {
    %c0 = arith.constant 0 : index
    %c0_0 = arith.constant 0 : index
    %0 = vector.load %arg2[%c0, %c0_0] : memref<6x9xbf16, #tpu.memory_space<vmem>>, vector<6x9xbf16>
    %c0_1 = arith.constant 0 : index
    %c0_2 = arith.constant 0 : index
    %1 = vector.load %arg1[%c0_1, %c0_2] : memref<25x1408xbf16, #tpu.memory_space<vmem>>, vector<3x1408xbf16>
    %c5 = arith.constant 5 : index
    %c0_3 = arith.constant 0 : index
    %2 = vector.load %arg1[%c5, %c0_3] : memref<25x1408xbf16, #tpu.memory_space<vmem>>, vector<3x1408xbf16>
    %c10 = arith.constant 10 : index
    %c0_4 = arith.constant 0 : index
    %3 = vector.load %arg1[%c10, %c0_4] : memref<25x1408xbf16, #tpu.memory_space<vmem>>, vector<3x1408xbf16>
    %4 = tpu.concatenate %1, %2, %3 in 0 : vector<3x1408xbf16>, vector<3x1408xbf16>, vector<3x1408xbf16> -> vector<9x1408xbf16>
    %cst = arith.constant dense<0.000000e+00> : vector<6x1408xf32>
    %5 = tpu.matmul %0, %4, %cst {dimension_numbers = #tpu.dot_dimension_numbers<[1], [0], [0], [1], [0, 0, 1, 1], [], []>} : vector<6x9xbf16>, vector<9x1408xbf16>, vector<6x1408xf32> -> vector<6x1408xf32>
    %c5_5 = arith.constant 5 : index
    %c0_6 = arith.constant 0 : index
    %6 = vector.load %arg1[%c5_5, %c0_6] : memref<25x1408xbf16, #tpu.memory_space<vmem>>, vector<3x1408xbf16>
    %c10_7 = arith.constant 10 : index
    %c0_8 = arith.constant 0 : index
    %7 = vector.load %arg1[%c10_7, %c0_8] : memref<25x1408xbf16, #tpu.memory_space<vmem>>, vector<3x1408xbf16>
    %c15 = arith.constant 15 : index
    %c0_9 = arith.constant 0 : index
    %8 = vector.load %arg1[%c15, %c0_9] : memref<25x1408xbf16, #tpu.memory_space<vmem>>, vector<3x1408xbf16>
    %9 = tpu.concatenate %6, %7, %8 in 0 : vector<3x1408xbf16>, vector<3x1408xbf16>, vector<3x1408xbf16> -> vector<9x1408xbf16>
    %cst_10 = arith.constant dense<0.000000e+00> : vector<6x1408xf32>
    %10 = tpu.matmul %0, %9, %cst_10 {dimension_numbers = #tpu.dot_dimension_numbers<[1], [0], [0], [1], [0, 0, 1, 1], [], []>} : vector<6x9xbf16>, vector<9x1408xbf16>, vector<6x1408xf32> -> vector<6x1408xf32>
    %11 = arith.maximumf %5, %10 : vector<6x1408xf32>
    %c10_11 = arith.constant 10 : index
    %c0_12 = arith.constant 0 : index
    %12 = vector.load %arg1[%c10_11, %c0_12] : memref<25x1408xbf16, #tpu.memory_space<vmem>>, vector<3x1408xbf16>
    %c15_13 = arith.constant 15 : index
    %c0_14 = arith.constant 0 : index
    %13 = vector.load %arg1[%c15_13, %c0_14] : memref<25x1408xbf16, #tpu.memory_space<vmem>>, vector<3x1408xbf16>
    %c20 = arith.constant 20 : index
    %c0_15 = arith.constant 0 : index
    %14 = vector.load %arg1[%c20, %c0_15] : memref<25x1408xbf16, #tpu.memory_space<vmem>>, vector<3x1408xbf16>
    %15 = tpu.concatenate %12, %13, %14 in 0 : vector<3x1408xbf16>, vector<3x1408xbf16>, vector<3x1408xbf16> -> vector<9x1408xbf16>
    %cst_16 = arith.constant dense<0.000000e+00> : vector<6x1408xf32>
    %16 = tpu.matmul %0, %15, %cst_16 {dimension_numbers = #tpu.dot_dimension_numbers<[1], [0], [0], [1], [0, 0, 1, 1], [], []>} : vector<6x9xbf16>, vector<9x1408xbf16>, vector<6x1408xf32> -> vector<6x1408xf32>
    %17 = arith.maximumf %11, %16 : vector<6x1408xf32>
    %c1 = arith.constant 1 : index
    %c0_17 = arith.constant 0 : index
    %18 = vector.load %arg1[%c1, %c0_17] : memref<25x1408xbf16, #tpu.memory_space<vmem>>, vector<3x1408xbf16>
    %c6 = arith.constant 6 : index
    %c0_18 = arith.constant 0 : index
    %19 = vector.load %arg1[%c6, %c0_18] : memref<25x1408xbf16, #tpu.memory_space<vmem>>, vector<3x1408xbf16>
    %c11 = arith.constant 11 : index
    %c0_19 = arith.constant 0 : index
    %20 = vector.load %arg1[%c11, %c0_19] : memref<25x1408xbf16, #tpu.memory_space<vmem>>, vector<3x1408xbf16>
    %21 = tpu.concatenate %18, %19, %20 in 0 : vector<3x1408xbf16>, vector<3x1408xbf16>, vector<3x1408xbf16> -> vector<9x1408xbf16>
    %cst_20 = arith.constant dense<0.000000e+00> : vector<6x1408xf32>
    %22 = tpu.matmul %0, %21, %cst_20 {dimension_numbers = #tpu.dot_dimension_numbers<[1], [0], [0], [1], [0, 0, 1, 1], [], []>} : vector<6x9xbf16>, vector<9x1408xbf16>, vector<6x1408xf32> -> vector<6x1408xf32>
    %23 = arith.maximumf %17, %22 : vector<6x1408xf32>
    %c6_21 = arith.constant 6 : index
    %c0_22 = arith.constant 0 : index
    %24 = vector.load %arg1[%c6_21, %c0_22] : memref<25x1408xbf16, #tpu.memory_space<vmem>>, vector<3x1408xbf16>
    %c11_23 = arith.constant 11 : index
    %c0_24 = arith.constant 0 : index
    %25 = vector.load %arg1[%c11_23, %c0_24] : memref<25x1408xbf16, #tpu.memory_space<vmem>>, vector<3x1408xbf16>
    %c16 = arith.constant 16 : index
    %c0_25 = arith.constant 0 : index
    %26 = vector.load %arg1[%c16, %c0_25] : memref<25x1408xbf16, #tpu.memory_space<vmem>>, vector<3x1408xbf16>
    %27 = tpu.concatenate %24, %25, %26 in 0 : vector<3x1408xbf16>, vector<3x1408xbf16>, vector<3x1408xbf16> -> vector<9x1408xbf16>
    %cst_26 = arith.constant dense<0.000000e+00> : vector<6x1408xf32>
    %28 = tpu.matmul %0, %27, %cst_26 {dimension_numbers = #tpu.dot_dimension_numbers<[1], [0], [0], [1], [0, 0, 1, 1], [], []>} : vector<6x9xbf16>, vector<9x1408xbf16>, vector<6x1408xf32> -> vector<6x1408xf32>
    %29 = arith.maximumf %23, %28 : vector<6x1408xf32>
    %c11_27 = arith.constant 11 : index
    %c0_28 = arith.constant 0 : index
    %30 = vector.load %arg1[%c11_27, %c0_28] : memref<25x1408xbf16, #tpu.memory_space<vmem>>, vector<3x1408xbf16>
    %c16_29 = arith.constant 16 : index
    %c0_30 = arith.constant 0 : index
    %31 = vector.load %arg1[%c16_29, %c0_30] : memref<25x1408xbf16, #tpu.memory_space<vmem>>, vector<3x1408xbf16>
    %c21 = arith.constant 21 : index
    %c0_31 = arith.constant 0 : index
    %32 = vector.load %arg1[%c21, %c0_31] : memref<25x1408xbf16, #tpu.memory_space<vmem>>, vector<3x1408xbf16>
    %33 = tpu.concatenate %30, %31, %32 in 0 : vector<3x1408xbf16>, vector<3x1408xbf16>, vector<3x1408xbf16> -> vector<9x1408xbf16>
    %cst_32 = arith.constant dense<0.000000e+00> : vector<6x1408xf32>
    %34 = tpu.matmul %0, %33, %cst_32 {dimension_numbers = #tpu.dot_dimension_numbers<[1], [0], [0], [1], [0, 0, 1, 1], [], []>} : vector<6x9xbf16>, vector<9x1408xbf16>, vector<6x1408xf32> -> vector<6x1408xf32>
    %35 = arith.maximumf %29, %34 : vector<6x1408xf32>
    %c2 = arith.constant 2 : index
    %c0_33 = arith.constant 0 : index
    %36 = vector.load %arg1[%c2, %c0_33] : memref<25x1408xbf16, #tpu.memory_space<vmem>>, vector<3x1408xbf16>
    %c7 = arith.constant 7 : index
    %c0_34 = arith.constant 0 : index
    %37 = vector.load %arg1[%c7, %c0_34] : memref<25x1408xbf16, #tpu.memory_space<vmem>>, vector<3x1408xbf16>
    %c12 = arith.constant 12 : index
    %c0_35 = arith.constant 0 : index
    %38 = vector.load %arg1[%c12, %c0_35] : memref<25x1408xbf16, #tpu.memory_space<vmem>>, vector<3x1408xbf16>
    %39 = tpu.concatenate %36, %37, %38 in 0 : vector<3x1408xbf16>, vector<3x1408xbf16>, vector<3x1408xbf16> -> vector<9x1408xbf16>
    %cst_36 = arith.constant dense<0.000000e+00> : vector<6x1408xf32>
    %40 = tpu.matmul %0, %39, %cst_36 {dimension_numbers = #tpu.dot_dimension_numbers<[1], [0], [0], [1], [0, 0, 1, 1], [], []>} : vector<6x9xbf16>, vector<9x1408xbf16>, vector<6x1408xf32> -> vector<6x1408xf32>
    %41 = arith.maximumf %35, %40 : vector<6x1408xf32>
    %c7_37 = arith.constant 7 : index
    %c0_38 = arith.constant 0 : index
    %42 = vector.load %arg1[%c7_37, %c0_38] : memref<25x1408xbf16, #tpu.memory_space<vmem>>, vector<3x1408xbf16>
    %c12_39 = arith.constant 12 : index
    %c0_40 = arith.constant 0 : index
    %43 = vector.load %arg1[%c12_39, %c0_40] : memref<25x1408xbf16, #tpu.memory_space<vmem>>, vector<3x1408xbf16>
    %c17 = arith.constant 17 : index
    %c0_41 = arith.constant 0 : index
    %44 = vector.load %arg1[%c17, %c0_41] : memref<25x1408xbf16, #tpu.memory_space<vmem>>, vector<3x1408xbf16>
    %45 = tpu.concatenate %42, %43, %44 in 0 : vector<3x1408xbf16>, vector<3x1408xbf16>, vector<3x1408xbf16> -> vector<9x1408xbf16>
    %cst_42 = arith.constant dense<0.000000e+00> : vector<6x1408xf32>
    %46 = tpu.matmul %0, %45, %cst_42 {dimension_numbers = #tpu.dot_dimension_numbers<[1], [0], [0], [1], [0, 0, 1, 1], [], []>} : vector<6x9xbf16>, vector<9x1408xbf16>, vector<6x1408xf32> -> vector<6x1408xf32>
    %47 = arith.maximumf %41, %46 : vector<6x1408xf32>
    %c12_43 = arith.constant 12 : index
    %c0_44 = arith.constant 0 : index
    %48 = vector.load %arg1[%c12_43, %c0_44] : memref<25x1408xbf16, #tpu.memory_space<vmem>>, vector<3x1408xbf16>
    %c17_45 = arith.constant 17 : index
    %c0_46 = arith.constant 0 : index
    %49 = vector.load %arg1[%c17_45, %c0_46] : memref<25x1408xbf16, #tpu.memory_space<vmem>>, vector<3x1408xbf16>
    %c22 = arith.constant 22 : index
    %c0_47 = arith.constant 0 : index
    %50 = vector.load %arg1[%c22, %c0_47] : memref<25x1408xbf16, #tpu.memory_space<vmem>>, vector<3x1408xbf16>
    %51 = tpu.concatenate %48, %49, %50 in 0 : vector<3x1408xbf16>, vector<3x1408xbf16>, vector<3x1408xbf16> -> vector<9x1408xbf16>
    %cst_48 = arith.constant dense<0.000000e+00> : vector<6x1408xf32>
    %52 = tpu.matmul %0, %51, %cst_48 {dimension_numbers = #tpu.dot_dimension_numbers<[1], [0], [0], [1], [0, 0, 1, 1], [], []>} : vector<6x9xbf16>, vector<9x1408xbf16>, vector<6x1408xf32> -> vector<6x1408xf32>
    %53 = arith.maximumf %47, %52 : vector<6x1408xf32>
    %c0_49 = arith.constant 0 : index
    %c0_50 = arith.constant 0 : index
    %54 = vector.load %arg3[%c0_49, %c0_50] : memref<6x1xf32, #tpu.memory_space<vmem>>, vector<6x1xf32>
    %55 = vector.broadcast %54 : vector<6x1xf32> to vector<6x1408xf32>
    %56 = arith.addf %53, %55 : vector<6x1408xf32>
    %cst_51 = arith.constant 0.000000e+00 : f32
    %57 = vector.broadcast %cst_51 : f32 to vector<6x1408xf32>
    %58 = arith.maximumf %56, %57 : vector<6x1408xf32>
    %59 = arith.truncf %58 : vector<6x1408xf32> to vector<6x1408xbf16>
    %c0_52 = arith.constant 0 : index
    %c0_53 = arith.constant 0 : index
    %60 = vector.load %arg4[%c0_52, %c0_53] : memref<6x1408xbf16, #tpu.memory_space<vmem>>, vector<6x1408xbf16>
    tpu.vector_store %arg4[%c0_52, %c0_53], %59 {strides = array<i32>} : memref<6x1408xbf16, #tpu.memory_space<vmem>>, vector<6x1408xbf16>,
    return
  }
  func.func @transform_0(%arg0: i32) -> (i32, i32) {
    %c0_i32 = arith.constant 0 : i32
    %c0_i32_0 = arith.constant 0 : i32
    return %c0_i32, %arg0 : i32, i32
  }
  func.func @transform_1(%arg0: i32) -> (i32, i32) {
    %c0_i32 = arith.constant 0 : i32
    %c0_i32_0 = arith.constant 0 : i32
    %c0_i32_1 = arith.constant 0 : i32
    return %c0_i32, %c0_i32_0 : i32, i32
  }
  func.func @transform_2(%arg0: i32) -> (i32, i32) {
    %c0_i32 = arith.constant 0 : i32
    %c0_i32_0 = arith.constant 0 : i32
    %c0_i32_1 = arith.constant 0 : i32
    return %c0_i32, %c0_i32_0 : i32, i32
  }
  func.func @transform_3(%arg0: i32) -> (i32, i32) {
    %c0_i32 = arith.constant 0 : i32
    %c0_i32_0 = arith.constant 0 : i32
    return %c0_i32, %arg0 : i32, i32
  }
}

module attributes {stable_mosaic.version = 11 : i64} {
  func.func @conv_relu_pool_kernel(%arg0: i32, %arg1: memref<150x256xbf16, #tpu.memory_space<vmem>>, %arg2: memref<16x54xbf16, #tpu.memory_space<vmem>>, %arg3: memref<16x1xf32, #tpu.memory_space<vmem>>, %arg4: memref<16x256xf32, #tpu.memory_space<vmem>>) attributes {dimension_semantics = [#tpu.dimension_semantics<parallel>], iteration_bounds = array<i64: 1>, scalar_prefetch = 0 : i64, scratch_operands = 0 : i64, tpu.core_type = #tpu.core_type<tc>, window_params = [{transform_indices = @transform_0, window_bounds = array<i64: 150, 256>}, {pipeline_mode = #tpu.pipeline_mode<synchronous>, transform_indices = @transform_1, window_bounds = array<i64: 16, 54>}, {pipeline_mode = #tpu.pipeline_mode<synchronous>, transform_indices = @transform_2, window_bounds = array<i64: 16, 1>}, {transform_indices = @transform_3, window_bounds = array<i64: 16, 256>}]} {
    %c0 = arith.constant 0 : index
    %c0_0 = arith.constant 0 : index
    %0 = vector.load %arg2[%c0, %c0_0] : memref<16x54xbf16, #tpu.memory_space<vmem>>, vector<16x54xbf16>
    %c0_1 = arith.constant 0 : index
    %c0_2 = arith.constant 0 : index
    %1 = vector.load %arg1[%c0_1, %c0_2] : memref<150x256xbf16, #tpu.memory_space<vmem>>, vector<18x256xbf16>
    %c30 = arith.constant 30 : index
    %c0_3 = arith.constant 0 : index
    %2 = vector.load %arg1[%c30, %c0_3] : memref<150x256xbf16, #tpu.memory_space<vmem>>, vector<18x256xbf16>
    %c60 = arith.constant 60 : index
    %c0_4 = arith.constant 0 : index
    %3 = vector.load %arg1[%c60, %c0_4] : memref<150x256xbf16, #tpu.memory_space<vmem>>, vector<18x256xbf16>
    %4 = tpu.concatenate %1, %2, %3 in 0 : vector<18x256xbf16>, vector<18x256xbf16>, vector<18x256xbf16> -> vector<54x256xbf16>
    %cst = arith.constant dense<0.000000e+00> : vector<16x256xf32>
    %5 = tpu.matmul %0, %4, %cst {dimension_numbers = #tpu.dot_dimension_numbers<[1], [0], [0], [1], [0, 0, 1, 1], [], []>} : vector<16x54xbf16>, vector<54x256xbf16>, vector<16x256xf32> -> vector<16x256xf32>
    %c30_5 = arith.constant 30 : index
    %c0_6 = arith.constant 0 : index
    %6 = vector.load %arg1[%c30_5, %c0_6] : memref<150x256xbf16, #tpu.memory_space<vmem>>, vector<18x256xbf16>
    %c60_7 = arith.constant 60 : index
    %c0_8 = arith.constant 0 : index
    %7 = vector.load %arg1[%c60_7, %c0_8] : memref<150x256xbf16, #tpu.memory_space<vmem>>, vector<18x256xbf16>
    %c90 = arith.constant 90 : index
    %c0_9 = arith.constant 0 : index
    %8 = vector.load %arg1[%c90, %c0_9] : memref<150x256xbf16, #tpu.memory_space<vmem>>, vector<18x256xbf16>
    %9 = tpu.concatenate %6, %7, %8 in 0 : vector<18x256xbf16>, vector<18x256xbf16>, vector<18x256xbf16> -> vector<54x256xbf16>
    %cst_10 = arith.constant dense<0.000000e+00> : vector<16x256xf32>
    %10 = tpu.matmul %0, %9, %cst_10 {dimension_numbers = #tpu.dot_dimension_numbers<[1], [0], [0], [1], [0, 0, 1, 1], [], []>} : vector<16x54xbf16>, vector<54x256xbf16>, vector<16x256xf32> -> vector<16x256xf32>
    %11 = arith.maximumf %5, %10 : vector<16x256xf32>
    %c60_11 = arith.constant 60 : index
    %c0_12 = arith.constant 0 : index
    %12 = vector.load %arg1[%c60_11, %c0_12] : memref<150x256xbf16, #tpu.memory_space<vmem>>, vector<18x256xbf16>
    %c90_13 = arith.constant 90 : index
    %c0_14 = arith.constant 0 : index
    %13 = vector.load %arg1[%c90_13, %c0_14] : memref<150x256xbf16, #tpu.memory_space<vmem>>, vector<18x256xbf16>
    %c120 = arith.constant 120 : index
    %c0_15 = arith.constant 0 : index
    %14 = vector.load %arg1[%c120, %c0_15] : memref<150x256xbf16, #tpu.memory_space<vmem>>, vector<18x256xbf16>
    %15 = tpu.concatenate %12, %13, %14 in 0 : vector<18x256xbf16>, vector<18x256xbf16>, vector<18x256xbf16> -> vector<54x256xbf16>
    %cst_16 = arith.constant dense<0.000000e+00> : vector<16x256xf32>
    %16 = tpu.matmul %0, %15, %cst_16 {dimension_numbers = #tpu.dot_dimension_numbers<[1], [0], [0], [1], [0, 0, 1, 1], [], []>} : vector<16x54xbf16>, vector<54x256xbf16>, vector<16x256xf32> -> vector<16x256xf32>
    %17 = arith.maximumf %11, %16 : vector<16x256xf32>
    %c6 = arith.constant 6 : index
    %c0_17 = arith.constant 0 : index
    %18 = vector.load %arg1[%c6, %c0_17] : memref<150x256xbf16, #tpu.memory_space<vmem>>, vector<18x256xbf16>
    %c36 = arith.constant 36 : index
    %c0_18 = arith.constant 0 : index
    %19 = vector.load %arg1[%c36, %c0_18] : memref<150x256xbf16, #tpu.memory_space<vmem>>, vector<18x256xbf16>
    %c66 = arith.constant 66 : index
    %c0_19 = arith.constant 0 : index
    %20 = vector.load %arg1[%c66, %c0_19] : memref<150x256xbf16, #tpu.memory_space<vmem>>, vector<18x256xbf16>
    %21 = tpu.concatenate %18, %19, %20 in 0 : vector<18x256xbf16>, vector<18x256xbf16>, vector<18x256xbf16> -> vector<54x256xbf16>
    %cst_20 = arith.constant dense<0.000000e+00> : vector<16x256xf32>
    %22 = tpu.matmul %0, %21, %cst_20 {dimension_numbers = #tpu.dot_dimension_numbers<[1], [0], [0], [1], [0, 0, 1, 1], [], []>} : vector<16x54xbf16>, vector<54x256xbf16>, vector<16x256xf32> -> vector<16x256xf32>
    %23 = arith.maximumf %17, %22 : vector<16x256xf32>
    %c36_21 = arith.constant 36 : index
    %c0_22 = arith.constant 0 : index
    %24 = vector.load %arg1[%c36_21, %c0_22] : memref<150x256xbf16, #tpu.memory_space<vmem>>, vector<18x256xbf16>
    %c66_23 = arith.constant 66 : index
    %c0_24 = arith.constant 0 : index
    %25 = vector.load %arg1[%c66_23, %c0_24] : memref<150x256xbf16, #tpu.memory_space<vmem>>, vector<18x256xbf16>
    %c96 = arith.constant 96 : index
    %c0_25 = arith.constant 0 : index
    %26 = vector.load %arg1[%c96, %c0_25] : memref<150x256xbf16, #tpu.memory_space<vmem>>, vector<18x256xbf16>
    %27 = tpu.concatenate %24, %25, %26 in 0 : vector<18x256xbf16>, vector<18x256xbf16>, vector<18x256xbf16> -> vector<54x256xbf16>
    %cst_26 = arith.constant dense<0.000000e+00> : vector<16x256xf32>
    %28 = tpu.matmul %0, %27, %cst_26 {dimension_numbers = #tpu.dot_dimension_numbers<[1], [0], [0], [1], [0, 0, 1, 1], [], []>} : vector<16x54xbf16>, vector<54x256xbf16>, vector<16x256xf32> -> vector<16x256xf32>
    %29 = arith.maximumf %23, %28 : vector<16x256xf32>
    %c66_27 = arith.constant 66 : index
    %c0_28 = arith.constant 0 : index
    %30 = vector.load %arg1[%c66_27, %c0_28] : memref<150x256xbf16, #tpu.memory_space<vmem>>, vector<18x256xbf16>
    %c96_29 = arith.constant 96 : index
    %c0_30 = arith.constant 0 : index
    %31 = vector.load %arg1[%c96_29, %c0_30] : memref<150x256xbf16, #tpu.memory_space<vmem>>, vector<18x256xbf16>
    %c126 = arith.constant 126 : index
    %c0_31 = arith.constant 0 : index
    %32 = vector.load %arg1[%c126, %c0_31] : memref<150x256xbf16, #tpu.memory_space<vmem>>, vector<18x256xbf16>
    %33 = tpu.concatenate %30, %31, %32 in 0 : vector<18x256xbf16>, vector<18x256xbf16>, vector<18x256xbf16> -> vector<54x256xbf16>
    %cst_32 = arith.constant dense<0.000000e+00> : vector<16x256xf32>
    %34 = tpu.matmul %0, %33, %cst_32 {dimension_numbers = #tpu.dot_dimension_numbers<[1], [0], [0], [1], [0, 0, 1, 1], [], []>} : vector<16x54xbf16>, vector<54x256xbf16>, vector<16x256xf32> -> vector<16x256xf32>
    %35 = arith.maximumf %29, %34 : vector<16x256xf32>
    %c12 = arith.constant 12 : index
    %c0_33 = arith.constant 0 : index
    %36 = vector.load %arg1[%c12, %c0_33] : memref<150x256xbf16, #tpu.memory_space<vmem>>, vector<18x256xbf16>
    %c42 = arith.constant 42 : index
    %c0_34 = arith.constant 0 : index
    %37 = vector.load %arg1[%c42, %c0_34] : memref<150x256xbf16, #tpu.memory_space<vmem>>, vector<18x256xbf16>
    %c72 = arith.constant 72 : index
    %c0_35 = arith.constant 0 : index
    %38 = vector.load %arg1[%c72, %c0_35] : memref<150x256xbf16, #tpu.memory_space<vmem>>, vector<18x256xbf16>
    %39 = tpu.concatenate %36, %37, %38 in 0 : vector<18x256xbf16>, vector<18x256xbf16>, vector<18x256xbf16> -> vector<54x256xbf16>
    %cst_36 = arith.constant dense<0.000000e+00> : vector<16x256xf32>
    %40 = tpu.matmul %0, %39, %cst_36 {dimension_numbers = #tpu.dot_dimension_numbers<[1], [0], [0], [1], [0, 0, 1, 1], [], []>} : vector<16x54xbf16>, vector<54x256xbf16>, vector<16x256xf32> -> vector<16x256xf32>
    %41 = arith.maximumf %35, %40 : vector<16x256xf32>
    %c42_37 = arith.constant 42 : index
    %c0_38 = arith.constant 0 : index
    %42 = vector.load %arg1[%c42_37, %c0_38] : memref<150x256xbf16, #tpu.memory_space<vmem>>, vector<18x256xbf16>
    %c72_39 = arith.constant 72 : index
    %c0_40 = arith.constant 0 : index
    %43 = vector.load %arg1[%c72_39, %c0_40] : memref<150x256xbf16, #tpu.memory_space<vmem>>, vector<18x256xbf16>
    %c102 = arith.constant 102 : index
    %c0_41 = arith.constant 0 : index
    %44 = vector.load %arg1[%c102, %c0_41] : memref<150x256xbf16, #tpu.memory_space<vmem>>, vector<18x256xbf16>
    %45 = tpu.concatenate %42, %43, %44 in 0 : vector<18x256xbf16>, vector<18x256xbf16>, vector<18x256xbf16> -> vector<54x256xbf16>
    %cst_42 = arith.constant dense<0.000000e+00> : vector<16x256xf32>
    %46 = tpu.matmul %0, %45, %cst_42 {dimension_numbers = #tpu.dot_dimension_numbers<[1], [0], [0], [1], [0, 0, 1, 1], [], []>} : vector<16x54xbf16>, vector<54x256xbf16>, vector<16x256xf32> -> vector<16x256xf32>
    %47 = arith.maximumf %41, %46 : vector<16x256xf32>
    %c72_43 = arith.constant 72 : index
    %c0_44 = arith.constant 0 : index
    %48 = vector.load %arg1[%c72_43, %c0_44] : memref<150x256xbf16, #tpu.memory_space<vmem>>, vector<18x256xbf16>
    %c102_45 = arith.constant 102 : index
    %c0_46 = arith.constant 0 : index
    %49 = vector.load %arg1[%c102_45, %c0_46] : memref<150x256xbf16, #tpu.memory_space<vmem>>, vector<18x256xbf16>
    %c132 = arith.constant 132 : index
    %c0_47 = arith.constant 0 : index
    %50 = vector.load %arg1[%c132, %c0_47] : memref<150x256xbf16, #tpu.memory_space<vmem>>, vector<18x256xbf16>
    %51 = tpu.concatenate %48, %49, %50 in 0 : vector<18x256xbf16>, vector<18x256xbf16>, vector<18x256xbf16> -> vector<54x256xbf16>
    %cst_48 = arith.constant dense<0.000000e+00> : vector<16x256xf32>
    %52 = tpu.matmul %0, %51, %cst_48 {dimension_numbers = #tpu.dot_dimension_numbers<[1], [0], [0], [1], [0, 0, 1, 1], [], []>} : vector<16x54xbf16>, vector<54x256xbf16>, vector<16x256xf32> -> vector<16x256xf32>
    %53 = arith.maximumf %47, %52 : vector<16x256xf32>
    %c0_49 = arith.constant 0 : index
    %c0_50 = arith.constant 0 : index
    %54 = vector.load %arg3[%c0_49, %c0_50] : memref<16x1xf32, #tpu.memory_space<vmem>>, vector<16x1xf32>
    %55 = vector.broadcast %54 : vector<16x1xf32> to vector<16x256xf32>
    %56 = arith.addf %53, %55 : vector<16x256xf32>
    %cst_51 = arith.constant 0.000000e+00 : f32
    %57 = vector.broadcast %cst_51 : f32 to vector<16x256xf32>
    %58 = arith.maximumf %56, %57 : vector<16x256xf32>
    %c0_52 = arith.constant 0 : index
    %c0_53 = arith.constant 0 : index
    %59 = vector.load %arg4[%c0_52, %c0_53] : memref<16x256xf32, #tpu.memory_space<vmem>>, vector<16x256xf32>
    tpu.vector_store %arg4[%c0_52, %c0_53], %58 {strides = array<i32>} : memref<16x256xf32, #tpu.memory_space<vmem>>, vector<16x256xf32>,
    return
  }
  func.func @transform_0(%arg0: i32) -> (i32, i32) {
    %c0_i32 = arith.constant 0 : i32
    %c0_i32_0 = arith.constant 0 : i32
    return %c0_i32, %arg0 : i32, i32
  }
  func.func @transform_1(%arg0: i32) -> (i32, i32) {
    %c0_i32 = arith.constant 0 : i32
    %c0_i32_0 = arith.constant 0 : i32
    %c0_i32_1 = arith.constant 0 : i32
    return %c0_i32, %c0_i32_0 : i32, i32
  }
  func.func @transform_2(%arg0: i32) -> (i32, i32) {
    %c0_i32 = arith.constant 0 : i32
    %c0_i32_0 = arith.constant 0 : i32
    %c0_i32_1 = arith.constant 0 : i32
    return %c0_i32, %c0_i32_0 : i32, i32
  }
  func.func @transform_3(%arg0: i32) -> (i32, i32) {
    %c0_i32 = arith.constant 0 : i32
    %c0_i32_0 = arith.constant 0 : i32
    return %c0_i32, %arg0 : i32, i32
  }
}

module attributes {stable_mosaic.version = 11 : i64} {
  func.func @mlp_kernel(%arg0: i32, %arg1: memref<8x1536xf32, #tpu.memory_space<vmem>>, %arg2: memref<1536x128xf32, #tpu.memory_space<vmem>>, %arg3: memref<1x128xf32, #tpu.memory_space<vmem>>, %arg4: memref<128x128xf32, #tpu.memory_space<vmem>>, %arg5: memref<1x128xf32, #tpu.memory_space<vmem>>, %arg6: memref<128x128xf32, #tpu.memory_space<vmem>>, %arg7: memref<1x128xf32, #tpu.memory_space<vmem>>, %arg8: memref<8x128xf32, #tpu.memory_space<vmem>>) attributes {dimension_semantics = [#tpu.dimension_semantics<parallel>], iteration_bounds = array<i64: 1>, scalar_prefetch = 0 : i64, scratch_operands = 0 : i64, tpu.core_type = #tpu.core_type<tc>, window_params = [{transform_indices = @transform_0, window_bounds = array<i64: 8, 1536>}, {pipeline_mode = #tpu.pipeline_mode<synchronous>, transform_indices = @transform_1, window_bounds = array<i64: 1536, 128>}, {pipeline_mode = #tpu.pipeline_mode<synchronous>, transform_indices = @transform_2, window_bounds = array<i64: 1, 128>}, {pipeline_mode = #tpu.pipeline_mode<synchronous>, transform_indices = @transform_3, window_bounds = array<i64: 128, 128>}, {pipeline_mode = #tpu.pipeline_mode<synchronous>, transform_indices = @transform_4, window_bounds = array<i64: 1, 128>}, {pipeline_mode = #tpu.pipeline_mode<synchronous>, transform_indices = @transform_5, window_bounds = array<i64: 128, 128>}, {pipeline_mode = #tpu.pipeline_mode<synchronous>, transform_indices = @transform_6, window_bounds = array<i64: 1, 128>}, {transform_indices = @transform_7, window_bounds = array<i64: 8, 128>}]} {
    %c0 = arith.constant 0 : index
    %c0_0 = arith.constant 0 : index
    %0 = vector.load %arg1[%c0, %c0_0] : memref<8x1536xf32, #tpu.memory_space<vmem>>, vector<8x1536xf32>
    %c0_1 = arith.constant 0 : index
    %c0_2 = arith.constant 0 : index
    %1 = vector.load %arg2[%c0_1, %c0_2] : memref<1536x128xf32, #tpu.memory_space<vmem>>, vector<1536x128xf32>
    %cst = arith.constant dense<0.000000e+00> : vector<8x128xf32>
    %2 = tpu.matmul %0, %1, %cst {dimension_numbers = #tpu.dot_dimension_numbers<[1], [0], [0], [1], [0, 0, 1, 1], [], []>} : vector<8x1536xf32>, vector<1536x128xf32>, vector<8x128xf32> -> vector<8x128xf32>
    %c0_3 = arith.constant 0 : index
    %c0_4 = arith.constant 0 : index
    %3 = vector.load %arg3[%c0_3, %c0_4] : memref<1x128xf32, #tpu.memory_space<vmem>>, vector<1x128xf32>
    %4 = vector.broadcast %3 : vector<1x128xf32> to vector<8x128xf32>
    %5 = arith.addf %2, %4 : vector<8x128xf32>
    %cst_5 = arith.constant 0.000000e+00 : f32
    %6 = vector.broadcast %cst_5 : f32 to vector<8x128xf32>
    %7 = arith.maximumf %5, %6 : vector<8x128xf32>
    %c0_6 = arith.constant 0 : index
    %c0_7 = arith.constant 0 : index
    %8 = vector.load %arg4[%c0_6, %c0_7] : memref<128x128xf32, #tpu.memory_space<vmem>>, vector<128x128xf32>
    %cst_8 = arith.constant dense<0.000000e+00> : vector<8x128xf32>
    %9 = tpu.matmul %7, %8, %cst_8 {dimension_numbers = #tpu.dot_dimension_numbers<[1], [0], [0], [1], [0, 0, 1, 1], [], []>} : vector<8x128xf32>, vector<128x128xf32>, vector<8x128xf32> -> vector<8x128xf32>
    %c0_9 = arith.constant 0 : index
    %c0_10 = arith.constant 0 : index
    %10 = vector.load %arg5[%c0_9, %c0_10] : memref<1x128xf32, #tpu.memory_space<vmem>>, vector<1x128xf32>
    %11 = vector.broadcast %10 : vector<1x128xf32> to vector<8x128xf32>
    %12 = arith.addf %9, %11 : vector<8x128xf32>
    %cst_11 = arith.constant 0.000000e+00 : f32
    %13 = vector.broadcast %cst_11 : f32 to vector<8x128xf32>
    %14 = arith.maximumf %12, %13 : vector<8x128xf32>
    %c0_12 = arith.constant 0 : index
    %c0_13 = arith.constant 0 : index
    %15 = vector.load %arg6[%c0_12, %c0_13] : memref<128x128xf32, #tpu.memory_space<vmem>>, vector<128x128xf32>
    %cst_14 = arith.constant dense<0.000000e+00> : vector<8x128xf32>
    %16 = tpu.matmul %14, %15, %cst_14 {dimension_numbers = #tpu.dot_dimension_numbers<[1], [0], [0], [1], [0, 0, 1, 1], [], []>} : vector<8x128xf32>, vector<128x128xf32>, vector<8x128xf32> -> vector<8x128xf32>
    %c0_15 = arith.constant 0 : index
    %c0_16 = arith.constant 0 : index
    %17 = vector.load %arg7[%c0_15, %c0_16] : memref<1x128xf32, #tpu.memory_space<vmem>>, vector<1x128xf32>
    %18 = vector.broadcast %17 : vector<1x128xf32> to vector<8x128xf32>
    %19 = arith.addf %16, %18 : vector<8x128xf32>
    %c0_17 = arith.constant 0 : index
    %c0_18 = arith.constant 0 : index
    %20 = vector.load %arg8[%c0_17, %c0_18] : memref<8x128xf32, #tpu.memory_space<vmem>>, vector<8x128xf32>
    tpu.vector_store %arg8[%c0_17, %c0_18], %19 {strides = array<i32>} : memref<8x128xf32, #tpu.memory_space<vmem>>, vector<8x128xf32>,
    return
  }
  func.func @transform_0(%arg0: i32) -> (i32, i32) {
    %c0_i32 = arith.constant 0 : i32
    %c0_i32_0 = arith.constant 0 : i32
    return %arg0, %c0_i32 : i32, i32
  }
  func.func @transform_1(%arg0: i32) -> (i32, i32) {
    %c0_i32 = arith.constant 0 : i32
    %c0_i32_0 = arith.constant 0 : i32
    %c0_i32_1 = arith.constant 0 : i32
    return %c0_i32, %c0_i32_0 : i32, i32
  }
  func.func @transform_2(%arg0: i32) -> (i32, i32) {
    %c0_i32 = arith.constant 0 : i32
    %c0_i32_0 = arith.constant 0 : i32
    %c0_i32_1 = arith.constant 0 : i32
    return %c0_i32, %c0_i32_0 : i32, i32
  }
  func.func @transform_3(%arg0: i32) -> (i32, i32) {
    %c0_i32 = arith.constant 0 : i32
    %c0_i32_0 = arith.constant 0 : i32
    %c0_i32_1 = arith.constant 0 : i32
    return %c0_i32, %c0_i32_0 : i32, i32
  }
  func.func @transform_4(%arg0: i32) -> (i32, i32) {
    %c0_i32 = arith.constant 0 : i32
    %c0_i32_0 = arith.constant 0 : i32
    %c0_i32_1 = arith.constant 0 : i32
    return %c0_i32, %c0_i32_0 : i32, i32
  }
  func.func @transform_5(%arg0: i32) -> (i32, i32) {
    %c0_i32 = arith.constant 0 : i32
    %c0_i32_0 = arith.constant 0 : i32
    %c0_i32_1 = arith.constant 0 : i32
    return %c0_i32, %c0_i32_0 : i32, i32
  }
  func.func @transform_6(%arg0: i32) -> (i32, i32) {
    %c0_i32 = arith.constant 0 : i32
    %c0_i32_0 = arith.constant 0 : i32
    %c0_i32_1 = arith.constant 0 : i32
    return %c0_i32, %c0_i32_0 : i32, i32
  }
  func.func @transform_7(%arg0: i32) -> (i32, i32) {
    %c0_i32 = arith.constant 0 : i32
    %c0_i32_0 = arith.constant 0 : i32
    return %arg0, %c0_i32 : i32, i32
  }
}

</mosaic_0001>

<bundles_post_ra>
// kernel: pc_discriminator_forward.3
= control target key start
LH: loop header
LB: loop body
LE: loop exit
PB: predicated region body
PF: predicated region fallthrough
CT: control target
= control target key end

     0   :  { %s5289_s12 = smov 0   ;;  %s5291_s13 = smov 0   ;;  %s7038_s0 = inlined_call_operand.vmem [shape: bf16[25,2816], index: 0, kind: input, shape index: {}]   ;;  %s7039_s1 = inlined_call_operand.vmem [shape: bf16[6,9], index: 1, kind: input, shape index: {}]   ;;  %s7040_s2 = inlined_call_operand.vmem [shape: f32[6,1], index: 2, kind: input, shape index: {}]   ;;  %s7041_s3 = inlined_call_operand.vmem [shape: bf16[6,2816], index: 3, kind: output, shape index: {}]  }
   0x1   :  { %s5293_s14 = smov 0  }
   0x2 LB: > { %s4814_s15 = sadd.s32 4294967295, %s5263_s14   ;;  %s5306_s16 = sadd.s32 1, %s5263_s14   ;;  %s5263_s14 = sphi %s5293_s14, %s7241_s14   ;;  %s5259_s13 = sphi %s5291_s13, %s7240_s13   ;;  %s5255_s12 = sphi %s5289_s12, %s7239_s12  }
   0x3   : > { %s17_s17 = ssub.s32 %s5263_s14, %s5306_s16  ;;  %s20_s18 = sadd.s32 1, %s5259_s13 }
   0x4   : > { %p18_p0 = scmp.eq.s32.totalorder %s17_s17, 0  ;;  %p27_p1 = scmp.ne.s32.totalorder %s5259_s13, %s5255_s12 }
   0x5   : > { %p28_p2 = scmp.eq.s32.totalorder %s5263_s14, 0  ;;  %p4817_p4 = scmp.ge.s32.totalorder %s5263_s14, 2 }
   0x6   : > { %s5315_s19 = scalar_select %p18_p0, %s5259_s13, %s20_s18  }
   0x7   : > { %p29_p3 = por %p28_p2, %p27_p1  ;;  %127 = sbr.rel (%p4817_p4) target bundleno = 31 (0x1f), region = 24 }
   0xe   : > { %130 = sbr.rel (!%p29_p3) target bundleno = 31 (0x1f), region = 28  ;;  %s132_s20 = sand.u32 (%p29_p3), 1, %s5259_s13  }
   0xf   : > { %s5001_s21 = smul.u32 (%p29_p3), 44, %s5263_s14 }
  0x10   : > { %s5080_s22 = smul.u32 (%p29_p3), 176, %s132_s20 }
  0x11   : > { %s5323_s25 = scalar_lea.vmem (%p29_p3), %s7038_s0, %s5001_s21 }
  0x12   : > { %v152_v0 = vld [vmem:[%s5323_s25] sm:$0xff] (%p29_p3)  ;;  %v154_v1 = vld [vmem:[%s5323_s25 + $0x8] sm:$0xff] (%p29_p3)  ;;  %v156_v2 = vld [vmem:[%s5323_s25 + $0x10] sm:$0xff] (%p29_p3)  ;;  %s5328_s26 = scalar_lea.vmem (%p29_p3), [#allocation2], %s5080_s22 }
  0x13   : > { %153 = vst [vmem:[%s5328_s26] sm:$0xff] (%p29_p3), %v152_v0  ;;  %155 = vst [vmem:[%s5328_s26 + $0x8] sm:$0xff] (%p29_p3), %v154_v1  ;;  %v158_v3 = vld [vmem:[%s5323_s25 + $0x18] sm:$0xff] (%p29_p3)  ;;  %v160_v4 = vld [vmem:[%s5323_s25 + $0x20] sm:$0xff] (%p29_p3) }
  0x14   : > { %157 = vst [vmem:[%s5328_s26 + $0x10] sm:$0xff] (%p29_p3), %v156_v2  ;;  %v162_v5 = vld [vmem:[%s5323_s25 + $0x58] sm:$0xff] (%p29_p3)  ;;  %159 = vst [vmem:[%s5328_s26 + $0x18] sm:$0xff] (%p29_p3), %v158_v3  ;;  %v164_v6 = vld [vmem:[%s5323_s25 + $0x60] sm:$0xff] (%p29_p3) }
  0x15   : > { %161 = vst [vmem:[%s5328_s26 + $0x20] sm:$0xff] %v160_v4  ;;  %163 = vst [vmem:[%s5328_s26 + $0x2c] sm:$0xff] %v162_v5  ;;  %v166_v7 = vld [vmem:[%s5323_s25 + $0x68] sm:$0xff]  ;;  %v168_v8 = vld [vmem:[%s5323_s25 + $0x70] sm:$0xff] }
  0x16   : > { %165 = vst [vmem:[%s5328_s26 + $0x34] sm:$0xff] %v164_v6  ;;  %167 = vst [vmem:[%s5328_s26 + $0x3c] sm:$0xff] %v166_v7  ;;  %v170_v9 = vld [vmem:[%s5323_s25 + $0x78] sm:$0xff]  ;;  %v172_v10 = vld [vmem:[%s5323_s25 + $0xb0] sm:$0xff] }
  0x17   : > { %169 = vst [vmem:[%s5328_s26 + $0x44] sm:$0xff] %v168_v8  ;;  %v174_v11 = vld [vmem:[%s5323_s25 + $0xb8] sm:$0xff]  ;;  %171 = vst [vmem:[%s5328_s26 + $0x4c] sm:$0xff] %v170_v9  ;;  %v176_v12 = vld [vmem:[%s5323_s25 + $0xc0] sm:$0xff] }
  0x18   : > { %173 = vst [vmem:[%s5328_s26 + $0x58] sm:$0xff] %v172_v10  ;;  %175 = vst [vmem:[%s5328_s26 + $0x60] sm:$0xff] %v174_v11  ;;  %v178_v13 = vld [vmem:[%s5323_s25 + $0xc8] sm:$0xff]  ;;  %v180_v14 = vld [vmem:[%s5323_s25 + $0xd0] sm:$0xff] }
  0x19   : > { %177 = vst [vmem:[%s5328_s26 + $0x68] sm:$0xff] %v176_v12  ;;  %179 = vst [vmem:[%s5328_s26 + $0x70] sm:$0xff] %v178_v13  ;;  %v182_v15 = vld [vmem:[%s5323_s25 + $0x108] sm:$0xff]  ;;  %v184_v16 = vld [vmem:[%s5323_s25 + $0x110] sm:$0xff] }
  0x1a   : > { %181 = vst [vmem:[%s5328_s26 + $0x78] sm:$0xff] %v180_v14  ;;  %v186_v17 = vld [vmem:[%s5323_s25 + $0x118] sm:$0xff]  ;;  %183 = vst [vmem:[%s5328_s26 + $0x84] sm:$0xff] %v182_v15  ;;  %v188_v18 = vld [vmem:[%s5323_s25 + $0x120] sm:$0xff] }
  0x1b   : > { %185 = vst [vmem:[%s5328_s26 + $0x8c] sm:$0xff] %v184_v16  ;;  %187 = vst [vmem:[%s5328_s26 + $0x94] sm:$0xff] %v186_v17  ;;  %v190_v19 = vld [vmem:[%s5323_s25 + $0x128] sm:$0xff]  ;;  %v4821_v21 = vld [vmem:[%s5323_s25 + $0x80] sm:$0xf] }
  0x1c   : > { %v4819_v20 = vld [vmem:[%s5323_s25 + $0x28] sm:$0xf]  ;;  %189 = vst [vmem:[%s5328_s26 + $0x9c] sm:$0xff] %v188_v18  ;;  %191 = vst [vmem:[%s5328_s26 + $0xa4] sm:$0xff] %v190_v19  ;;  %v4823_v22 = vld [vmem:[%s5323_s25 + $0xd8] sm:$0xf] }
  0x1d   : > { %4820 = vst [vmem:[%s5328_s26 + $0x28] sm:$0xf] %v4819_v20  ;;  %v4825_v23 = vld [vmem:[%s5323_s25 + $0x130] sm:$0xf]  ;;  %4822 = vst [vmem:[%s5328_s26 + $0x54] sm:$0xf] %v4821_v21 }
  0x1e   : > { %4824 = vst [vmem:[%s5328_s26 + $0x80] sm:$0xf] %v4823_v22  ;;  %4826 = vst [vmem:[%s5328_s26 + $0xac] sm:$0xf] %v4825_v23 }
  0x1f PF: > { %p4827_p5 = scmp.ge.s32.totalorder %s5263_s14, 1  ;;  %p211_p6 = scmp.lt.s32.totalorder %s5263_s14, 3 }
  0x21   : > { %p212_p7 = pnand %p4827_p5, %p211_p6 }
  0x23   : > { %215 = sbr.rel (%p212_p7) target bundleno = 551 (0x227), region = 54 }
  0x2a   : > { %s218_s27 = sand.u32 1, %s5255_s12   ;;  %vm448_vm0 = vcmask 1043456   ;;  %vm449_vm1 = vcmask 1044480   ;;  %vm396_vm2 = vcmask 1041408   ;;  %v5265_v24 = vmov 65535   ;;  %s242_s11 = smul.u32 11, %s4814_s15 }
  0x2b   : > { %s5081_s28 = smul.u32 176, %s218_s27  ;;  %v450_v25 = vsel %vm448_vm0, 4294967295, %v5265_v24  ;;  %v7046_v26 = vmov 0   ;;  %vm397_vm3 = vsmask.f32 1280  ;;  %vm410_vm4 = vcmask 1042432  }
  0x2c   : > { %506 = vmatprep.mubr.bf16.mxu0 %v7046_v26  ;;  %547 = vmatprep.mubr.bf16.mxu1 %v7046_v26  ;;  %v5380_v27 = vsel %vm449_vm1, %v450_v25, 0  ;;  %vm5401_vm5 = vmand %vm396_vm2, %vm397_vm3  ;;  %vm444_vm6 = vcmask 72704   ;;  %v5476_v20 = vld [vmem:[%s7039_s1] sm:$0x7]  ;;  %vm5268_vm7 = vmmov 0   ;;  %p243_p8 = scmp.lt.s32.totalorder %s242_s11, 21 }
  0x2d   : > { %5110 = vset.pattern.permute.xlu0 %v7046_v26  ;;  %s5383_s29 = scalar_lea.vmem [#allocation2], %s5081_s28 }
  0x2e   : > { %v250_v28 = vld [vmem:[%s5383_s29] sm:$0x33]  ;;  %v256_v29 = vld [vmem:[%s5383_s29] sm:$0xcc]  ;;  %v262_v30 = vld [vmem:[%s5383_s29 + $0x2c] sm:$0x66] }
  0x2f   : > { %v5388_v31 = vcombine.high %v250_v28, %v250_v28  ;;  %v5390_v32 = vcombine.high %v256_v29, %v256_v29  ;;  %v5392_v33 = vcombine.high %v262_v30, %v262_v30  ;;  %v251_v34 = vld [vmem:[%s5383_s29 + $0x8] sm:$0x33]  ;;  %v257_v35 = vld [vmem:[%s5383_s29 + $0x8] sm:$0xcc]  ;;  %v263_v36 = vld [vmem:[%s5383_s29 + $0x34] sm:$0x66]  ;;  %v5397_v37 = vcombine.low %v250_v28, %v250_v28 }
  0x30   : > { %v5405_v39 = vcombine.high %v251_v34, %v251_v34  ;;  %v5407_v40 = vcombine.high %v257_v35, %v257_v35  ;;  %v5409_v41 = vcombine.high %v263_v36, %v263_v36  ;;  %v5411_v42 = vcombine.low %v256_v29, %v256_v29  ;;  %v252_v59 = vld [vmem:[%s5383_s29 + $0x10] sm:$0x33]  ;;  %v258_v4 = vld [vmem:[%s5383_s29 + $0x10] sm:$0xcc]  ;;  %v264_v7 = vld [vmem:[%s5383_s29 + $0x3c] sm:$0x66] }
  0x31   : > { %7134 = vst [vmem:[#allocation3_spill] sm:$0xff] %v5392_v33  ;;  %v336_v43 = vrot.slane %v5390_v32, 1  ;;  %v386_v44 = vrot.slane %v5392_v33, 6  ;;  %v1795_v46 = vshll.u32 %v5388_v31, 16  ;;  %v5427_v54 = vcombine.low %v262_v30, %v262_v30  ;;  %v253_v10 = vld [vmem:[%s5383_s29 + $0x18] sm:$0x33] }
  0x32   : > { %v338_v47 = vrot.slane %v5407_v40, 1  ;;  %v388_v48 = vrot.slane %v5409_v41, 6  ;;  %v1809_v50 = vshll.u32 %v5405_v39, 16  ;;  %v335_v53 = vrot.slane %v5411_v42, 1  ;;  %v259_v23 = vld [vmem:[%s5383_s29 + $0x18] sm:$0xcc] }
  0x33   : > { %v400_v51 = vsel %vm5401_vm5, %v5388_v31, %v336_v43  ;;  %v5424_v52 = vrot.slane %v1795_v46, 1  ;;  %v385_v62 = vrot.slane %v5427_v54, 6  ;;  %v1788_v1 = vshll.u32 %v5397_v37, 16  ;;  %v265_v24 = vld [vmem:[%s5383_s29 + $0x44] sm:$0x66]  ;;  %s7243_s11 = smov (!%p243_p8, %s242_s11), 21 }
  0x34   : > { %v416_v55 = vsel %vm410_vm4, %v400_v51, %v386_v44  ;;  %v402_v56 = vsel %vm5401_vm5, %v5405_v39, %v338_v47  ;;  %v5433_v57 = vrot.slane %v1809_v50, 1  ;;  %v399_v63 = vsel %vm5401_vm5, %v5397_v37, %v335_v53  ;;  %v254_v46 = vld [vmem:[%s5383_s29 + $0x20] sm:$0x33]  ;;  %v260_v47 = vld [vmem:[%s5383_s29 + $0x20] sm:$0xcc]  ;;  %s4828_s12 = sshll.u32 %s7243_s11, 2 }
  0x35   : > { %v454_v60 = vand.u32 %v5380_v27, %v416_v55  ;;  %v422_v61 = vsel %vm410_vm4, %v402_v56, %v388_v48  ;;  %v5445_v2 = vcombine.low %v251_v34, %v251_v34  ;;  %v5447_v3 = vcombine.low %v257_v35, %v257_v35  ;;  %v5511_v55 = vld [vmem:[%s5383_s29 + $0x28] ss:$0 sps:$4 sm:$0xcc]   ;;  %s7008_s17 = scalar_lea.vmem %s7041_s3, %s4828_s12 }
  0x36   : > { %v458_v0 = vand.u32 %v5380_v27, %v422_v61  ;;  %v413_v5 = vsel %vm410_vm4, %v399_v63, %v385_v62  ;;  %v5451_v6 = vcombine.low %v263_v36, %v263_v36  ;;  %v5454_v8 = vcombine.low %v252_v59, %v252_v59  ;;  %v266_v62 = vld [vmem:[%s5383_s29 + $0x4c] sm:$0x66]  ;;  %v5521_v63 = vld [vmem:[%s5383_s29 + $0x54] ss:$0 sps:$4 sm:$0x66]  }
  0x37   : > { %474 = vmatprep.subr.bf16.mxu0 %v454_v60  ;;  %v5456_v9 = vcombine.high %v252_v59, %v252_v59  ;;  %v452_v11 = vand.u32 %v5380_v27, %v413_v5  ;;  %v5460_v12 = vrot.slane %v1788_v1, 1  ;;  %v337_v13 = vrot.slane %v5447_v3, 1 }
  0x38   : > { %7137 = vst [vmem:[#allocation4_spill] sm:$0xff] %v5454_v8  ;;  %515 = vmatprep.subr.bf16.mxu1 %v458_v0  ;;  %v387_v15 = vrot.slane %v5451_v6, 6  ;;  %v1802_v16 = vshll.u32 %v5445_v2, 16  ;;  %v5466_v17 = vcombine.low %v258_v4, %v258_v4  ;;  %v5468_v18 = vcombine.high %v258_v4, %v258_v4 }
  0x39   : > { %475 = vmatpush1.bf16.msra.mxu0 %v452_v11  ;;  %v401_v19 = vsel %vm5401_vm5, %v5445_v2, %v337_v13  ;;  %v5478_v21 = vcombine.low %v264_v7, %v264_v7  ;;  %v5480_v22 = vcombine.high %v264_v7, %v264_v7  ;;  %v5484_v25 = vcombine.low %v253_v10, %v253_v10  ;;  %v5141_v7 = vld [vmem:[%s5383_s29 + $0x28] ss:$0 sps:$4 sm:$0x33]  }
  0x3a   : > { %v419_v28 = vsel %vm410_vm4, %v401_v19, %v387_v15  ;;  %v5487_v29 = vrot.slane %v1802_v16, 1  ;;  %v340_v30 = vrot.slane %v5468_v18, 1  ;;  %v339_v34 = vrot.slane %v5466_v17, 1 }
  0x3b   : > { %7138 = vst [vmem:[#allocation5_spill] sm:$0xff] %v5484_v25  ;;  %v456_v35 = vand.u32 %v5380_v27, %v419_v28  ;;  %v390_v36 = vrot.slane %v5480_v22, 6  ;;  %v389_v43 = vrot.slane %v5478_v21, 6  ;;  %v5494_v44 = vcombine.high %v253_v10, %v253_v10 }
  0x3c   : > { %4862 = vmatmul.mubr.msk.bf16.vlgmr.msra.gmra.mrb[0].mxu0 %vm444_vm6, %v5476_v20  ;;  %v404_v48 = vsel %vm5401_vm5, %v5456_v9, %v340_v30  ;;  %v403_v50 = vsel %vm5401_vm5, %v5454_v8, %v339_v34  ;;  %v5506_v51 = vcombine.low %v259_v23, %v259_v23  ;;  %v5508_v53 = vcombine.high %v259_v23, %v259_v23 }
  0x3d   : > { %7139 = vst [vmem:[#allocation6_spill] sm:$0xff] %v5494_v44  ;;  %516 = vmatpush1.bf16.msra.mxu1 %v456_v35  ;;  %v428_v56 = vsel %vm410_vm4, %v404_v48, %v390_v36  ;;  %v425_v59 = vsel %vm410_vm4, %v403_v50, %v389_v43  ;;  %v5515_v60 = vcombine.low %v265_v24, %v265_v24  ;;  %v395_v35 = vrot.slane %v5521_v63, 6  ;;  %v5559_v50 = vld [vmem:[%s5383_s29 + $0x30] ss:$44 sps:$4 sm:$0x18]  }
  0x3e   : > { %v5517_v61 = vcombine.high %v265_v24, %v265_v24  ;;  %v462_v0 = vand.u32 %v5380_v27, %v428_v56  ;;  %v460_v1 = vand.u32 %v5380_v27, %v425_v59  ;;  %v342_v4 = vrot.slane %v5508_v53, 1  ;;  %588 = vmatprep.mubr.bf16.mxu0 %v7046_v26 }
  0x3f   : > { %v341_v5 = vrot.slane %v5506_v51, 1  ;;  %v391_v11 = vrot.slane %v5515_v60, 6  ;;  %v5531_v13 = vcombine.low %v254_v46, %v254_v46  ;;  %v5533_v15 = vcombine.high %v254_v46, %v254_v46 }
  0x40   : > { %v392_v10 = vrot.slane %v5517_v61, 6  ;;  %4863 = vmatmul.mubr.msk.bf16.vlgmr.msra.gmra.mrb[0].mxu1 %vm444_vm6, %v5476_v20  ;;  %556 = vmatprep.subr.bf16.mxu0 %v462_v0  ;;  %v406_v16 = vsel %vm5401_vm5, %v5494_v44, %v342_v4  ;;  %v5543_v23 = vcombine.low %v260_v47, %v260_v47  ;;  %v345_v24 = vrot.slane %v5511_v55, 1 }
  0x41   : > { %7140 = vst [vmem:[#allocation7_spill] sm:$0xff] %v5531_v13  ;;  %7141 = vst [vmem:[#allocation8_spill] sm:$0xff] %v5533_v15  ;;  %v405_v19 = vsel %vm5401_vm5, %v5484_v25, %v341_v5  ;;  %557 = vmatpush1.bf16.msra.mxu0 %v460_v1  ;;  %629 = vmatprep.mubr.bf16.mxu1 %v7046_v26  ;;  %v5549_v34 = vcombine.high %v260_v47, %v260_v47  ;;  %v740_v0 = vshrl.u32 %v5390_v32, 16 }
  0x42   : > { %v434_v28 = vsel %vm410_vm4, %v406_v16, %v392_v10  ;;  %v431_v30 = vsel %vm410_vm4, %v405_v19, %v391_v11  ;;  %v5554_v46 = vcombine.low %v266_v62, %v266_v62  ;;  %v5556_v48 = vcombine.high %v266_v62, %v266_v62 }
  0x43   : > { %v466_v36 = vand.u32 %v5380_v27, %v434_v28  ;;  %v464_v43 = vand.u32 %v5380_v27, %v431_v30  ;;  %v344_v56 = vrot.slane %v5549_v34, 1  ;;  %v343_v59 = vrot.slane %v5543_v23, 1 }
  0x44   : > { %v409_v47 = vsel %vm5401_vm5, %v5141_v7, %v345_v24  ;;  %4864 = vmatmul.mubr.msk.bf16.vlgmr.msra.gmra.mrb[4].mxu0 %vm444_vm6, %v5476_v20  ;;  %v394_v1 = vrot.slane %v5556_v48, 6  ;;  %v393_v62 = vrot.slane %v5554_v46, 6  ;;  %v743_v5 = vshll.u32 %v5390_v32, 16 }
  0x45   : > { %597 = vmatprep.subr.bf16.mxu1 %v466_v36  ;;  %v443_v4 = vsel %vm410_vm4, %v409_v47, %v395_v35  ;;  %v408_v7 = vsel %vm5401_vm5, %v5533_v15, %v344_v56  ;;  %v407_v10 = vsel %vm5401_vm5, %v5531_v13, %v343_v59  ;;  %670 = vmatprep.mubr.bf16.mxu0 %v7046_v26  ;;  %v742_v16 = vrot.slane %v740_v0, 2  ;;  %v5587_v35 = vld [vmem:[%s5383_s29 + $0x2c] ss:$44 sps:$4 sm:$0x18]  }
  0x46   : > { %598 = vmatpush1.bf16.msra.mxu1 %v464_v43  ;;  %v472_v11 = vand.u32 %v5380_v27, %v443_v4  ;;  %v440_v19 = vsel %vm410_vm4, %v408_v7, %v394_v1  ;;  %v437_v24 = vsel %vm410_vm4, %v407_v10, %v393_v62  ;;  %v7042_v28 = vmov 0.0  }
  0x47   : > { %5026 = vmatprep.subr.bf16.mxu1 %v7042_v28  ;;  %v745_v32 = vrot.slane %v743_v5, 3  ;;  %v5584_v30 = vshrl.u32 %v5392_v33, 16  ;;  %v470_v36 = vand.u32 %v5380_v27, %v440_v19  ;;  %v468_v43 = vand.u32 %v5380_v27, %v437_v24 }
  0x48   : > { %v5592_v56 = vshll.u32 %v5392_v33, 16  ;;  %v971_v59 = vshrl.u32 %v5559_v50, 16  ;;  %v973_v1 = vshll.u32 %v5559_v50, 16  ;;  %v732_v62 = vshrl.u32 %v5411_v42, 16 }
  0x49   : > { %4865 = vmatmul.mubr.msk.bf16.vlgmr.msra.gmra.mrb[4].mxu1 %vm444_vm6, %v5476_v20  ;;  %v746_v47 = vor.u32 %v745_v32, %v742_v16  ;;  %v840_v0 = vrot.slane %v5584_v30, 7  ;;  %638 = vmatprep.subr.bf16.mxu0 %v470_v36  ;;  %v735_v4 = vshll.u32 %v5411_v42, 16  ;;  %v5602_v5 = vshrl.u32 %v5427_v54, 16 }
  0x4a   : > { %5027 = vmatpush3.bf16.msra.mxu1 %v472_v11  ;;  %v5605_v7 = vshll.u32 %v5427_v54, 16  ;;  %v964_v10 = vshrl.u32 %v5587_v35, 16  ;;  %639 = vmatpush1.bf16.msra.mxu0 %v468_v43  ;;  %v975_v19 = vrot.slane %v973_v1, 1  ;;  %v734_v11 = vrot.slane %v732_v62, 2 }
  0x4b   : > { %5028 = vmatprep.mubr.msk.bf16.mxu1 %vm5268_vm7, %v7042_v28  ;;  %v843_v16 = vor.u32 %v5592_v56, %v840_v0  ;;  %v966_v42 = vshll.u32 %v5587_v35, 16  ;;  %v737_v24 = vrot.slane %v735_v4, 3  ;;  %v833_v32 = vrot.slane %v5602_v5, 7  ;;  %v5621_v0 = vld [vmem:[%s5383_s29 + $0x38] ss:$44 sps:$4 sm:$0x18]  }
  0x4c   : > { %v756_v36 = vshrl.u32 %v5407_v40, 16  ;;  %v759_v14 = vshll.u32 %v5407_v40, 16  ;;  %v976_v49 = vor.u32 %v975_v19, %v971_v59  ;;  %v5618_v45 = vshrl.u32 %v5409_v41, 16 }
  0x4d   : > { %v1041_v43 = vsel %vm5401_vm5, %v746_v47, %v843_v16  ;;  %v968_v58 = vrot.slane %v966_v42, 1  ;;  %4866 = vmatmul.mubr.msk.bf16.vlgmr.msra.gmra.mrb[8].mxu0 %vm444_vm6, %v5476_v20  ;;  %v738_v1 = vor.u32 %v737_v24, %v734_v11  ;;  %v836_v62 = vor.u32 %v5605_v7, %v833_v32  ;;  %v5636_v24 = vld [vmem:[%s5383_s29 + $0x34] ss:$44 sps:$4 sm:$0x18]  }
  0x4e   : > { %v758_v4 = vrot.slane %v756_v36, 2  ;;  %v761_v28 = vrot.slane %v759_v14, 3  ;;  %v1056_v40 = vsel %vm410_vm4, %v1041_v43, %v976_v49  ;;  %v854_v47 = vrot.slane %v5618_v45, 7  ;;  %1138 = vmatprep.mubr.bf16.mxu0 %v7046_v26 }
  0x4f   : > { %v969_v59 = vor.u32 %v968_v58, %v964_v10  ;;  %v5629_v16 = vshll.u32 %v5409_v41, 16  ;;  %v1086_v19 = vand.u32 %v1056_v40, %v5380_v27  ;;  %v1040_v42 = vsel %vm5401_vm5, %v738_v1, %v836_v62 }
  0x50   : > { %v762_v11 = vor.u32 %v761_v28, %v758_v4  ;;  %v985_v14 = vshrl.u32 %v5621_v0, 16  ;;  %v987_v10 = vshll.u32 %v5621_v0, 16  ;;  %v748_v32 = vshrl.u32 %v5447_v3, 16 }
  0x51   : > { %5029 = vmatmul.mubr.msk.bf16.vlgmr.msra.gmra.mrb[8].mxu1 %vm444_vm6, %v5476_v20  ;;  %v1053_v49 = vsel %vm410_vm4, %v1040_v42, %v969_v59  ;;  %v857_v58 = vor.u32 %v5629_v16, %v854_v47  ;;  %1106 = vmatprep.subr.bf16.mxu0 %v1086_v19  ;;  %v751_v28 = vshll.u32 %v5447_v3, 16  ;;  %v5648_v43 = vshrl.u32 %v5451_v6, 16  ;;  %v5658_v47 = vld [vmem:[%s5383_s29 + $0x40] ss:$44 sps:$4 sm:$0x18]  }
  0x52   : > { %v1084_v36 = vand.u32 %v1053_v49, %v5380_v27  ;;  %v5651_v1 = vshll.u32 %v5451_v6, 16  ;;  %1179 = vmatprep.mubr.bf16.mxu1 %v7046_v26  ;;  %v989_v62 = vrot.slane %v987_v10, 1  ;;  %v750_v40 = vrot.slane %v748_v32, 2 }
  0x53   : > { %v1043_v4 = vsel %vm5401_vm5, %v762_v11, %v857_v58  ;;  %v978_v59 = vshrl.u32 %v5636_v24, 16  ;;  %v753_v19 = vrot.slane %v751_v28, 3  ;;  %v847_v3 = vrot.slane %v5648_v43, 7 }
  0x54   : > { %1107 = vmatpush1.bf16.msra.mxu0 %v1084_v36  ;;  %v980_v42 = vshll.u32 %v5636_v24, 16  ;;  %v772_v49 = vshrl.u32 %v5468_v18, 16  ;;  %v990_v13 = vor.u32 %v989_v62, %v985_v14  ;;  %v775_v10 = vshll.u32 %v5468_v18, 16 }
  0x55   : > { %v5665_v26 = vshrl.u32 %v5480_v22, 16  ;;  %v5668_v11 = vshll.u32 %v5480_v22, 16  ;;  %v754_v58 = vor.u32 %v753_v19, %v750_v40  ;;  %v850_v32 = vor.u32 %v5651_v1, %v847_v3  ;;  %v5680_v19 = vld [vmem:[%s5383_s29 + $0x3c] ss:$44 sps:$4 sm:$0x18]  }
  0x56   : > { %v982_v36 = vrot.slane %v980_v42, 1  ;;  %v774_v28 = vrot.slane %v772_v49, 2  ;;  %v1062_v15 = vsel %vm410_vm4, %v1043_v4, %v990_v13  ;;  %v777_v14 = vrot.slane %v775_v10, 3 }
  0x57   : > { %7142 = vst [vmem:[#allocation9_spill] sm:$0xff] %v5665_v26  ;;  %7143 = vst [vmem:[#allocation10_spill] sm:$0xff] %v5668_v11  ;;  %4879 = vmatmul.mubr.msk.bf16.vlgmr.msra.gmra.mrb[12].mxu0 %vm444_vm6, %v5476_v20  ;;  %v868_v62 = vrot.slane %v5665_v26, 7  ;;  %v999_v18 = vshrl.u32 %v5658_v47, 16  ;;  %v1090_v25 = vand.u32 %v1062_v15, %v5380_v27  ;;  %v1042_v40 = vsel %vm5401_vm5, %v754_v58, %v850_v32 }
  0x58   : > { %v983_v44 = vor.u32 %v982_v36, %v978_v59  ;;  %v1001_v3 = vshll.u32 %v5658_v47, 16  ;;  %v7144_v42 = vmov 0   ;;  %v778_v13 = vor.u32 %v777_v14, %v774_v28 }
  0x59   : > { %1220 = vmatprep.mubr.bf16.mxu0 %v7144_v42  ;;  %v871_v4 = vor.u32 %v5668_v11, %v868_v62  ;;  %v764_v49 = vshrl.u32 %v5466_v17, 16  ;;  %v767_v10 = vshll.u32 %v5466_v17, 16  ;;  %1147 = vmatprep.subr.bf16.mxu1 %v1090_v25  ;;  %v5689_v58 = vshrl.u32 %v5478_v21, 16 }
  0x5a   : > { %v1059_v15 = vsel %vm410_vm4, %v1042_v40, %v983_v44  ;;  %v1003_v59 = vrot.slane %v1001_v3, 1  ;;  %v5692_v32 = vshll.u32 %v5478_v21, 16  ;;  %v992_v25 = vshrl.u32 %v5680_v19, 16  ;;  %v5701_v40 = vld [vmem:[%s5383_s29 + $0x48] ss:$44 sps:$4 sm:$0x18]  }
  0x5b   : > { %7145 = vst [vmem:[#allocation11_spill] sm:$0xff] %v5689_v58  ;;  %v1088_v36 = vand.u32 %v1059_v15, %v5380_v27  ;;  %v1045_v28 = vsel %vm5401_vm5, %v778_v13, %v871_v4  ;;  %v766_v14 = vrot.slane %v764_v49, 2  ;;  %v769_v62 = vrot.slane %v767_v10, 3 }
  0x5c   : > { %7146 = vst [vmem:[#allocation12_spill] sm:$0xff] %v5692_v32  ;;  %v1004_v8 = vor.u32 %v1003_v59, %v999_v18  ;;  %v861_v17 = vrot.slane %v5689_v58, 7  ;;  %v994_v44 = vshll.u32 %v5680_v19, 16  ;;  %v788_v11 = vshrl.u32 %v5508_v53, 16 }
  0x5d   : > { %1148 = vmatpush1.bf16.msra.mxu1 %v1088_v36  ;;  %v770_v3 = vor.u32 %v769_v62, %v766_v14  ;;  %v791_v15 = vshll.u32 %v5508_v53, 16  ;;  %v5706_v13 = vshrl.u32 %v5517_v61, 16  ;;  %v5711_v10 = vshll.u32 %v5517_v61, 16  ;;  %v5716_v62 = vld [vmem:[%s5383_s29 + $0x44] ss:$44 sps:$4 sm:$0x18]  }
  0x5e   : > { %v1068_v18 = vsel %vm410_vm4, %v1045_v28, %v1004_v8  ;;  %v864_v4 = vor.u32 %v5692_v32, %v861_v17  ;;  %v996_v49 = vrot.slane %v994_v44, 1  ;;  %v790_v58 = vrot.slane %v788_v11, 2 }
  0x5f   : > { %7147 = vst [vmem:[#allocation13_spill] sm:$0xff] %v5706_v13  ;;  %7148 = vst [vmem:[#allocation14_spill] sm:$0xff] %v5711_v10  ;;  %v1094_v59 = vand.u32 %v1068_v18, %v5380_v27  ;;  %v793_v36 = vrot.slane %v791_v15, 3  ;;  %v882_v14 = vrot.slane %v5706_v13, 7  ;;  %v1013_v28 = vshrl.u32 %v5701_v40, 16 }
  0x60   : > { %4880 = vmatmul.mubr.msk.bf16.vlgmr.msra.gmra.mrb[12].mxu1 %vm444_vm6, %v5476_v20  ;;  %v997_v53 = vor.u32 %v996_v49, %v992_v25  ;;  %v1044_v8 = vsel %vm5401_vm5, %v770_v3, %v864_v4  ;;  %v1015_v17 = vshll.u32 %v5701_v40, 16  ;;  %v780_v15 = vshrl.u32 %v5506_v51, 16  ;;  %v5736_v4 = vld [vmem:[%s5383_s29 + $0x50] ss:$44 sps:$4 sm:$0x18]  }
  0x61   : > { %1188 = vmatprep.subr.bf16.mxu0 %v1094_v59  ;;  %v794_v44 = vor.u32 %v793_v36, %v790_v58  ;;  %v885_v11 = vor.u32 %v5711_v10, %v882_v14  ;;  %v783_v18 = vshll.u32 %v5506_v51, 16  ;;  %1261 = vmatprep.mubr.bf16.mxu1 %v7144_v42  ;;  %v5730_v49 = vshrl.u32 %v5515_v60, 16 }
  0x62   : > { %v1065_v13 = vsel %vm410_vm4, %v1044_v8, %v997_v53  ;;  %v1017_v25 = vrot.slane %v1015_v17, 1  ;;  %v5733_v3 = vshll.u32 %v5515_v60, 16  ;;  %v782_v51 = vrot.slane %v780_v15, 2 }
  0x63   : > { %7149 = vst [vmem:[#allocation15_spill] sm:$0xff] %v5730_v49  ;;  %v1092_v58 = vand.u32 %v1065_v13, %v5380_v27  ;;  %v1047_v59 = vsel %vm5401_vm5, %v794_v44, %v885_v11  ;;  %v785_v36 = vrot.slane %v783_v18, 3  ;;  %v875_v53 = vrot.slane %v5730_v49, 7  ;;  %v5755_v18 = vld [vmem:[%s5383_s29 + $0x4c] ss:$44 sps:$4 sm:$0x18]  }
  0x64   : > { %7150 = vst [vmem:[#allocation16_spill] sm:$0xff] %v5733_v3  ;;  %v1018_v14 = vor.u32 %v1017_v25, %v1013_v28  ;;  %v1006_v8 = vshrl.u32 %v5716_v62, 16  ;;  %v1008_v17 = vshll.u32 %v5716_v62, 16  ;;  %v804_v32 = vshrl.u32 %v5549_v34, 16 }
  0x65   : > { %1189 = vmatpush1.bf16.msra.mxu0 %v1092_v58  ;;  %v786_v10 = vor.u32 %v785_v36, %v782_v51  ;;  %v807_v26 = vshll.u32 %v5549_v34, 16  ;;  %v5747_v13 = vshrl.u32 %v5556_v48, 16  ;;  %v878_v11 = vor.u32 %v5733_v3, %v875_v53 }
  0x66   : > { %v1074_v44 = vsel %vm410_vm4, %v1047_v59, %v1018_v14  ;;  %v1010_v28 = vrot.slane %v1008_v17, 1  ;;  %v5752_v15 = vshll.u32 %v5556_v48, 16  ;;  %v806_v58 = vrot.slane %v804_v32, 2 }
  0x67   : > { %7151 = vst [vmem:[#allocation17_spill] sm:$0xff] %v5747_v13  ;;  %v1098_v25 = vand.u32 %v1074_v44, %v5380_v27  ;;  %v809_v51 = vrot.slane %v807_v26, 3  ;;  %v896_v36 = vrot.slane %v5747_v13, 7  ;;  %v1046_v49 = vsel %vm5401_vm5, %v786_v10, %v878_v11 }
  0x68   : > { %7152 = vst [vmem:[#allocation18_spill] sm:$0xff] %v5752_v15  ;;  %v1011_v34 = vor.u32 %v1010_v28, %v1006_v8  ;;  %4881 = vmatmul.mubr.msk.bf16.vlgmr.msra.gmra.mrb[16].mxu0 %vm444_vm6, %v5476_v20  ;;  %v1027_v59 = vshrl.u32 %v5736_v4, 16  ;;  %v1029_v14 = vshll.u32 %v5736_v4, 16  ;;  %v796_v26 = vshrl.u32 %v5543_v23, 16 }
  0x69   : > { %1229 = vmatprep.subr.bf16.mxu1 %v1098_v25  ;;  %v810_v53 = vor.u32 %v809_v51, %v806_v58  ;;  %v899_v17 = vor.u32 %v5752_v15, %v896_v36  ;;  %v799_v32 = vshll.u32 %v5543_v23, 16  ;;  %1302 = vmatprep.mubr.bf16.mxu0 %v7144_v42  ;;  %v5771_v44 = vshrl.u32 %v5554_v46, 16  ;;  %v5777_v28 = vld [vmem:[%s5383_s29 + $0x54] ss:$44 sps:$4 sm:$0x18]  }
  0x6a   : > { %v1071_v8 = vsel %vm410_vm4, %v1046_v49, %v1011_v34  ;;  %v1031_v10 = vrot.slane %v1029_v14, 1  ;;  %v5774_v11 = vshll.u32 %v5554_v46, 16  ;;  %v798_v51 = vrot.slane %v796_v26, 2 }
  0x6b   : > { %7153 = vst [vmem:[#allocation19_spill] sm:$0xff] %v5771_v44  ;;  %v1096_v25 = vand.u32 %v1071_v8, %v5380_v27  ;;  %v1049_v58 = vsel %vm5401_vm5, %v810_v53, %v899_v17  ;;  %v801_v23 = vrot.slane %v799_v32, 3  ;;  %v889_v15 = vrot.slane %v5771_v44, 7 }
  0x6c   : > { %7154 = vst [vmem:[#allocation20_spill] sm:$0xff] %v5774_v11  ;;  %v1032_v36 = vor.u32 %v1031_v10, %v1027_v59  ;;  %v1020_v49 = vshrl.u32 %v5755_v18, 16  ;;  %v1022_v34 = vshll.u32 %v5755_v18, 16  ;;  %v812_v13 = vshrl.u32 %v5511_v55, 16 }
  0x6d   : > { %1230 = vmatpush1.bf16.msra.mxu1 %v1096_v25  ;;  %v802_v14 = vor.u32 %v801_v23, %v798_v51  ;;  %v815_v3 = vshll.u32 %v5511_v55, 16  ;;  %v5788_v8 = vshrl.u32 %v5521_v63, 16  ;;  %v892_v59 = vor.u32 %v5774_v11, %v889_v15  ;;  %v1362_v55 = vld [vmem:[%s5383_s29 + $0x58] sm:$0xcc] }
  0x6e   : > { %v1080_v53 = vsel %vm410_vm4, %v1049_v58, %v1032_v36  ;;  %v1024_v17 = vrot.slane %v1022_v34, 1  ;;  %v7156_v26 = vmov 0.0   ;;  %v5794_v32 = vshll.u32 %v5521_v63, 16 }
  0x6f   : > { %7155 = vst [vmem:[#allocation21_spill] sm:$0xff] %v5788_v8  ;;  %5032 = vmatprep.subr.bf16.mxu1 %v7156_v26  ;;  %v1102_v10 = vand.u32 %v1080_v53, %v5380_v27  ;;  %v814_v25 = vrot.slane %v812_v13, 2  ;;  %v817_v51 = vrot.slane %v815_v3, 3  ;;  %v903_v23 = vrot.slane %v5788_v8, 7 }
  0x70   : > { %4882 = vmatmul.mubr.msk.bf16.vlgmr.msra.gmra.mrb[16].mxu1 %vm444_vm6, %v5476_v20  ;;  %v1025_v58 = vor.u32 %v1024_v17, %v1020_v49  ;;  %v1048_v15 = vsel %vm5401_vm5, %v802_v14, %v892_v59  ;;  %v1034_v36 = vshrl.u32 %v5777_v28, 16  ;;  %v1036_v34 = vshll.u32 %v5777_v28, 16  ;;  %v1363_v59 = vld [vmem:[%s5383_s29 + $0x60] sm:$0xcc] }
  0x71   : > { %1270 = vmatprep.subr.bf16.mxu0 %v1102_v10  ;;  %v818_v11 = vor.u32 %v817_v51, %v814_v25  ;;  %v906_v13 = vor.u32 %v5794_v32, %v903_v23  ;;  %5034 = vmatprep.mubr.msk.bf16.mxu1 %vm5268_vm7, %v7156_v26  ;;  %v1369_v3 = vrot.slane %v5392_v33, 1  ;;  %v1391_v53 = vrot.slane %v5559_v50, 2 }
  0x72   : > { %v1077_v49 = vsel %vm410_vm4, %v1048_v15, %v1025_v58  ;;  %v1038_v17 = vrot.slane %v1036_v34, 1  ;;  %v5811_v8 = vcombine.low %v1362_v55, %v1362_v55  ;;  %v5813_v14 = vcombine.high %v1362_v55, %v1362_v55 }
  0x73   : > { %v1100_v10 = vand.u32 %v1077_v49, %v5380_v27  ;;  %v1050_v25 = vsel %vm5401_vm5, %v818_v11, %v906_v13  ;;  %v1452_v51 = vsel %vm5401_vm5, %v1369_v3, %v1391_v53  ;;  %v1368_v23 = vrot.slane %v5427_v54, 1  ;;  %v1364_v53 = vld [vmem:[%s5383_s29 + $0x68] sm:$0xcc] }
  0x74   : > { %7157 = vst [vmem:[#allocation22_spill] sm:$0xff] %v5811_v8  ;;  %v1039_v50 = vor.u32 %v1038_v17, %v1034_v36  ;;  %v1441_v58 = vrot.slane %v5813_v14, 7  ;;  %v1390_v15 = vrot.slane %v5587_v35, 2  ;;  %v1440_v55 = vrot.slane %v5811_v8, 7 }
  0x75   : > { %1271 = vmatpush1.bf16.msra.mxu0 %v1100_v10  ;;  %v1371_v34 = vrot.slane %v5409_v41, 1  ;;  %v1393_v49 = vrot.slane %v5621_v0, 2  ;;  %v5827_v33 = vcombine.low %v1363_v59, %v1363_v59  ;;  %v5829_v11 = vcombine.high %v1363_v59, %v1363_v59 }
  0x76   : > { %v1083_v13 = vsel %vm410_vm4, %v1050_v25, %v1039_v50  ;;  %v1467_v3 = vsel %vm410_vm4, %v1452_v51, %v1441_v58  ;;  %v1451_v36 = vsel %vm5401_vm5, %v1368_v23, %v1390_v15  ;;  %v1370_v35 = vrot.slane %v5451_v6, 1 }
  0x77   : > { %v1104_v17 = vand.u32 %v1083_v13, %v5380_v27  ;;  %v1497_v10 = vand.u32 %v1467_v3, %v5380_v27  ;;  %v1464_v0 = vsel %vm410_vm4, %v1451_v36, %v1440_v55  ;;  %v1443_v8 = vrot.slane %v5829_v11, 7  ;;  %v1365_v3 = vld [vmem:[%s5383_s29 + $0x70] sm:$0xcc] }
  0x78   : > { %4883 = vmatmul.mubr.msk.bf16.vlgmr.msra.gmra.mrb[20].mxu0 %vm444_vm6, %v5476_v20  ;;  %v1495_v59 = vand.u32 %v1464_v0, %v5380_v27  ;;  %v1454_v25 = vsel %vm5401_vm5, %v1371_v34, %v1393_v49  ;;  %v1392_v51 = vrot.slane %v5636_v24, 2  ;;  %v1442_v23 = vrot.slane %v5827_v33, 7 }
  0x79   : > { %5033 = vmatpush3.bf16.msra.mxu1 %v1104_v17  ;;  %1517 = vmatprep.subr.bf16.mxu0 %v1497_v10  ;;  %v1473_v50 = vsel %vm410_vm4, %v1454_v25, %v1443_v8  ;;  %v1373_v58 = vrot.slane %v5480_v22, 1  ;;  %v1395_v15 = vrot.slane %v5658_v47, 2  ;;  %v5851_v55 = vcombine.low %v1364_v53, %v1364_v53 }
  0x7a   : > { %1518 = vmatpush1.bf16.msra.mxu0 %v1495_v59  ;;  %v1501_v13 = vand.u32 %v1473_v50, %v5380_v27  ;;  %v1453_v34 = vsel %vm5401_vm5, %v1370_v35, %v1392_v51  ;;  %1549 = vmatprep.mubr.bf16.mxu0 %v7144_v42  ;;  %v5857_v24 = vcombine.high %v1364_v53, %v1364_v53  ;;  %v1372_v49 = vrot.slane %v5478_v21, 1 }
  0x7b   : > { %7158 = vst [vmem:[#allocation23_spill] sm:$0xff] %v5851_v55  ;;  %v1470_v8 = vsel %vm410_vm4, %v1453_v34, %v1442_v23  ;;  %v1456_v47 = vsel %vm5401_vm5, %v1373_v58, %v1395_v15  ;;  %v1394_v36 = vrot.slane %v5680_v19, 2  ;;  %v1444_v17 = vrot.slane %v5851_v55, 7  ;;  %v1366_v23 = vld [vmem:[%s5383_s29 + $0x78] sm:$0xcc] }
  0x7c   : > { %5035 = vmatmul.mubr.msk.bf16.vlgmr.msra.gmra.mrb[20].mxu1 %vm444_vm6, %v5476_v20  ;;  %1558 = vmatprep.subr.bf16.mxu1 %v1501_v13  ;;  %v1499_v35 = vand.u32 %v1470_v8, %v5380_v27  ;;  %v1445_v53 = vrot.slane %v5857_v24, 7  ;;  %v1375_v10 = vrot.slane %v5517_v61, 1  ;;  %v1397_v0 = vrot.slane %v5701_v40, 2  ;;  %v5891_v8 = vld [vmem:[%s5383_s29 + $0x80] ss:$0 sps:$4 sm:$0xcc]  }
  0x7d   : > { %1590 = vmatprep.mubr.bf16.mxu1 %v7144_v42  ;;  %v1455_v19 = vsel %vm5401_vm5, %v1372_v49, %v1394_v36  ;;  %v5875_v59 = vcombine.low %v1365_v3, %v1365_v3  ;;  %v5877_v25 = vcombine.high %v1365_v3, %v1365_v3  ;;  %v1374_v51 = vrot.slane %v5515_v60, 1  ;;  %7161 = vst [vmem:[#allocation26_spill] sm:$0xff] %v5891_v8 }
  0x7e   : > { %1559 = vmatpush1.bf16.msra.mxu1 %v1499_v35  ;;  %v1479_v50 = vsel %vm410_vm4, %v1456_v47, %v1445_v53  ;;  %v1476_v58 = vsel %vm410_vm4, %v1455_v19, %v1444_v17  ;;  %v1458_v40 = vsel %vm5401_vm5, %v1375_v10, %v1397_v0  ;;  %v1396_v15 = vrot.slane %v5716_v62, 2  ;;  %v5902_v35 = vld [vmem:[%s5383_s29 + $0x4] ss:$44 sps:$4 sm:$0x18]  }
  0x7f   : > { %7159 = vst [vmem:[#allocation24_spill] sm:$0xff] %v5875_v59  ;;  %7160 = vst [vmem:[#allocation25_spill] sm:$0xff] %v5877_v25  ;;  %v1505_v13 = vand.u32 %v1479_v50, %v5380_v27  ;;  %v1503_v34 = vand.u32 %v1476_v58, %v5380_v27  ;;  %v1447_v49 = vrot.slane %v5877_v25, 7  ;;  %v1446_v3 = vrot.slane %v5875_v59, 7  ;;  %v7178_v25 = vld [vmem:[#allocation15_spill] sm:$0xff] }
  0x80   : > { %4896 = vmatmul.mubr.msk.bf16.vlgmr.msra.gmra.mrb[24].mxu0 %vm444_vm6, %v5476_v20  ;;  %v1457_v47 = vsel %vm5401_vm5, %v1374_v51, %v1396_v15  ;;  %v1377_v36 = vrot.slane %v5556_v48, 1  ;;  %v1399_v62 = vrot.slane %v5736_v4, 2  ;;  %v5899_v17 = vcombine.low %v1366_v23, %v1366_v23  ;;  %7163 = vst [vmem:[#allocation28_spill] sm:$0xff] %v5902_v35 }
  0x81   : > { %1599 = vmatprep.subr.bf16.mxu0 %v1505_v13  ;;  %v1485_v53 = vsel %vm410_vm4, %v1458_v40, %v1447_v49  ;;  %v1482_v10 = vsel %vm410_vm4, %v1457_v47, %v1446_v3  ;;  %1631 = vmatprep.mubr.bf16.mxu0 %v7144_v42  ;;  %v5907_v0 = vcombine.high %v1366_v23, %v1366_v23  ;;  %v1376_v19 = vrot.slane %v5554_v46, 1  ;;  %v5928_v47 = vld [vmem:[%s5383_s29] ss:$44 sps:$4 sm:$0x18]  }
  0x82   : > { %7162 = vst [vmem:[#allocation27_spill] sm:$0xff] %v5899_v17  ;;  %1600 = vmatpush1.bf16.msra.mxu0 %v1503_v34  ;;  %v1509_v51 = vand.u32 %v1485_v53, %v5380_v27  ;;  %v1507_v4 = vand.u32 %v1482_v10, %v5380_v27  ;;  %v1460_v50 = vsel %vm5401_vm5, %v1377_v36, %v1399_v62  ;;  %v1398_v58 = vrot.slane %v5755_v18, 2 }
  0x83   : > { %7164 = vst [vmem:[#allocation29_spill] sm:$0xff] %v5907_v0  ;;  %v1449_v40 = vrot.slane %v5907_v0, 7  ;;  %v1448_v15 = vrot.slane %v5899_v17, 7  ;;  %v1378_v23 = vrot.slane %v5521_v63, 1  ;;  %v1400_v13 = vrot.slane %v5777_v28, 2 }
  0x84   : > { %4897 = vmatmul.mubr.msk.bf16.vlgmr.msra.gmra.mrb[24].mxu1 %vm444_vm6, %v5476_v20  ;;  %1640 = vmatprep.subr.bf16.mxu1 %v1509_v51  ;;  %v1459_v34 = vsel %vm5401_vm5, %v1376_v19, %v1398_v58  ;;  %v1450_v49 = vrot.slane %v5891_v8, 7  ;;  %v7165_v18 = vshrl.u32 %v5388_v31, 16  ;;  %v7094_v63 = vshrl.u32 %v5902_v35, 16  ;;  %v5944_v51 = vld [vmem:[%s5383_s29 + $0xc] ss:$44 sps:$4 sm:$0x18]  }
  0x85   : > { %1641 = vmatpush1.bf16.msra.mxu1 %v1507_v4  ;;  %1672 = vmatprep.mubr.bf16.mxu1 %v7144_v42  ;;  %v1491_v28 = vsel %vm410_vm4, %v1460_v50, %v1449_v40  ;;  %v1488_v36 = vsel %vm410_vm4, %v1459_v34, %v1448_v15  ;;  %v1461_v62 = vsel %vm5401_vm5, %v1378_v23, %v1400_v13  ;;  %v7091_v53 = vshll.u32 %v5902_v35, 16 }
  0x86   : > { %v1798_v3 = vor.u32 %v5424_v52, %v7165_v18  ;;  %v1513_v31 = vand.u32 %v1491_v28, %v5380_v27  ;;  %v1511_v52 = vand.u32 %v1488_v36, %v5380_v27  ;;  %5038 = vmatprep.subr.bf16.mxu1 %v7156_v26  ;;  %v1494_v10 = vsel %vm410_vm4, %v1461_v62, %v1450_v49 }
  0x87   : > { %v1929_v19 = vrot.slane %v7094_v63, 1  ;;  %v1515_v4 = vand.u32 %v1494_v10, %v5380_v27  ;;  %v1932_v50 = vrot.slane %v7091_v53, 2  ;;  %v2020_v58 = vrot.slane %v5584_v30, 6 }
  0x88   : > { %v2021_v40 = vrot.slane %v5592_v56, 7  ;;  %4898 = vmatmul.mubr.msk.bf16.vlgmr.msra.gmra.mrb[28].mxu0 %vm444_vm6, %v5476_v20  ;;  %1681 = vmatprep.subr.bf16.mxu0 %v1513_v31  ;;  %v7166_v15 = vshrl.u32 %v5397_v37, 16  ;;  %v7090_v13 = vshrl.u32 %v5928_v47, 16  ;;  %v7083_v34 = vshll.u32 %v5928_v47, 16 }
  0x89   : > { %v2017_v49 = vrot.slane %v5602_v5, 6  ;;  %1682 = vmatpush1.bf16.msra.mxu0 %v1511_v52  ;;  %1713 = vmatprep.mubr.bf16.mxu0 %v7144_v42  ;;  %v1933_v18 = vor.u32 %v1932_v50, %v1929_v19  ;;  %v2018_v36 = vrot.slane %v5605_v7, 7  ;;  %v7167_v62 = vshrl.u32 %v5405_v39, 16  ;;  %v5965_v37 = vld [vmem:[%s5383_s29 + $0x8] ss:$44 sps:$4 sm:$0x18]  }
  0x8a   : > { %v1791_v23 = vor.u32 %v5460_v12, %v7166_v15  ;;  %v2022_v28 = vor.u32 %v2021_v40, %v2020_v58  ;;  %v1921_v12 = vrot.slane %v7090_v13, 1  ;;  %v1924_v10 = vrot.slane %v7083_v34, 2 }
  0x8b   : > { %v1812_v31 = vor.u32 %v5433_v57, %v7167_v62  ;;  %v7087_v52 = vshrl.u32 %v5944_v51, 16  ;;  %v7084_v15 = vshll.u32 %v5944_v51, 16  ;;  %v2051_v19 = vsel %vm5401_vm5, %v1798_v3, %v1933_v18 }
  0x8c   : > { %v2019_v50 = vor.u32 %v2018_v36, %v2017_v49  ;;  %v2026_v39 = vrot.slane %v5618_v45, 6  ;;  %v2027_v57 = vrot.slane %v5629_v16, 7  ;;  %4899 = vmatmul.mubr.msk.bf16.vlgmr.msra.gmra.mrb[28].mxu1 %vm444_vm6, %v5476_v20  ;;  %v2066_v58 = vsel %vm410_vm4, %v2051_v19, %v2022_v28 }
  0x8d   : > { %v1925_v40 = vor.u32 %v1924_v10, %v1921_v12  ;;  %v1945_v62 = vrot.slane %v7087_v52, 1  ;;  %v1948_v34 = vrot.slane %v7084_v15, 2  ;;  %5039 = vmatpush3.bf16.msra.mxu1 %v1515_v4  ;;  %5040 = vmatprep.mubr.msk.bf16.mxu1 %vm5268_vm7, %v7156_v26  ;;  %v2096_v3 = vand.u32 %v2066_v58, %v5380_v27  ;;  %v5992_v12 = vld [vmem:[%s5383_s29 + $0x14] ss:$44 sps:$4 sm:$0x18]  }
  0x8e   : > { %v2028_v49 = vor.u32 %v2027_v57, %v2026_v39  ;;  %v7168_v18 = vshrl.u32 %v5445_v2, 16  ;;  %v7086_v28 = vshrl.u32 %v5965_v37, 16  ;;  %v7085_v4 = vshll.u32 %v5965_v37, 16 }
  0x8f   : > { %v2050_v10 = vsel %vm5401_vm5, %v1791_v23, %v1925_v40  ;;  %v1949_v19 = vor.u32 %v1948_v34, %v1945_v62  ;;  %v2023_v15 = vrot.slane %v5648_v43, 6  ;;  %2116 = vmatprep.subr.bf16.mxu0 %v2096_v3  ;;  %v1821_v57 = vshrl.u32 %v5456_v9, 16  ;;  %v6012_v40 = vld [vmem:[%s5383_s29 + $0x10] ss:$44 sps:$4 sm:$0x18]  }
  0x90   : > { %v1805_v36 = vor.u32 %v5487_v29, %v7168_v18  ;;  %v2063_v39 = vsel %vm410_vm4, %v2050_v10, %v2019_v50  ;;  %v1937_v2 = vrot.slane %v7086_v28, 1  ;;  %v2024_v29 = vrot.slane %v5651_v1, 7  ;;  %4900 = vmatmul.mubr.msk.bf16.vlgmr.msra.gmra.mrb[32].mxu0 %vm444_vm6, %v5476_v20 }
  0x91   : > { %v2094_v23 = vand.u32 %v2063_v39, %v5380_v27  ;;  %v2053_v34 = vsel %vm5401_vm5, %v1812_v31, %v1949_v19  ;;  %v1940_v58 = vrot.slane %v7085_v4, 2  ;;  %v1823_v50 = vshll.u32 %v5456_v9, 16  ;;  %2148 = vmatprep.mubr.bf16.mxu0 %v7144_v42  ;;  %v7169_v4 = vld [vmem:[#allocation9_spill] sm:$0xff] }
  0x92   : > { %v2072_v62 = vsel %vm410_vm4, %v2053_v34, %v2028_v49  ;;  %v2025_v3 = vor.u32 %v2024_v29, %v2023_v15  ;;  %v7089_v18 = vshrl.u32 %v5992_v12, 16  ;;  %v7088_v10 = vshll.u32 %v5992_v12, 16  ;;  %v7170_v49 = vld [vmem:[#allocation10_spill] sm:$0xff]  ;;  %v7171_v34 = vld [vmem:[#allocation4_spill] sm:$0xff] }
  0x93   : > { %2117 = vmatpush1.bf16.msra.mxu0 %v2094_v23  ;;  %v2100_v31 = vand.u32 %v2072_v62, %v5380_v27  ;;  %v1941_v19 = vor.u32 %v1940_v58, %v1937_v2  ;;  %v1825_v39 = vrot.slane %v1823_v50, 1  ;;  %v2032_v28 = vrot.slane %v7169_v4, 6  ;;  %v6033_v62 = vld [vmem:[%s5383_s29 + $0x1c] ss:$44 sps:$4 sm:$0x18]  }
  0x94   : > { %v1961_v9 = vrot.slane %v7089_v18, 1  ;;  %v1964_v15 = vrot.slane %v7088_v10, 2  ;;  %v2033_v29 = vrot.slane %v7170_v49, 7  ;;  %v1814_v52 = vshrl.u32 %v7171_v34, 16  ;;  %5041 = vmatmul.mubr.msk.bf16.vlgmr.msra.gmra.mrb[32].mxu1 %vm444_vm6, %v5476_v20 }
  0x95   : > { %2157 = vmatprep.subr.bf16.mxu1 %v2100_v31  ;;  %v2052_v2 = vsel %vm5401_vm5, %v1805_v36, %v1941_v19  ;;  %v1826_v23 = vor.u32 %v1825_v39, %v1821_v57  ;;  %v1816_v58 = vshll.u32 %v7171_v34, 16  ;;  %v7093_v50 = vshrl.u32 %v6012_v40, 16  ;;  %2189 = vmatprep.mubr.bf16.mxu1 %v7144_v42  ;;  %v7172_v57 = vld [vmem:[#allocation11_spill] sm:$0xff]  ;;  %v7173_v34 = vld [vmem:[#allocation12_spill] sm:$0xff] }
  0x96   : > { %v2069_v10 = vsel %vm410_vm4, %v2052_v2, %v2025_v3  ;;  %v1965_v18 = vor.u32 %v1964_v15, %v1961_v9  ;;  %v2034_v13 = vor.u32 %v2033_v29, %v2032_v28  ;;  %v7092_v20 = vshll.u32 %v6012_v40, 16  ;;  %v7174_v28 = vld [vmem:[#allocation6_spill] sm:$0xff] }
  0x97   : > { %v2098_v31 = vand.u32 %v2069_v10, %v5380_v27  ;;  %v1818_v53 = vrot.slane %v1816_v58, 1  ;;  %v1953_v36 = vrot.slane %v7093_v50, 1  ;;  %v2029_v19 = vrot.slane %v7172_v57, 6  ;;  %v6051_v10 = vld [vmem:[%s7039_s1] sm:$0x7] }
  0x98   : > { %v2055_v39 = vsel %vm5401_vm5, %v1826_v23, %v1965_v18  ;;  %v1956_v3 = vrot.slane %v7092_v20, 2  ;;  %v2030_v9 = vrot.slane %v7173_v34, 7  ;;  %v1835_v15 = vshrl.u32 %v7174_v28, 16  ;;  %4913 = vmatmul.mubr.msk.bf16.vlgmr.msra.gmra.mrb[36].mxu0 %vm444_vm6, %v6051_v10  ;;  %v6058_v23 = vld [vmem:[%s5383_s29 + $0x18] ss:$44 sps:$4 sm:$0x18]  }
  0x99   : > { %2158 = vmatpush1.bf16.msra.mxu1 %v2098_v31  ;;  %v2078_v29 = vsel %vm410_vm4, %v2055_v39, %v2034_v13  ;;  %v1819_v2 = vor.u32 %v1818_v53, %v1814_v52  ;;  %v1837_v18 = vshll.u32 %v7174_v28, 16  ;;  %v7099_v58 = vshrl.u32 %v6033_v62, 16  ;;  %2230 = vmatprep.mubr.bf16.mxu0 %v7144_v42  ;;  %v7175_v53 = vld [vmem:[#allocation13_spill] sm:$0xff]  ;;  %v7176_v39 = vld [vmem:[#allocation14_spill] sm:$0xff] }
  0x9a   : > { %v2104_v20 = vand.u32 %v2078_v29, %v5380_v27  ;;  %v1957_v31 = vor.u32 %v1956_v3, %v1953_v36  ;;  %v2031_v50 = vor.u32 %v2030_v9, %v2029_v19  ;;  %v7102_v63 = vshll.u32 %v6033_v62, 16  ;;  %v7177_v19 = vld [vmem:[#allocation5_spill] sm:$0xff] }
  0x9b   : > { %v1839_v8 = vrot.slane %v1837_v18, 1  ;;  %v1977_v13 = vrot.slane %v7099_v58, 1  ;;  %v2038_v52 = vrot.slane %v7175_v53, 6  ;;  %v2039_v28 = vrot.slane %v7176_v39, 7 }
  0x9c   : > { %2198 = vmatprep.subr.bf16.mxu0 %v2104_v20  ;;  %v2054_v17 = vsel %vm5401_vm5, %v1819_v2, %v1957_v31  ;;  %v1980_v36 = vrot.slane %v7102_v63, 2  ;;  %v1828_v3 = vshrl.u32 %v7177_v19, 16  ;;  %v1830_v9 = vshll.u32 %v7177_v19, 16  ;;  %4914 = vmatmul.mubr.msk.bf16.vlgmr.msra.gmra.mrb[36].mxu1 %vm444_vm6, %v6051_v10  ;;  %v6079_v20 = vld [vmem:[%s5383_s29 + $0x24] ss:$44 sps:$4 sm:$0x18]  }
  0x9d   : > { %v2075_v29 = vsel %vm410_vm4, %v2054_v17, %v2031_v50  ;;  %v1840_v18 = vor.u32 %v1839_v8, %v1835_v15  ;;  %v2040_v58 = vor.u32 %v2039_v28, %v2038_v52  ;;  %v7107_v0 = vshrl.u32 %v6058_v23, 16  ;;  %2271 = vmatprep.mubr.bf16.mxu1 %v7144_v42  ;;  %v7179_v8 = vld [vmem:[#allocation16_spill] sm:$0xff] }
  0x9e   : > { %v2102_v2 = vand.u32 %v2075_v29, %v5380_v27  ;;  %v1981_v31 = vor.u32 %v1980_v36, %v1977_v13  ;;  %v1832_v63 = vrot.slane %v1830_v9, 1  ;;  %v7108_v59 = vshll.u32 %v6058_v23, 16  ;;  %v7180_v15 = vld [vmem:[#allocation8_spill] sm:$0xff] }
  0x9f   : > { %v1969_v19 = vrot.slane %v7107_v0, 1  ;;  %v2035_v17 = vrot.slane %v7178_v25, 6  ;;  %v2036_v50 = vrot.slane %v7179_v8, 7  ;;  %v1849_v52 = vshrl.u32 %v7180_v15, 16 }
  0xa0   : > { %2199 = vmatpush1.bf16.msra.mxu0 %v2102_v2  ;;  %v2057_v28 = vsel %vm5401_vm5, %v1840_v18, %v1981_v31  ;;  %v1833_v29 = vor.u32 %v1832_v63, %v1828_v3  ;;  %v1972_v13 = vrot.slane %v7108_v59, 2  ;;  %v1851_v36 = vshll.u32 %v7180_v15, 16  ;;  %v6095_v9 = vld [vmem:[%s5383_s29 + $0x20] ss:$44 sps:$4 sm:$0x18]  }
  0xa1   : > { %v2084_v0 = vsel %vm410_vm4, %v2057_v28, %v2040_v58  ;;  %v2037_v39 = vor.u32 %v2036_v50, %v2035_v17  ;;  %v7110_v25 = vshrl.u32 %v6079_v20, 16  ;;  %v7109_v8 = vshll.u32 %v6079_v20, 16  ;;  %v7181_v63 = vld [vmem:[#allocation17_spill] sm:$0xff]  ;;  %v7182_v17 = vld [vmem:[#allocation18_spill] sm:$0xff]  ;;  %v7183_v15 = vld [vmem:[#allocation7_spill] sm:$0xff] }
  0xa2   : > { %v2108_v2 = vand.u32 %v2084_v0, %v5380_v27  ;;  %v1973_v53 = vor.u32 %v1972_v13, %v1969_v19  ;;  %v1853_v18 = vrot.slane %v1851_v36, 1  ;;  %v2044_v3 = vrot.slane %v7181_v63, 6  ;;  %v6115_v59 = vld [vmem:[%s5383_s29 + $0x28] ss:$44 sps:$4 sm:$0x18]  }
  0xa3   : > { %4915 = vmatmul.mubr.msk.bf16.vlgmr.msra.gmra.mrb[40].mxu0 %vm444_vm6, %v6051_v10  ;;  %v1993_v31 = vrot.slane %v7110_v25, 1  ;;  %v1996_v58 = vrot.slane %v7109_v8, 2  ;;  %v2045_v50 = vrot.slane %v7182_v17, 7  ;;  %v1842_v28 = vshrl.u32 %v7183_v15, 16 }
  0xa4   : > { %2239 = vmatprep.subr.bf16.mxu1 %v2108_v2  ;;  %v2056_v0 = vsel %vm5401_vm5, %v1833_v29, %v1973_v53  ;;  %v1854_v19 = vor.u32 %v1853_v18, %v1849_v52  ;;  %v1844_v13 = vshll.u32 %v7183_v15, 16  ;;  %v7111_v36 = vshrl.u32 %v6095_v9, 16  ;;  %2312 = vmatprep.mubr.bf16.mxu0 %v7144_v42 }
  0xa5   : > { %v2081_v8 = vsel %vm410_vm4, %v2056_v0, %v2037_v39  ;;  %v1997_v25 = vor.u32 %v1996_v58, %v1993_v31  ;;  %v2046_v17 = vor.u32 %v2045_v50, %v2044_v3  ;;  %v7115_v2 = vshll.u32 %v6095_v9, 16  ;;  %v7184_v39 = vld [vmem:[#allocation20_spill] sm:$0xff] }
  0xa6   : > { %v2106_v63 = vand.u32 %v2081_v8, %v5380_v27  ;;  %v1846_v53 = vrot.slane %v1844_v13, 1  ;;  %v1985_v52 = vrot.slane %v7111_v36, 1  ;;  %v2041_v29 = vrot.slane %v5771_v44, 6  ;;  %v5237_v3 = vld [vmem:[%s5383_s29 + $0x28] ss:$0 sps:$4 sm:$0x33]  }
  0xa7   : > { %v2059_v18 = vsel %vm5401_vm5, %v1854_v19, %v1997_v25  ;;  %v1988_v15 = vrot.slane %v7115_v2, 2  ;;  %v2042_v31 = vrot.slane %v7184_v39, 7  ;;  %v1856_v58 = vshrl.u32 %v5237_v3, 16  ;;  %v2372_v36 = vld [vmem:[%s5383_s29 + $0x58] sm:$0x33]  ;;  %v7185_v39 = vld [vmem:[#allocation21_spill] sm:$0xff] }
  0xa8   : > { %2240 = vmatpush1.bf16.msra.mxu1 %v2106_v63  ;;  %v2090_v50 = vsel %vm410_vm4, %v2059_v18, %v2046_v17  ;;  %v1847_v8 = vor.u32 %v1846_v53, %v1842_v28  ;;  %v1858_v0 = vshll.u32 %v5237_v3, 16  ;;  %v7117_v13 = vshrl.u32 %v6115_v59, 16 }
  0xa9   : > { %v2112_v44 = vand.u32 %v2090_v50, %v5380_v27  ;;  %v1989_v55 = vor.u32 %v1988_v15, %v1985_v52  ;;  %v2043_v25 = vor.u32 %v2042_v31, %v2041_v29  ;;  %5044 = vmatprep.subr.bf16.mxu1 %v7156_v26  ;;  %v7116_v19 = vshll.u32 %v6115_v59, 16  ;;  %v2373_v15 = vld [vmem:[%s5383_s29 + $0x60] sm:$0x33] }
  0xaa   : > { %v1860_v2 = vrot.slane %v1858_v0, 1  ;;  %v2001_v63 = vrot.slane %v7117_v13, 1  ;;  %v2047_v17 = vrot.slane %v7185_v39, 6  ;;  %v2048_v28 = vrot.slane %v5794_v32, 7  ;;  %v7186_v0 = vld [vmem:[#allocation3_spill] sm:$0xff] }
  0xab   : > { %4916 = vmatmul.mubr.msk.bf16.vlgmr.msra.gmra.mrb[40].mxu1 %vm444_vm6, %v6051_v10  ;;  %2280 = vmatprep.subr.bf16.mxu0 %v2112_v44  ;;  %v2058_v53 = vsel %vm5401_vm5, %v1847_v8, %v1989_v55  ;;  %v2004_v52 = vrot.slane %v7116_v19, 2  ;;  %v2379_v29 = vrot.slane %v5902_v35, 3  ;;  %v6147_v18 = vcombine.low %v2372_v36, %v2372_v36 }
  0xac   : > { %v2087_v31 = vsel %vm410_vm4, %v2058_v53, %v2043_v25  ;;  %v1861_v3 = vor.u32 %v1860_v2, %v1856_v58  ;;  %v2049_v50 = vor.u32 %v2048_v28, %v2047_v17  ;;  %5046 = vmatprep.mubr.msk.bf16.mxu1 %vm5268_vm7, %v7156_v26  ;;  %v6153_v44 = vcombine.high %v2372_v36, %v2372_v36  ;;  %v2374_v53 = vld [vmem:[%s5383_s29 + $0x68] sm:$0x33] }
  0xad   : > { %v2110_v55 = vand.u32 %v2087_v31, %v5380_v27  ;;  %v2005_v8 = vor.u32 %v2004_v52, %v2001_v63  ;;  %v2451_v19 = vsel %vm5401_vm5, %v2379_v29, %v7186_v0  ;;  %v2378_v13 = vrot.slane %v5928_v47, 3 }
  0xae   : > { %v2440_v35 = vrot.slane %v6153_v44, 5  ;;  %v2439_v2 = vrot.slane %v6147_v18, 5  ;;  %v2381_v58 = vrot.slane %v5944_v51, 3  ;;  %v6163_v25 = vcombine.low %v2373_v15, %v2373_v15 }
  0xaf   : > { %2281 = vmatpush1.bf16.msra.mxu0 %v2110_v55  ;;  %v2060_v36 = vsel %vm5401_vm5, %v1861_v3, %v2005_v8  ;;  %v2450_v63 = vsel %vm5401_vm5, %v2378_v13, %v5427_v54  ;;  %v6170_v17 = vcombine.high %v2373_v15, %v2373_v15  ;;  %v2380_v28 = vrot.slane %v5965_v37, 3  ;;  %v2375_v8 = vld [vmem:[%s5383_s29 + $0x70] sm:$0x33] }
  0xb0   : > { %v2093_v52 = vsel %vm410_vm4, %v2060_v36, %v2049_v50  ;;  %v2466_v29 = vsel %vm410_vm4, %v2451_v19, %v2440_v35  ;;  %v2463_v31 = vsel %vm410_vm4, %v2450_v63, %v2439_v2  ;;  %v2453_v3 = vsel %vm5401_vm5, %v2381_v58, %v5409_v41 }
  0xb1   : > { %v2114_v55 = vand.u32 %v2093_v52, %v5380_v27  ;;  %v2496_v54 = vand.u32 %v2466_v29, %v5380_v27  ;;  %v2494_v13 = vand.u32 %v2463_v31, %v5380_v27  ;;  %v2442_v15 = vrot.slane %v6170_v17, 5 }
  0xb2   : > { %4917 = vmatmul.mubr.msk.bf16.vlgmr.msra.gmra.mrb[44].mxu0 %vm444_vm6, %v6051_v10  ;;  %v2441_v50 = vrot.slane %v6163_v25, 5  ;;  %v2452_v35 = vsel %vm5401_vm5, %v2380_v28, %v5451_v6  ;;  %v2383_v19 = vrot.slane %v5992_v12, 3  ;;  %v6191_v41 = vcombine.low %v2374_v53, %v2374_v53 }
  0xb3   : > { %5045 = vmatpush3.bf16.msra.mxu1 %v2114_v55  ;;  %2516 = vmatprep.subr.bf16.mxu0 %v2496_v54  ;;  %v2472_v0 = vsel %vm410_vm4, %v2453_v3, %v2442_v15  ;;  %v6195_v2 = vcombine.high %v2374_v53, %v2374_v53  ;;  %v2382_v58 = vrot.slane %v6012_v40, 3  ;;  %v2385_v36 = vrot.slane %v6033_v62, 3  ;;  %v2376_v55 = vld [vmem:[%s5383_s29 + $0x78] sm:$0x33] }
  0xb4   : > { %2517 = vmatpush1.bf16.msra.mxu0 %v2494_v13  ;;  %v2500_v63 = vand.u32 %v2472_v0, %v5380_v27  ;;  %v2469_v6 = vsel %vm410_vm4, %v2452_v35, %v2441_v50  ;;  %2548 = vmatprep.mubr.bf16.mxu0 %v7144_v42  ;;  %v2455_v28 = vsel %vm5401_vm5, %v2383_v19, %v5480_v22  ;;  %v2443_v52 = vrot.slane %v6191_v41, 5  ;;  %v6229_v0 = vld [vmem:[%s5383_s29 + $0x80] ss:$0 sps:$4 sm:$0x33]  }
  0xb5   : > { %v2498_v53 = vand.u32 %v2469_v6, %v5380_v27  ;;  %v2444_v29 = vrot.slane %v6195_v2, 5  ;;  %v2454_v31 = vsel %vm5401_vm5, %v2382_v58, %v5478_v21  ;;  %v6211_v3 = vcombine.low %v2375_v8, %v2375_v8 }
  0xb6   : > { %5047 = vmatmul.mubr.msk.bf16.vlgmr.msra.gmra.mrb[44].mxu1 %vm444_vm6, %v6051_v10  ;;  %2557 = vmatprep.subr.bf16.mxu1 %v2500_v63  ;;  %v2475_v22 = vsel %vm410_vm4, %v2454_v31, %v2443_v52  ;;  %v6217_v54 = vcombine.high %v2375_v8, %v2375_v8  ;;  %v2457_v13 = vsel %vm5401_vm5, %v2385_v36, %v5517_v61  ;;  %v2384_v15 = vrot.slane %v6058_v23, 3 }
  0xb7   : > { %2558 = vmatpush1.bf16.msra.mxu1 %v2498_v53  ;;  %2589 = vmatprep.mubr.bf16.mxu1 %v7144_v42  ;;  %v2478_v21 = vsel %vm410_vm4, %v2455_v28, %v2444_v29  ;;  %v2502_v50 = vand.u32 %v2475_v22, %v5380_v27  ;;  %v2445_v35 = vrot.slane %v6211_v3, 5  ;;  %v2387_v19 = vrot.slane %v6079_v20, 3 }
  0xb8   : > { %v2504_v8 = vand.u32 %v2478_v21, %v5380_v27  ;;  %v2446_v58 = vrot.slane %v6217_v54, 5  ;;  %v2456_v61 = vsel %vm5401_vm5, %v2384_v15, %v5515_v60  ;;  %v6236_v36 = vcombine.low %v2376_v55, %v2376_v55  ;;  %v5238_v21 = vld [vmem:[%s5383_s29 + $0x54] ss:$0 sps:$4 sm:$0x66]  }
  0xb9   : > { %v2481_v63 = vsel %vm410_vm4, %v2456_v61, %v2445_v35  ;;  %v6239_v6 = vcombine.high %v2376_v55, %v2376_v55  ;;  %v2459_v28 = vsel %vm5401_vm5, %v2387_v19, %v5556_v48  ;;  %v2386_v52 = vrot.slane %v6095_v9, 3 }
  0xba   : > { %4930 = vmatmul.mubr.msk.bf16.vlgmr.msra.gmra.mrb[48].mxu0 %vm444_vm6, %v6051_v10  ;;  %2598 = vmatprep.subr.bf16.mxu0 %v2504_v8  ;;  %v2484_v53 = vsel %vm410_vm4, %v2457_v13, %v2446_v58  ;;  %v2506_v60 = vand.u32 %v2481_v63, %v5380_v27  ;;  %v2447_v29 = vrot.slane %v6236_v36, 5  ;;  %v2388_v31 = vrot.slane %v6115_v59, 3 }
  0xbb   : > { %2599 = vmatpush1.bf16.msra.mxu0 %v2502_v50  ;;  %v2508_v55 = vand.u32 %v2484_v53, %v5380_v27  ;;  %2630 = vmatprep.mubr.bf16.mxu0 %v7144_v42  ;;  %v2448_v48 = vrot.slane %v6239_v6, 5  ;;  %v2458_v22 = vsel %vm5401_vm5, %v2386_v52, %v5554_v46  ;;  %v2449_v15 = vrot.slane %v6229_v0, 5 }
  0xbc   : > { %v2487_v13 = vsel %vm410_vm4, %v2458_v22, %v2447_v29  ;;  %v2460_v35 = vsel %vm5401_vm5, %v2388_v31, %v5238_v21  ;;  %v2775_v50 = vrot.slane %v5584_v30, 1  ;;  %v2776_v19 = vrot.slane %v5592_v56, 2 }
  0xbd   : > { %2639 = vmatprep.subr.bf16.mxu1 %v2508_v55  ;;  %v2490_v8 = vsel %vm410_vm4, %v2459_v28, %v2448_v48  ;;  %v2510_v58 = vand.u32 %v2487_v13, %v5380_v27  ;;  %v2493_v61 = vsel %vm410_vm4, %v2460_v35, %v2449_v15  ;;  %v2825_v46 = vshrl.u32 %v6153_v44, 16  ;;  %v7187_v13 = vld [vmem:[#allocation22_spill] sm:$0xff] }
  0xbe   : > { %4931 = vmatmul.mubr.msk.bf16.vlgmr.msra.gmra.mrb[48].mxu1 %vm444_vm6, %v6051_v10  ;;  %v2512_v63 = vand.u32 %v2490_v8, %v5380_v27  ;;  %v2514_v52 = vand.u32 %v2493_v61, %v5380_v27  ;;  %v2777_v53 = vor.u32 %v2776_v19, %v2775_v50  ;;  %v2828_v30 = vshll.u32 %v6153_v44, 16 }
  0xbf   : > { %2640 = vmatpush1.bf16.msra.mxu1 %v2506_v60  ;;  %2671 = vmatprep.mubr.bf16.mxu1 %v7144_v42  ;;  %v2827_v56 = vrot.slane %v2825_v46, 6  ;;  %v2923_v28 = vshrl.u32 %v5813_v14, 16  ;;  %v2926_v29 = vshll.u32 %v5813_v14, 16  ;;  %v2772_v31 = vrot.slane %v5602_v5, 1 }
  0xc0   : > { %2680 = vmatprep.subr.bf16.mxu0 %v2512_v63  ;;  %5050 = vmatprep.subr.bf16.mxu1 %v7156_v26  ;;  %v2830_v55 = vrot.slane %v2828_v30, 7  ;;  %v2773_v48 = vrot.slane %v5605_v7, 2  ;;  %v2817_v60 = vshrl.u32 %v6147_v18, 16  ;;  %v2820_v22 = vshll.u32 %v6147_v18, 16 }
  0xc1   : > { %v2925_v15 = vrot.slane %v2923_v28, 7  ;;  %v2916_v21 = vshrl.u32 %v7187_v13, 16  ;;  %v2919_v35 = vshll.u32 %v7187_v13, 16  ;;  %v2781_v14 = vrot.slane %v5618_v45, 1 }
  0xc2   : > { %4932 = vmatmul.mubr.msk.bf16.vlgmr.msra.gmra.mrb[52].mxu0 %vm444_vm6, %v6051_v10  ;;  %v2831_v5 = vor.u32 %v2830_v55, %v2827_v56  ;;  %v2774_v50 = vor.u32 %v2773_v48, %v2772_v31  ;;  %v2819_v19 = vrot.slane %v2817_v60, 6  ;;  %v2822_v7 = vrot.slane %v2820_v22, 7 }
  0xc3   : > { %2681 = vmatpush1.bf16.msra.mxu0 %v2510_v58  ;;  %2712 = vmatprep.mubr.bf16.mxu0 %v7144_v42  ;;  %v2928_v8 = vor.u32 %v2926_v29, %v2925_v15  ;;  %v2918_v61 = vrot.slane %v2916_v21, 7  ;;  %v2782_v63 = vrot.slane %v5629_v16, 2  ;;  %v2841_v45 = vshrl.u32 %v6170_v17, 16 }
  0xc4   : > { %v2993_v28 = vsel %vm5401_vm5, %v2777_v53, %v2831_v5  ;;  %v2823_v56 = vor.u32 %v2822_v7, %v2819_v19  ;;  %v2844_v31 = vshll.u32 %v6170_v17, 16  ;;  %v2937_v55 = vshrl.u32 %v5829_v11, 16 }
  0xc5   : > { %v3008_v48 = vsel %vm410_vm4, %v2993_v28, %v2928_v8  ;;  %v2921_v13 = vor.u32 %v2919_v35, %v2918_v61  ;;  %v2783_v58 = vor.u32 %v2782_v63, %v2781_v14  ;;  %v2843_v29 = vrot.slane %v2841_v45, 6 }
  0xc6   : > { %4933 = vmatmul.mubr.msk.bf16.vlgmr.msra.gmra.mrb[52].mxu1 %vm444_vm6, %v6051_v10  ;;  %v3038_v16 = vand.u32 %v3008_v48, %v5380_v27  ;;  %v2992_v53 = vsel %vm5401_vm5, %v2774_v50, %v2823_v56  ;;  %v2846_v15 = vrot.slane %v2844_v31, 7  ;;  %v2939_v21 = vrot.slane %v2937_v55, 7 }
  0xc7   : > { %5051 = vmatpush3.bf16.msra.mxu1 %v2514_v52  ;;  %5052 = vmatprep.mubr.msk.bf16.mxu1 %vm5268_vm7, %v7156_v26  ;;  %v3005_v35 = vsel %vm410_vm4, %v2992_v53, %v2921_v13  ;;  %v2940_v14 = vshll.u32 %v5829_v11, 16  ;;  %v2778_v5 = vrot.slane %v5648_v43, 1  ;;  %v2779_v19 = vrot.slane %v5651_v1, 2 }
  0xc8   : > { %3058 = vmatprep.subr.bf16.mxu0 %v3038_v16  ;;  %v3036_v7 = vand.u32 %v3005_v35, %v5380_v27  ;;  %v2847_v50 = vor.u32 %v2846_v15, %v2843_v29  ;;  %v2833_v8 = vshrl.u32 %v6163_v25, 16  ;;  %v2836_v61 = vshll.u32 %v6163_v25, 16 }
  0xc9   : > { %v2942_v52 = vor.u32 %v2940_v14, %v2939_v21  ;;  %v2780_v63 = vor.u32 %v2779_v19, %v2778_v5  ;;  %v2930_v28 = vshrl.u32 %v5827_v33, 16  ;;  %v2933_v56 = vshll.u32 %v5827_v33, 16 }
  0xca   : > { %4934 = vmatmul.mubr.msk.bf16.vlgmr.msra.gmra.mrb[56].mxu0 %vm444_vm6, %v6051_v10  ;;  %v2995_v43 = vsel %vm5401_vm5, %v2783_v58, %v2847_v50  ;;  %v2835_v1 = vrot.slane %v2833_v8, 6  ;;  %v2838_v11 = vrot.slane %v2836_v61, 7  ;;  %v2787_v55 = vrot.slane %v7169_v4, 1 }
  0xcb   : > { %3059 = vmatpush1.bf16.msra.mxu0 %v3036_v7  ;;  %v3014_v48 = vsel %vm410_vm4, %v2995_v43, %v2942_v52  ;;  %v2932_v13 = vrot.slane %v2930_v28, 7  ;;  %3090 = vmatprep.mubr.bf16.mxu0 %v7144_v42  ;;  %v2788_v33 = vrot.slane %v7170_v49, 2  ;;  %v7133_v29 = vshrl.u32 %v6195_v2, 16 }
  0xcc   : > { %v3042_v58 = vand.u32 %v3014_v48, %v5380_v27  ;;  %v2839_v16 = vor.u32 %v2838_v11, %v2835_v1  ;;  %v7132_v53 = vshll.u32 %v6195_v2, 16  ;;  %v2951_v15 = vshrl.u32 %v5857_v24, 16  ;;  %v7188_v1 = vld [vmem:[#allocation23_spill] sm:$0xff] }
  0xcd   : > { %v2935_v21 = vor.u32 %v2933_v56, %v2932_v13  ;;  %v2789_v35 = vor.u32 %v2788_v33, %v2787_v55  ;;  %v2859_v4 = vrot.slane %v7133_v29, 6  ;;  %v2954_v14 = vshll.u32 %v5857_v24, 16 }
  0xce   : > { %5053 = vmatmul.mubr.msk.bf16.vlgmr.msra.gmra.mrb[56].mxu1 %vm444_vm6, %v6051_v10  ;;  %3099 = vmatprep.subr.bf16.mxu1 %v3042_v58  ;;  %v2994_v49 = vsel %vm5401_vm5, %v2780_v63, %v2839_v16  ;;  %v2862_v5 = vrot.slane %v7132_v53, 7  ;;  %v2953_v19 = vrot.slane %v2951_v15, 7  ;;  %v2784_v7 = vrot.slane %v7172_v57, 1  ;;  %v7189_v58 = vld [vmem:[#allocation13_spill] sm:$0xff]  ;;  %v7190_v15 = vld [vmem:[#allocation14_spill] sm:$0xff] }
  0xcf   : > { %v3011_v50 = vsel %vm410_vm4, %v2994_v49, %v2935_v21  ;;  %3131 = vmatprep.mubr.bf16.mxu1 %v7144_v42  ;;  %v2785_v52 = vrot.slane %v7173_v34, 2  ;;  %v7131_v24 = vshrl.u32 %v6191_v41, 16  ;;  %v7130_v28 = vshll.u32 %v6191_v41, 16 }
  0xd0   : > { %v3040_v56 = vand.u32 %v3011_v50, %v5380_v27  ;;  %v2863_v43 = vor.u32 %v2862_v5, %v2859_v4  ;;  %v2956_v63 = vor.u32 %v2954_v14, %v2953_v19  ;;  %v2944_v11 = vshrl.u32 %v7188_v1, 16 }
  0xd1   : > { %v2786_v55 = vor.u32 %v2785_v52, %v2784_v7  ;;  %v2851_v57 = vrot.slane %v7131_v24, 6  ;;  %v2854_v48 = vrot.slane %v7130_v28, 7  ;;  %v2947_v13 = vshll.u32 %v7188_v1, 16  ;;  %v7191_v52 = vld [vmem:[#allocation25_spill] sm:$0xff] }
  0xd2   : > { %3100 = vmatpush1.bf16.msra.mxu1 %v3040_v56  ;;  %4936 = vmatmul.mubr.msk.bf16.vlgmr.msra.gmra.mrb[60].mxu0 %vm444_vm6, %v6051_v10  ;;  %v2997_v34 = vsel %vm5401_vm5, %v2789_v35, %v2863_v43  ;;  %v2946_v33 = vrot.slane %v2944_v11, 7  ;;  %v2793_v16 = vrot.slane %v7189_v58, 1  ;;  %v2794_v21 = vrot.slane %v7190_v15, 2  ;;  %v3324_v28 = vld [vmem:[%s5383_s29 + $0x4c] sm:$0xcc] }
  0xd3   : > { %v3020_v4 = vsel %vm410_vm4, %v2997_v34, %v2956_v63  ;;  %v2855_v14 = vor.u32 %v2854_v48, %v2851_v57  ;;  %v7129_v49 = vshrl.u32 %v6217_v54, 16  ;;  %v7128_v5 = vshll.u32 %v6217_v54, 16  ;;  %3172 = vmatprep.mubr.bf16.mxu0 %v7144_v42  ;;  %v7192_v48 = vld [vmem:[#allocation15_spill] sm:$0xff]  ;;  %v7193_v34 = vld [vmem:[#allocation16_spill] sm:$0xff] }
  0xd4   : > { %v3046_v19 = vand.u32 %v3020_v4, %v5380_v27  ;;  %v2949_v7 = vor.u32 %v2947_v13, %v2946_v33  ;;  %v2795_v50 = vor.u32 %v2794_v21, %v2793_v16  ;;  %v2965_v35 = vshrl.u32 %v7191_v52, 16 }
  0xd5   : > { %v2996_v56 = vsel %vm5401_vm5, %v2786_v55, %v2855_v14  ;;  %v2875_v43 = vrot.slane %v7129_v49, 6  ;;  %v2878_v63 = vrot.slane %v7128_v5, 7  ;;  %v2968_v1 = vshll.u32 %v7191_v52, 16  ;;  %v7194_v14 = vld [vmem:[#allocation24_spill] sm:$0xff] }
  0xd6   : > { %4937 = vmatmul.mubr.msk.bf16.vlgmr.msra.gmra.mrb[60].mxu1 %vm444_vm6, %v6051_v10  ;;  %3140 = vmatprep.subr.bf16.mxu0 %v3046_v19  ;;  %v3017_v11 = vsel %vm410_vm4, %v2996_v56, %v2949_v7  ;;  %v2967_v57 = vrot.slane %v2965_v35, 7  ;;  %v2790_v13 = vrot.slane %v7192_v48, 1  ;;  %v2791_v33 = vrot.slane %v7193_v34, 2 }
  0xd7   : > { %v3044_v55 = vand.u32 %v3017_v11, %v5380_v27  ;;  %v2879_v58 = vor.u32 %v2878_v63, %v2875_v43  ;;  %v7127_v16 = vshrl.u32 %v6211_v3, 16  ;;  %v7120_v15 = vshll.u32 %v6211_v3, 16  ;;  %3213 = vmatprep.mubr.bf16.mxu1 %v7144_v42  ;;  %v7195_v43 = vld [vmem:[#allocation17_spill] sm:$0xff] }
  0xd8   : > { %v2970_v21 = vor.u32 %v2968_v1, %v2967_v57  ;;  %v2792_v4 = vor.u32 %v2791_v33, %v2790_v13  ;;  %v2958_v19 = vshrl.u32 %v7194_v14, 16  ;;  %v2961_v7 = vshll.u32 %v7194_v14, 16  ;;  %v7196_v57 = vld [vmem:[#allocation18_spill] sm:$0xff] }
  0xd9   : > { %3141 = vmatpush1.bf16.msra.mxu0 %v3044_v55  ;;  %v2999_v52 = vsel %vm5401_vm5, %v2795_v50, %v2879_v58  ;;  %v2867_v35 = vrot.slane %v7127_v16, 6  ;;  %v2870_v56 = vrot.slane %v7120_v15, 7  ;;  %v2799_v63 = vrot.slane %v7195_v43, 1  ;;  %v7197_v55 = vld [vmem:[#allocation29_spill] sm:$0xff]  ;;  %v7198_v43 = vld [vmem:[#allocation19_spill] sm:$0xff] }
  0xda   : > { %v3026_v11 = vsel %vm410_vm4, %v2999_v52, %v2970_v21  ;;  %v2960_v1 = vrot.slane %v2958_v19, 7  ;;  %v2800_v48 = vrot.slane %v7196_v57, 2  ;;  %v7126_v13 = vshrl.u32 %v6239_v6, 16 }
  0xdb   : > { %v3050_v34 = vand.u32 %v3026_v11, %v5380_v27  ;;  %v2871_v33 = vor.u32 %v2870_v56, %v2867_v35  ;;  %v7121_v50 = vshll.u32 %v6239_v6, 16  ;;  %v2979_v58 = vshrl.u32 %v7197_v55, 16 }
  0xdc   : > { %v2963_v14 = vor.u32 %v2961_v7, %v2960_v1  ;;  %4938 = vmatmul.mubr.msk.bf16.vlgmr.msra.gmra.mrb[64].mxu0 %vm444_vm6, %v6051_v10  ;;  %v2801_v15 = vor.u32 %v2800_v48, %v2799_v63  ;;  %v2891_v21 = vrot.slane %v7126_v13, 6  ;;  %v2982_v19 = vshll.u32 %v7197_v55, 16  ;;  %v7199_v63 = vld [vmem:[#allocation20_spill] sm:$0xff]  ;;  %v4669_v13 = vld [vmem:[%s7040_s2] sm:$0x3f] }
  0xdd   : > { %3181 = vmatprep.subr.bf16.mxu1 %v3050_v34  ;;  %v2998_v52 = vsel %vm5401_vm5, %v2792_v4, %v2871_v33  ;;  %v2894_v35 = vrot.slane %v7121_v50, 7  ;;  %v2981_v56 = vrot.slane %v2979_v58, 7  ;;  %v2796_v11 = vrot.slane %v7198_v43, 1  ;;  %3254 = vmatprep.mubr.bf16.mxu0 %v7144_v42  ;;  %v7200_v33 = vld [vmem:[#allocation27_spill] sm:$0xff] }
  0xde   : > { %v3023_v7 = vsel %vm410_vm4, %v2998_v52, %v2963_v14  ;;  %v2797_v1 = vrot.slane %v7199_v63, 2  ;;  %v7124_v57 = vshrl.u32 %v6236_v36, 16  ;;  %v7122_v48 = vshll.u32 %v6236_v36, 16  ;;  %4672 = vperm.xlu0 %5110, %v4669_v13  }
  0xdf   : > { %v3048_v34 = vand.u32 %v3023_v7, %v5380_v27  ;;  %v2895_v55 = vor.u32 %v2894_v35, %v2891_v21  ;;  %v2984_v4 = vor.u32 %v2982_v19, %v2981_v56  ;;  %v2972_v50 = vshrl.u32 %v7200_v33, 16 }
  0xe0   : > { %v2798_v58 = vor.u32 %v2797_v1, %v2796_v11  ;;  %v2883_v43 = vrot.slane %v7124_v57, 6  ;;  %v2886_v14 = vrot.slane %v7122_v48, 7  ;;  %v2975_v52 = vshll.u32 %v7200_v33, 16  ;;  %v3314_v33 = vld [vmem:[%s5383_s29] sm:$0x66] }
  0xe1   : > { %3182 = vmatpush1.bf16.msra.mxu1 %v3048_v34  ;;  %v3001_v63 = vsel %vm5401_vm5, %v2801_v15, %v2895_v55  ;;  %v2974_v7 = vrot.slane %v2972_v50, 7  ;;  %v2802_v21 = vrot.slane %v7185_v39, 1  ;;  %v2803_v19 = vrot.slane %v5794_v32, 2  ;;  %v7201_v50 = vld [vmem:[#allocation26_spill] sm:$0xff] }
  0xe2   : > { %v3032_v35 = vsel %vm410_vm4, %v3001_v63, %v2984_v4  ;;  %v2887_v56 = vor.u32 %v2886_v14, %v2883_v43  ;;  %5056 = vmatprep.subr.bf16.mxu1 %v7156_v26  ;;  %v7123_v11 = vshrl.u32 %v6229_v0, 16  ;;  %v7125_v1 = vshll.u32 %v6229_v0, 16  ;;  %v3320_v39 = vld [vmem:[%s5383_s29 + $0x2c] sm:$0xcc] }
  0xe3   : > { %v3054_v34 = vand.u32 %v3032_v35, %v5380_v27  ;;  %v2977_v48 = vor.u32 %v2975_v52, %v2974_v7  ;;  %v2804_v15 = vor.u32 %v2803_v19, %v2802_v21  ;;  %v2986_v55 = vshrl.u32 %v7201_v50, 16  ;;  %v3315_v19 = vld [vmem:[%s5383_s29 + $0x8] sm:$0x66] }
  0xe4   : > { %4939 = vmatmul.mubr.msk.bf16.vlgmr.msra.gmra.mrb[64].mxu1 %vm444_vm6, %v6051_v10  ;;  %v3000_v32 = vsel %vm5401_vm5, %v2798_v58, %v2887_v56  ;;  %v2899_v4 = vrot.slane %v7123_v11, 6  ;;  %v2902_v43 = vrot.slane %v7125_v1, 7  ;;  %v2989_v14 = vshll.u32 %v7201_v50, 16  ;;  %v7202_v56 = vld [vmem:[#allocation28_spill] sm:$0xff] }
  0xe5   : > { %3222 = vmatprep.subr.bf16.mxu0 %v3054_v34  ;;  %v3029_v52 = vsel %vm410_vm4, %v3000_v32, %v2977_v48  ;;  %v2988_v63 = vrot.slane %v2986_v55, 7  ;;  %5058 = vmatprep.mubr.msk.bf16.mxu1 %vm5268_vm7, %v7156_v26  ;;  %v4942_v7 = vcombine.low %v3314_v33, %v3314_v33  ;;  %v4943_v21 = vcombine.high %v3314_v33, %v3314_v33 }
  0xe6   : > { %v3052_v58 = vand.u32 %v3029_v52, %v5380_v27  ;;  %v2903_v35 = vor.u32 %v2902_v43, %v2899_v4  ;;  %v3377_v11 = vrot.slane %v7202_v56, 2  ;;  %v6452_v57 = vcombine.low %v3320_v39, %v3320_v39  ;;  %v3321_v52 = vld [vmem:[%s5383_s29 + $0x34] sm:$0xcc] }
  0xe7   : > { %v2991_v1 = vor.u32 %v2989_v14, %v2988_v63  ;;  %v3354_v50 = vrot.slane %v4942_v7, 1  ;;  %v3355_v34 = vrot.slane %v4943_v21, 1  ;;  %v6454_v48 = vcombine.high %v3320_v39, %v3320_v39 }
  0xe8   : > { %3223 = vmatpush1.bf16.msra.mxu0 %v3052_v58  ;;  %v3002_v55 = vsel %vm5401_vm5, %v2804_v15, %v2903_v35  ;;  %v3376_v33 = vrot.slane %v5928_v47, 2  ;;  %v3426_v32 = vrot.slane %v6452_v57, 7  ;;  %v4944_v4 = vcombine.low %v3315_v19, %v3315_v19  ;;  %v3316_v35 = vld [vmem:[%s5383_s29 + $0x10] sm:$0x66] }
  0xe9   : > { %v3035_v43 = vsel %vm410_vm4, %v3002_v55, %v2991_v1  ;;  %v3427_v14 = vrot.slane %v6454_v48, 7  ;;  %v3438_v63 = vsel %vm5401_vm5, %v3355_v34, %v3377_v11  ;;  %v4945_v39 = vcombine.high %v3315_v19, %v3315_v19  ;;  %v3322_v55 = vld [vmem:[%s5383_s29 + $0x3c] sm:$0xcc] }
  0xea   : > { %v3056_v7 = vand.u32 %v3035_v43, %v5380_v27  ;;  %v3437_v15 = vsel %vm5401_vm5, %v3354_v50, %v3376_v33  ;;  %v3356_v21 = vrot.slane %v4944_v4, 1  ;;  %v3379_v58 = vrot.slane %v5944_v51, 2 }
  0xeb   : > { %4940 = vmatmul.mubr.msk.bf16.vlgmr.msra.gmra.mrb[68].mxu0 %vm444_vm6, %v6051_v10  ;;  %v3453_v1 = vsel %vm410_vm4, %v3438_v63, %v3427_v14  ;;  %v3450_v11 = vsel %vm410_vm4, %v3437_v15, %v3426_v32  ;;  %v3357_v19 = vrot.slane %v4945_v39, 1  ;;  %v6477_v34 = vcombine.low %v3321_v52, %v3321_v52 }
  0xec   : > { %5057 = vmatpush3.bf16.msra.mxu1 %v3056_v7  ;;  %v3483_v50 = vand.u32 %v3453_v1, %v5380_v27  ;;  %v3481_v33 = vand.u32 %v3450_v11, %v5380_v27  ;;  %v6482_v4 = vcombine.high %v3321_v52, %v3321_v52  ;;  %v3378_v43 = vrot.slane %v5965_v37, 2  ;;  %3535 = vmatprep.mubr.bf16.mxu0 %v7144_v42  ;;  %v3317_v1 = vld [vmem:[%s5383_s29 + $0x18] sm:$0x66] }
  0xed   : > { %v3440_v32 = vsel %vm5401_vm5, %v3357_v19, %v3379_v58  ;;  %v3428_v14 = vrot.slane %v6477_v34, 7  ;;  %v4946_v63 = vcombine.low %v3316_v35, %v3316_v35  ;;  %v4947_v13 = vcombine.high %v3316_v35, %v3316_v35 }
  0xee   : > { %3503 = vmatprep.subr.bf16.mxu0 %v3483_v50  ;;  %v3429_v39 = vrot.slane %v6482_v4, 7  ;;  %v3439_v7 = vsel %vm5401_vm5, %v3356_v21, %v3378_v43  ;;  %v3381_v52 = vrot.slane %v5992_v12, 2  ;;  %v6493_v15 = vcombine.low %v3322_v55, %v3322_v55  ;;  %v3323_v50 = vld [vmem:[%s5383_s29 + $0x44] sm:$0xcc] }
  0xef   : > { %5059 = vmatmul.mubr.msk.bf16.vlgmr.msra.gmra.mrb[68].mxu1 %vm444_vm6, %v6051_v10  ;;  %3504 = vmatpush1.bf16.msra.mxu0 %v3481_v33  ;;  %v3456_v58 = vsel %vm410_vm4, %v3439_v7, %v3428_v14  ;;  %v3358_v11 = vrot.slane %v4946_v63, 1  ;;  %v3359_v19 = vrot.slane %v4947_v13, 1  ;;  %v6499_v35 = vcombine.high %v3322_v55, %v3322_v55 }
  0xf0   : > { %v3459_v16 = vsel %vm410_vm4, %v3440_v32, %v3429_v39  ;;  %v3485_v21 = vand.u32 %v3456_v58, %v5380_v27  ;;  %3576 = vmatprep.mubr.bf16.mxu1 %v7144_v42  ;;  %v3380_v43 = vrot.slane %v6012_v40, 2  ;;  %v3430_v5 = vrot.slane %v6493_v15, 7  ;;  %v3318_v58 = vld [vmem:[%s5383_s29 + $0x20] sm:$0x66] }
  0xf1   : > { %v3487_v33 = vand.u32 %v3459_v16, %v5380_v27  ;;  %v3431_v14 = vrot.slane %v6499_v35, 7  ;;  %v3442_v55 = vsel %vm5401_vm5, %v3359_v19, %v3381_v52  ;;  %v4948_v63 = vcombine.low %v3317_v1, %v3317_v1 }
  0xf2   : > { %v3441_v32 = vsel %vm5401_vm5, %v3358_v11, %v3380_v43  ;;  %v4949_v13 = vcombine.high %v3317_v1, %v3317_v1  ;;  %v3383_v39 = vrot.slane %v6033_v62, 2  ;;  %v6514_v7 = vcombine.low %v3323_v50, %v3323_v50 }
  0xf3   : > { %3544 = vmatprep.subr.bf16.mxu1 %v3487_v33  ;;  %4964 = vmatmul.mubr.msk.bf16.vlgmr.msra.gmra.mrb[72].mxu0 %vm444_vm6, %v6051_v10  ;;  %v3465_v16 = vsel %vm410_vm4, %v3442_v55, %v3431_v14  ;;  %v3462_v49 = vsel %vm410_vm4, %v3441_v32, %v3430_v5  ;;  %v3360_v52 = vrot.slane %v4948_v63, 1  ;;  %v6521_v19 = vcombine.high %v3323_v50, %v3323_v50  ;;  %v5218_v50 = vld [vmem:[%s5383_s29 + $0x28] ss:$0 sps:$4 sm:$0x66]  }
  0xf4   : > { %3545 = vmatpush1.bf16.msra.mxu1 %v3485_v21  ;;  %v3491_v1 = vand.u32 %v3465_v16, %v5380_v27  ;;  %v3489_v11 = vand.u32 %v3462_v49, %v5380_v27  ;;  %v3361_v43 = vrot.slane %v4949_v13, 1  ;;  %v3382_v33 = vrot.slane %v6058_v23, 2  ;;  %3617 = vmatprep.mubr.bf16.mxu0 %v7144_v42  ;;  %v6539_v13 = vld [vmem:[%s5383_s29 + $0x54] ss:$0 sps:$4 sm:$0xcc]  }
  0xf5   : > { %v3433_v24 = vrot.slane %v6521_v19, 7  ;;  %v3432_v14 = vrot.slane %v6514_v7, 7  ;;  %v4950_v5 = vcombine.low %v3318_v58, %v3318_v58  ;;  %v4951_v55 = vcombine.high %v3318_v58, %v3318_v58 }
  0xf6   : > { %3585 = vmatprep.subr.bf16.mxu0 %v3491_v1  ;;  %v3444_v21 = vsel %vm5401_vm5, %v3361_v43, %v3383_v39  ;;  %v3443_v63 = vsel %vm5401_vm5, %v3360_v52, %v3382_v33  ;;  %v3385_v49 = vrot.slane %v6079_v20, 2  ;;  %v6536_v32 = vcombine.low %v3324_v28, %v3324_v28 }
  0xf7   : > { %4965 = vmatmul.mubr.msk.bf16.vlgmr.msra.gmra.mrb[72].mxu1 %vm444_vm6, %v6051_v10  ;;  %3586 = vmatpush1.bf16.msra.mxu0 %v3489_v11  ;;  %v3471_v58 = vsel %vm410_vm4, %v3444_v21, %v3433_v24  ;;  %v3468_v16 = vsel %vm410_vm4, %v3443_v63, %v3432_v14  ;;  %v3362_v1 = vrot.slane %v4950_v5, 1  ;;  %v3363_v53 = vrot.slane %v4951_v55, 1 }
  0xf8   : > { %v3495_v39 = vand.u32 %v3471_v58, %v5380_v27  ;;  %v3493_v52 = vand.u32 %v3468_v16, %v5380_v27  ;;  %3658 = vmatprep.mubr.bf16.mxu1 %v7144_v42  ;;  %v6548_v43 = vcombine.high %v3324_v28, %v3324_v28  ;;  %v3384_v33 = vrot.slane %v6095_v9, 2 }
  0xf9   : > { %v3446_v29 = vsel %vm5401_vm5, %v3363_v53, %v3385_v49  ;;  %v3434_v11 = vrot.slane %v6536_v32, 7  ;;  %v3364_v24 = vrot.slane %v5218_v50, 1  ;;  %v3386_v14 = vrot.slane %v6115_v59, 2 }
  0xfa   : > { %3626 = vmatprep.subr.bf16.mxu1 %v3495_v39  ;;  %v3435_v5 = vrot.slane %v6548_v43, 7  ;;  %v3445_v55 = vsel %vm5401_vm5, %v3362_v1, %v3384_v33  ;;  %v3436_v21 = vrot.slane %v6539_v13, 7  ;;  %v7203_v28 = vshrl.u32 %v7202_v56, 16 }
  0xfb   : > { %3627 = vmatpush1.bf16.msra.mxu1 %v3493_v52  ;;  %4966 = vmatmul.mubr.msk.bf16.vlgmr.msra.gmra.mrb[76].mxu0 %vm444_vm6, %v6051_v10  ;;  %v3474_v53 = vsel %vm410_vm4, %v3445_v55, %v3434_v11  ;;  %v3447_v50 = vsel %vm5401_vm5, %v3364_v24, %v3386_v14  ;;  %v7204_v49 = vshll.u32 %v7202_v56, 16  ;;  %v3811_v16 = vshrl.u32 %v6454_v48, 16 }
  0xfc   : > { %v3762_v63 = vrot.slane %v7203_v28, 3  ;;  %v3477_v1 = vsel %vm410_vm4, %v3446_v29, %v3435_v5  ;;  %v3497_v39 = vand.u32 %v3474_v53, %v5380_v27  ;;  %5062 = vmatprep.subr.bf16.mxu1 %v7156_v26  ;;  %v3480_v52 = vsel %vm410_vm4, %v3447_v50, %v3436_v21  ;;  %3699 = vmatprep.mubr.bf16.mxu0 %v7144_v42  ;;  %v6588_v53 = vld [vmem:[%s7039_s1] sm:$0x7] }
  0xfd   : > { %v3763_v58 = vrot.slane %v7204_v49, 4  ;;  %v3813_v10 = vshll.u32 %v6454_v48, 16  ;;  %v3499_v33 = vand.u32 %v3477_v1, %v5380_v27  ;;  %v3501_v11 = vand.u32 %v3480_v52, %v5380_v27 }
  0xfe   : > { %v3894_v24 = vrot.slane %v2825_v46, 5  ;;  %v3895_v29 = vrot.slane %v2828_v30, 6  ;;  %v7205_v5 = vshrl.u32 %v5928_v47, 16  ;;  %v7206_v21 = vshll.u32 %v5928_v47, 16 }
  0xff   : > { %v3764_v56 = vor.u32 %v3763_v58, %v3762_v63  ;;  %v3815_v14 = vrot.slane %v3813_v10, 1  ;;  %4967 = vmatmul.mubr.msk.bf16.vlgmr.msra.gmra.mrb[76].mxu1 %vm444_vm6, %v6588_v53  ;;  %3667 = vmatprep.subr.bf16.mxu0 %v3499_v33  ;;  %v3804_v46 = vshrl.u32 %v6452_v57, 16  ;;  %v3806_v63 = vshll.u32 %v6452_v57, 16 }
 0x100   : > { %v3759_v55 = vrot.slane %v7205_v5, 3  ;;  %v3760_v28 = vrot.slane %v7206_v21, 4  ;;  %v3891_v30 = vrot.slane %v2817_v60, 5  ;;  %v3892_v47 = vrot.slane %v2820_v22, 6  ;;  %3668 = vmatpush1.bf16.msra.mxu0 %v3497_v39  ;;  %5063 = vmatpush3.bf16.msra.mxu1 %v3501_v11 }
 0x101   : > { %v3816_v50 = vor.u32 %v3815_v14, %v3811_v16  ;;  %v3896_v49 = vor.u32 %v3895_v29, %v3894_v24  ;;  %v7207_v1 = vshrl.u32 %v5944_v51, 16  ;;  %5064 = vmatprep.mubr.msk.bf16.mxu1 %vm5268_vm7, %v7156_v26  ;;  %v3808_v10 = vrot.slane %v3806_v63, 1 }
 0x102   : > { %v3761_v58 = vor.u32 %v3760_v28, %v3759_v55  ;;  %v3893_v33 = vor.u32 %v3892_v47, %v3891_v30  ;;  %v7208_v5 = vshll.u32 %v5944_v51, 16  ;;  %v3825_v60 = vshrl.u32 %v6482_v4, 16 }
 0x103   : > { %v3768_v52 = vrot.slane %v7207_v1, 3  ;;  %v3925_v22 = vsel %vm5401_vm5, %v3764_v56, %v3816_v50  ;;  %v3827_v16 = vshll.u32 %v6482_v4, 16  ;;  %v3900_v39 = vrot.slane %v2841_v45, 5  ;;  %4968 = vmatmul.mubr.msk.bf16.vlgmr.msra.gmra.mrb[80].mxu0 %vm444_vm6, %v6588_v53 }
 0x104   : > { %v3769_v21 = vrot.slane %v7208_v5, 4  ;;  %v3901_v11 = vrot.slane %v2844_v31, 6  ;;  %v3940_v24 = vsel %vm410_vm4, %v3925_v22, %v3896_v49  ;;  %v3809_v51 = vor.u32 %v3808_v10, %v3804_v46  ;;  %4022 = vmatprep.mubr.bf16.mxu0 %v7144_v42 }
 0x105   : > { %v7209_v29 = vshrl.u32 %v5965_v37, 16  ;;  %v3970_v56 = vand.u32 %v3940_v24, %v5380_v27  ;;  %v3829_v28 = vrot.slane %v3827_v16, 1  ;;  %v7210_v30 = vshll.u32 %v5965_v37, 16 }
 0x106   : > { %v3770_v14 = vor.u32 %v3769_v21, %v3768_v52  ;;  %v3902_v63 = vor.u32 %v3901_v11, %v3900_v39  ;;  %v3924_v31 = vsel %vm5401_vm5, %v3761_v58, %v3809_v51  ;;  %v3818_v47 = vshrl.u32 %v6477_v34, 16 }
 0x107   : > { %v3765_v55 = vrot.slane %v7209_v29, 3  ;;  %v3766_v45 = vrot.slane %v7210_v30, 4  ;;  %v3820_v46 = vshll.u32 %v6477_v34, 16  ;;  %v3897_v50 = vrot.slane %v2833_v8, 5  ;;  %3990 = vmatprep.subr.bf16.mxu0 %v3970_v56  ;;  %5065 = vmatmul.mubr.msk.bf16.vlgmr.msra.gmra.mrb[80].mxu1 %vm444_vm6, %v6588_v53 }
 0x108   : > { %v3937_v49 = vsel %vm410_vm4, %v3924_v31, %v3893_v33  ;;  %v3830_v1 = vor.u32 %v3829_v28, %v3825_v60  ;;  %v3898_v37 = vrot.slane %v2836_v61, 6  ;;  %v7211_v5 = vshrl.u32 %v5992_v12, 16  ;;  %4063 = vmatprep.mubr.bf16.mxu1 %v7144_v42 }
 0x109   : > { %v3767_v52 = vor.u32 %v3766_v45, %v3765_v55  ;;  %v3968_v58 = vand.u32 %v3937_v49, %v5380_v27  ;;  %v3822_v10 = vrot.slane %v3820_v46, 1  ;;  %v7212_v22 = vshll.u32 %v5992_v12, 16 }
 0x10a   : > { %v3774_v21 = vrot.slane %v7211_v5, 3  ;;  %v3927_v33 = vsel %vm5401_vm5, %v3770_v14, %v3830_v1  ;;  %v3899_v60 = vor.u32 %v3898_v37, %v3897_v50  ;;  %v3839_v61 = vshrl.u32 %v6499_v35, 16 }
 0x10b   : > { %v3775_v8 = vrot.slane %v7212_v22, 4  ;;  %v3841_v16 = vshll.u32 %v6499_v35, 16  ;;  %3991 = vmatpush1.bf16.msra.mxu0 %v3968_v58  ;;  %v3946_v39 = vsel %vm410_vm4, %v3927_v33, %v3902_v63  ;;  %v3823_v11 = vor.u32 %v3822_v10, %v3818_v47 }
 0x10c   : > { %v7213_v51 = vshrl.u32 %v6195_v2, 16  ;;  %v3974_v12 = vand.u32 %v3946_v39, %v5380_v27  ;;  %v7214_v14 = vshll.u32 %v6195_v2, 16  ;;  %v7215_v28 = vshrl.u32 %v6012_v40, 16 }
 0x10d   : > { %v3776_v24 = vor.u32 %v3775_v8, %v3774_v21  ;;  %v3843_v55 = vrot.slane %v3841_v16, 1  ;;  %v3926_v45 = vsel %vm5401_vm5, %v3767_v52, %v3823_v11  ;;  %v7216_v31 = vshll.u32 %v6012_v40, 16 }
 0x10e   : > { %v3906_v29 = vrot.slane %v7213_v51, 5  ;;  %v3907_v56 = vrot.slane %v7214_v14, 6  ;;  %v3771_v30 = vrot.slane %v7215_v28, 3  ;;  %v3832_v47 = vshrl.u32 %v6493_v15, 16  ;;  %4031 = vmatprep.subr.bf16.mxu1 %v3974_v12  ;;  %4970 = vmatmul.mubr.msk.bf16.vlgmr.msra.gmra.mrb[84].mxu0 %vm444_vm6, %v6588_v53 }
 0x10f   : > { %v3772_v63 = vrot.slane %v7216_v31, 4  ;;  %v3834_v46 = vshll.u32 %v6493_v15, 16  ;;  %v3943_v50 = vsel %vm410_vm4, %v3926_v45, %v3899_v60  ;;  %v3844_v49 = vor.u32 %v3843_v55, %v3839_v61  ;;  %4104 = vmatprep.mubr.bf16.mxu0 %v7144_v42 }
 0x110   : > { %v3908_v1 = vor.u32 %v3907_v56, %v3906_v29  ;;  %v7217_v37 = vshrl.u32 %v6191_v41, 16  ;;  %v3972_v52 = vand.u32 %v3943_v50, %v5380_v27  ;;  %v7218_v5 = vshll.u32 %v6191_v41, 16 }
 0x111   : > { %v3773_v10 = vor.u32 %v3772_v63, %v3771_v30  ;;  %v3836_v40 = vrot.slane %v3834_v46, 1  ;;  %v3929_v22 = vsel %vm5401_vm5, %v3776_v24, %v3844_v49  ;;  %v7219_v8 = vshrl.u32 %v6033_v62, 16  ;;  %v6685_v46 = vpop.f32.mrb[0].mxu0 }
 0x112   : > { %v3903_v58 = vrot.slane %v7217_v37, 5  ;;  %v3904_v21 = vrot.slane %v7218_v5, 6  ;;  %v7220_v60 = vshll.u32 %v6033_v62, 16  ;;  %v3853_v16 = vshrl.u32 %v6521_v19, 16  ;;  %4032 = vmatpush1.bf16.msra.mxu1 %v3972_v52 }
 0x113   : > { %v3780_v33 = vrot.slane %v7219_v8, 3  ;;  %v3952_v39 = vsel %vm410_vm4, %v3929_v22, %v3908_v1  ;;  %v3837_v11 = vor.u32 %v3836_v40, %v3832_v47  ;;  %v3855_v29 = vshll.u32 %v6521_v19, 16 }
 0x114   : > { %v3781_v61 = vrot.slane %v7220_v60, 4  ;;  %v3905_v51 = vor.u32 %v3904_v21, %v3903_v58  ;;  %v3978_v12 = vand.u32 %v3952_v39, %v5380_v27  ;;  %v7221_v24 = vshrl.u32 %v6217_v54, 16  ;;  %v6692_v58 = vpop.f32.mrb[1].mxu0 }
 0x115   : > { %v7222_v56 = vshll.u32 %v6217_v54, 16  ;;  %v3928_v62 = vsel %vm5401_vm5, %v3773_v10, %v3837_v11  ;;  %v3857_v30 = vrot.slane %v3855_v29, 1  ;;  %v7223_v45 = vshrl.u32 %v6058_v23, 16  ;;  %4971 = vmatmul.mubr.msk.bf16.vlgmr.msra.gmra.mrb[84].mxu1 %vm444_vm6, %v6588_v53  ;;  %v512_v21 = vpop.f32.mrb[2].mxu0 }
 0x116   : > { %v3782_v55 = vor.u32 %v3781_v61, %v3780_v33  ;;  %v3912_v14 = vrot.slane %v7221_v24, 5  ;;  %v7224_v63 = vshll.u32 %v6058_v23, 16  ;;  %4072 = vmatprep.subr.bf16.mxu0 %v3978_v12  ;;  %v3949_v50 = vsel %vm410_vm4, %v3928_v62, %v3905_v51  ;;  %4145 = vmatprep.mubr.bf16.mxu1 %v7144_v42  ;;  %v513_v51 = vpop.f32.mrb[3].mxu0 }
 0x117   : > { %v3913_v28 = vrot.slane %v7222_v56, 6  ;;  %v3777_v31 = vrot.slane %v7223_v45, 3  ;;  %v3846_v1 = vshrl.u32 %v6514_v7, 16  ;;  %v3848_v37 = vshll.u32 %v6514_v7, 16  ;;  %v6710_v56 = vpop.f32.mrb[0].mxu1 }
 0x118   : > { %v3778_v47 = vrot.slane %v7224_v63, 4  ;;  %v3976_v52 = vand.u32 %v3949_v50, %v5380_v27  ;;  %v3858_v10 = vor.u32 %v3857_v30, %v3853_v16  ;;  %v7225_v40 = vshrl.u32 %v6211_v3, 16  ;;  %v6713_v45 = vpop.f32.mrb[1].mxu1 }
 0x119   : > { %v3914_v49 = vor.u32 %v3913_v28, %v3912_v14  ;;  %v3850_v22 = vrot.slane %v3848_v37, 1  ;;  %v7226_v8 = vshll.u32 %v6211_v3, 16  ;;  %v7227_v60 = vshrl.u32 %v6079_v20, 16 }
 0x11a   : > { %v3779_v23 = vor.u32 %v3778_v47, %v3777_v31  ;;  %v3909_v5 = vrot.slane %v7225_v40, 5  ;;  %v7228_v39 = vshll.u32 %v6079_v20, 16  ;;  %4073 = vmatpush1.bf16.msra.mxu0 %v3976_v52  ;;  %v3931_v16 = vsel %vm5401_vm5, %v3782_v55, %v3858_v10  ;;  %v553_v52 = vpop.f32.mrb[2].mxu1 }
 0x11b   : > { %v3910_v33 = vrot.slane %v7226_v8, 6  ;;  %v3786_v61 = vrot.slane %v7227_v60, 3  ;;  %v3867_v29 = vshrl.u32 %v6548_v43, 16  ;;  %v3869_v12 = vshll.u32 %v6548_v43, 16  ;;  %v554_v21 = vpop.f32.mrb[3].mxu1 }
 0x11c   : > { %v3787_v11 = vrot.slane %v7228_v39, 4  ;;  %v7229_v24 = vshrl.u32 %v6239_v6, 16  ;;  %v3958_v28 = vsel %vm410_vm4, %v3931_v16, %v3914_v49  ;;  %v3851_v62 = vor.u32 %v3850_v22, %v3846_v1  ;;  %v5220_v21 = vld [vmem:[%s5383_s29 + $0x58] ss:$44 sps:$4 sm:$0x18]  }
 0x11d   : > { %v3911_v30 = vor.u32 %v3910_v33, %v3909_v5  ;;  %v3982_v31 = vand.u32 %v3958_v28, %v5380_v27  ;;  %v3871_v63 = vrot.slane %v3869_v12, 1  ;;  %v7230_v55 = vshll.u32 %v6239_v6, 16  ;;  %4972 = vmatmul.mubr.msk.bf16.vlgmr.msra.gmra.mrb[88].mxu0 %vm444_vm6, %v6588_v53 }
 0x11e   : > { %v3918_v14 = vrot.slane %v7229_v24, 5  ;;  %v3788_v20 = vor.u32 %v3787_v11, %v3786_v61  ;;  %v7231_v50 = vshrl.u32 %v6095_v9, 16  ;;  %v3930_v10 = vsel %vm5401_vm5, %v3779_v23, %v3851_v62  ;;  %4186 = vmatprep.mubr.bf16.mxu0 %v7144_v42  ;;  %v6732_v23 = vpop.f32.mrb[4].mxu0 }
 0x11f   : > { %v3919_v47 = vrot.slane %v7230_v55, 6  ;;  %v7232_v49 = vshll.u32 %v6095_v9, 16  ;;  %v3860_v40 = vshrl.u32 %v6536_v32, 16  ;;  %v3862_v5 = vshll.u32 %v6536_v32, 16  ;;  %4113 = vmatprep.subr.bf16.mxu1 %v3982_v31  ;;  %v6737_v12 = vpop.f32.mrb[5].mxu0 }
 0x120   : > { %v3783_v37 = vrot.slane %v7231_v50, 3  ;;  %v3955_v22 = vsel %vm410_vm4, %v3930_v10, %v3911_v30  ;;  %v3872_v8 = vor.u32 %v3871_v63, %v3867_v29  ;;  %v7233_v60 = vshrl.u32 %v6236_v36, 16  ;;  %v594_v31 = vpop.f32.mrb[6].mxu0 }
 0x121   : > { %v3784_v1 = vrot.slane %v7232_v49, 4  ;;  %v3920_v33 = vor.u32 %v3919_v47, %v3918_v14  ;;  %v3980_v9 = vand.u32 %v3955_v22, %v5380_v27  ;;  %v3864_v11 = vrot.slane %v3862_v5, 1  ;;  %v595_v52 = vpop.f32.mrb[7].mxu0  ;;  %v6756_v22 = vpop.f32.mrb[4].mxu1 }
 0x122   : > { %v3915_v61 = vrot.slane %v7233_v60, 5  ;;  %v7234_v51 = vshll.u32 %v6236_v36, 16  ;;  %v3933_v29 = vsel %vm5401_vm5, %v3788_v20, %v3872_v8  ;;  %v7235_v24 = vshrl.u32 %v6115_v59, 16 }
 0x123   : > { %v3785_v39 = vor.u32 %v3784_v1, %v3783_v37  ;;  %v7236_v28 = vshll.u32 %v6115_v59, 16  ;;  %v3874_v30 = vshrl.u32 %v6539_v13, 16  ;;  %4114 = vmatpush1.bf16.msra.mxu1 %v3980_v9  ;;  %v3964_v63 = vsel %vm410_vm4, %v3933_v29, %v3920_v33  ;;  %v5222_v37 = vld [vmem:[%s5383_s29 + $0x5c] ss:$44 sps:$4 sm:$0x18]  }
 0x124   : > { %v3916_v16 = vrot.slane %v7234_v51, 6  ;;  %v3789_v14 = vrot.slane %v7235_v24, 3  ;;  %v3865_v55 = vor.u32 %v3864_v11, %v3860_v40  ;;  %v3876_v50 = vshll.u32 %v6539_v13, 16  ;;  %5068 = vmatprep.subr.bf16.mxu1 %v7156_v26  ;;  %v5225_v24 = vld [vmem:[%s5383_s29 + $0x64] ss:$44 sps:$4 sm:$0x18]  }
 0x125   : > { %v3790_v62 = vrot.slane %v7236_v28, 4  ;;  %v3986_v20 = vand.u32 %v3964_v63, %v5380_v27  ;;  %v7237_v59 = vshrl.u32 %v6229_v0, 16  ;;  %v7238_v1 = vshll.u32 %v6229_v0, 16 }
 0x126   : > { %v3917_v47 = vor.u32 %v3916_v16, %v3915_v61  ;;  %v3932_v40 = vsel %vm5401_vm5, %v3785_v39, %v3865_v55  ;;  %v3878_v8 = vrot.slane %v3876_v50, 1  ;;  %v4259_v33 = vrot.slane %v6454_v48, 2  ;;  %v6762_v61 = vpop.f32.mrb[5].mxu1  ;;  %4973 = vmatmul.mubr.msk.bf16.vlgmr.msra.gmra.mrb[88].mxu1 %vm444_vm6, %v6588_v53  ;;  %v6788_v50 = vpop.f32.mrb[8].mxu0 }
 0x127   : > { %v3791_v10 = vor.u32 %v3790_v62, %v3789_v14  ;;  %v3921_v49 = vrot.slane %v7237_v59, 5  ;;  %v3922_v5 = vrot.slane %v7238_v1, 6  ;;  %v4281_v60 = vrot.slane %v6153_v44, 7  ;;  %4154 = vmatprep.subr.bf16.mxu0 %v3986_v20  ;;  %v635_v51 = vpop.f32.mrb[6].mxu1  ;;  %5070 = vmatprep.mubr.msk.bf16.mxu1 %vm5268_vm7, %v7156_v26 }
 0x128   : > { %v3961_v0 = vsel %vm410_vm4, %v3932_v40, %v3917_v47  ;;  %v4258_v11 = vrot.slane %v6452_v57, 2  ;;  %v4280_v39 = vrot.slane %v6147_v18, 7  ;;  %v3879_v48 = vor.u32 %v3878_v8, %v3874_v30  ;;  %v636_v14 = vpop.f32.mrb[7].mxu1  ;;  %v5223_v62 = vld [vmem:[%s5383_s29 + $0x60] ss:$44 sps:$4 sm:$0x18]  }
 0x129   : > { %v3923_v9 = vor.u32 %v3922_v5, %v3921_v49  ;;  %v3984_v16 = vand.u32 %v3961_v0, %v5380_v27  ;;  %v4348_v44 = vsel %vm5401_vm5, %v4259_v33, %v4281_v60  ;;  %v4261_v29 = vrot.slane %v6482_v4, 2  ;;  %v5228_v47 = vld [vmem:[%s5383_s29 + $0x6c] ss:$44 sps:$4 sm:$0x18]   ;;  %v6810_v60 = vpop.f32.mrb[8].mxu1 }
 0x12a   : > { %v4363_v28 = vsel %vm410_vm4, %v4348_v44, %v5222_v37  ;;  %v4347_v18 = vsel %vm5401_vm5, %v4258_v11, %v4280_v39  ;;  %v4283_v57 = vrot.slane %v6170_v17, 7  ;;  %v4260_v30 = vrot.slane %v6477_v34, 2  ;;  %v5231_v20 = vld [vmem:[%s5383_s29 + $0x74] ss:$44 sps:$4 sm:$0x18]   ;;  %v5030_v51 = vpop.f32.mrb[9].mxu1 }
 0x12b   : > { %4155 = vmatpush1.bf16.msra.mxu0 %v3984_v16  ;;  %v3934_v31 = vsel %vm5401_vm5, %v3791_v10, %v3879_v48  ;;  %v4393_v63 = vand.u32 %v4363_v28, %v5380_v27  ;;  %v4360_v4 = vsel %vm410_vm4, %v4347_v18, %v5220_v21  ;;  %v4282_v55 = vrot.slane %v6163_v25, 7  ;;  %v6796_v10 = vpop.f32.mrb[9].mxu0  ;;  %v5226_v5 = vld [vmem:[%s5383_s29 + $0x68] ss:$44 sps:$4 sm:$0x18]  }
 0x12c   : > { %v3967_v37 = vsel %vm410_vm4, %v3934_v31, %v3923_v9  ;;  %v4391_v17 = vand.u32 %v4360_v4, %v5380_v27  ;;  %v4350_v34 = vsel %vm5401_vm5, %v4261_v29, %v4283_v57  ;;  %v4263_v52 = vrot.slane %v6499_v35, 2  ;;  %v676_v21 = vpop.f32.mrb[10].mxu0  ;;  %v5229_v16 = vld [vmem:[%s5383_s29 + $0x70] ss:$44 sps:$4 sm:$0x18]   ;;  %v716_v29 = vpop.f32.mrb[10].mxu1 }
 0x12d   : > { %v3988_v59 = vand.u32 %v3967_v37, %v5380_v27  ;;  %4413 = vmatprep.subr.bf16.mxu0 %v4393_v63  ;;  %v4369_v25 = vsel %vm410_vm4, %v4350_v34, %v5225_v24  ;;  %v4349_v49 = vsel %vm5401_vm5, %v4260_v30, %v4282_v55  ;;  %v4285_v1 = vrot.slane %v6195_v2, 7  ;;  %v677_v0 = vpop.f32.mrb[11].mxu0  ;;  %v5234_v28 = vld [vmem:[%s5383_s29 + $0x7c] ss:$44 sps:$4 sm:$0x18]   ;;  %v5031_v18 = vpop.f32.mrb[11].mxu1 }
 0x12e   : > { %4974 = vmatmul.mubr.msk.bf16.vlgmr.msra.gmra.mrb[92].mxu0 %vm444_vm6, %v6588_v53  ;;  %v4397_v35 = vand.u32 %v4369_v25, %v5380_v27  ;;  %v4366_v40 = vsel %vm410_vm4, %v4349_v49, %v5223_v62  ;;  %v4262_v8 = vrot.slane %v6493_v15, 2  ;;  %v4284_v33 = vrot.slane %v6191_v41, 7  ;;  %v5232_v4 = vld [vmem:[%s5383_s29 + $0x78] ss:$44 sps:$4 sm:$0x18]  }
 0x12f   : > { %5069 = vmatpush3.bf16.msra.mxu1 %v3988_v59  ;;  %4414 = vmatpush1.bf16.msra.mxu0 %v4391_v17  ;;  %v4395_v2 = vand.u32 %v4366_v40, %v5380_v27  ;;  %v4352_v9 = vsel %vm5401_vm5, %v4263_v52, %v4285_v1  ;;  %v4265_v11 = vrot.slane %v6521_v19, 2  ;;  %v4287_v39 = vrot.slane %v6217_v54, 7  ;;  %v5240_v17 = vld [vmem:[%s5383_s29 + $0x80] ss:$0 sps:$4 sm:$0x33]  }
 0x130   : > { %4454 = vmatprep.subr.bf16.mxu1 %v4397_v35  ;;  %4445 = vmatprep.mubr.bf16.mxu0 %v7144_v42  ;;  %v4375_v41 = vsel %vm410_vm4, %v4352_v9, %v5228_v47  ;;  %v4351_v15 = vsel %vm5401_vm5, %v4262_v8, %v4284_v33  ;;  %v4264_v48 = vrot.slane %v6514_v7, 2  ;;  %v4286_v44 = vrot.slane %v6211_v3, 7  ;;  %v6846_v47 = vpop.f32.mrb[12].mxu0 }
 0x131   : > { %v4401_v24 = vand.u32 %v4375_v41, %v5380_v27  ;;  %v4372_v19 = vsel %vm410_vm4, %v4351_v15, %v5226_v5  ;;  %v4354_v54 = vsel %vm5401_vm5, %v4265_v11, %v4287_v39  ;;  %v4267_v14 = vrot.slane %v6548_v43, 2  ;;  %v1142_v52 = vpop.f32.mrb[13].mxu0  ;;  %v5235_v5 = vld [vmem:[%s5383_s29 + $0x80] ss:$44 sps:$4 sm:$0x18]  }
 0x132   : > { %5071 = vmatmul.mubr.msk.bf16.vlgmr.msra.gmra.mrb[92].mxu1 %vm444_vm6, %v6588_v53  ;;  %v4381_v7 = vsel %vm410_vm4, %v4354_v54, %v5231_v20  ;;  %v4353_v3 = vsel %vm5401_vm5, %v4264_v48, %v4286_v44  ;;  %v4289_v57 = vrot.slane %v6239_v6, 7  ;;  %v4399_v62 = vand.u32 %v4372_v19, %v5380_v27  ;;  %v1144_v59 = vpop.f32.mrb[14].mxu0 }
 0x133   : > { %4455 = vmatpush1.bf16.msra.mxu1 %v4395_v2  ;;  %4486 = vmatprep.mubr.bf16.mxu1 %v7144_v42  ;;  %v4405_v43 = vand.u32 %v4381_v7, %v5380_v27  ;;  %v4266_v30 = vrot.slane %v6536_v32, 2  ;;  %v4288_v31 = vrot.slane %v6236_v36, 7  ;;  %v4378_v63 = vsel %vm410_vm4, %v4353_v3, %v5229_v16  ;;  %v1145_v49 = vpop.f32.mrb[15].mxu0  ;;  %v1181_v35 = vpop.f32.mrb[12].mxu1 }
 0x134   : > { %4495 = vmatprep.subr.bf16.mxu0 %v4401_v24  ;;  %v4356_v55 = vsel %vm5401_vm5, %v4267_v14, %v4289_v57  ;;  %v4268_v6 = vrot.slane %v6539_v13, 2  ;;  %v4290_v36 = vrot.slane %v5240_v17, 7  ;;  %v1351_v34 = vmax.f32 %v6685_v46, %v6846_v47  ;;  %v1183_v38 = vpop.f32.mrb[13].mxu1 }
 0x135   : > { %4536 = vmatprep.subr.bf16.mxu1 %v4405_v43  ;;  %v4387_v37 = vsel %vm410_vm4, %v4356_v55, %v5234_v28  ;;  %v4355_v32 = vsel %vm5401_vm5, %v4266_v30, %v4288_v31  ;;  %v1352_v20 = vmax.f32 %v6692_v58, %v1142_v52  ;;  %v4403_v25 = vand.u32 %v4378_v63, %v5380_v27  ;;  %v1185_v0 = vpop.f32.mrb[14].mxu1 }
 0x136   : > { %4987 = vmatmul.mubr.msk.bf16.vlgmr.msra.gmra.mrb[96].mxu0 %vm444_vm6, %v6588_v53  ;;  %v4409_v13 = vand.u32 %v4387_v37, %v5380_v27  ;;  %v4384_v1 = vsel %vm410_vm4, %v4355_v32, %v5232_v4  ;;  %v4357_v46 = vsel %vm5401_vm5, %v4268_v6, %v4290_v36  ;;  %v1353_v40 = vmax.f32 %v6710_v56, %v1181_v35  ;;  %v1186_v2 = vpop.f32.mrb[15].mxu1 }
 0x137   : > { %4496 = vmatpush1.bf16.msra.mxu0 %v4399_v62  ;;  %4527 = vmatprep.mubr.bf16.mxu0 %v7144_v42  ;;  %v4407_v58 = vand.u32 %v4384_v1, %v5380_v27  ;;  %v4390_v21 = vsel %vm410_vm4, %v4357_v46, %v5235_v5  ;;  %v1354_v33 = vmax.f32 %v6713_v45, %v1183_v38 }
 0x138   : > { %4577 = vmatprep.subr.bf16.mxu0 %v4409_v13  ;;  %v4411_v8 = vand.u32 %v4390_v21, %v5380_v27 }
 0x13a   : > { %4988 = vmatmul.mubr.msk.bf16.vlgmr.msra.gmra.mrb[96].mxu1 %vm444_vm6, %v6588_v53 }
 0x13b   : > { %4537 = vmatpush1.bf16.msra.mxu1 %v4403_v25  ;;  %4568 = vmatprep.mubr.bf16.mxu1 %v7144_v42  ;;  %v1222_v9 = vpop.f32.mrb[16].mxu0 }
 0x13c   : > { %5074 = vmatprep.subr.bf16.mxu1 %v7156_v26  ;;  %v1355_v56 = vmax.f32 %v6732_v23, %v1222_v9  ;;  %v1224_v27 = vpop.f32.mrb[17].mxu0 }
 0x13d   : > { %v1226_v11 = vpop.f32.mrb[18].mxu0 }
 0x13e   : > { %4989 = vmatmul.mubr.msk.bf16.vlgmr.msra.gmra.mrb[100].mxu0 %vm444_vm6, %v6588_v53  ;;  %v1227_v45 = vpop.f32.mrb[19].mxu0 }
 0x13f   : > { %4578 = vmatpush1.bf16.msra.mxu0 %v4407_v58  ;;  %4609 = vmatprep.mubr.bf16.mxu0 %v7144_v42  ;;  %v1356_v42 = vmax.f32 %v6737_v12, %v1224_v27 }
 0x142   : > { %4990 = vmatmul.mubr.msk.bf16.vlgmr.msra.gmra.mrb[100].mxu1 %vm444_vm6, %v6588_v53 }
 0x143   : > { %5075 = vmatpush3.bf16.msra.mxu1 %v4411_v8  ;;  %5076 = vmatprep.mubr.msk.bf16.mxu1 %vm5268_vm7, %v7156_v26  ;;  %v1263_v39 = vpop.f32.mrb[16].mxu1 }
 0x144   : > { %v1357_v51 = vmax.f32 %v6756_v22, %v1263_v39  ;;  %v1265_v41 = vpop.f32.mrb[17].mxu1 }
 0x145   : > { %v1358_v26 = vmax.f32 %v6762_v61, %v1265_v41  ;;  %v1267_v15 = vpop.f32.mrb[18].mxu1 }
 0x146   : > { %4991 = vmatmul.mubr.msk.bf16.vlgmr.msra.gmra.mrb[104].mxu0 %vm444_vm6, %v6588_v53  ;;  %v1268_v16 = vpop.f32.mrb[19].mxu1 }
 0x14a   : > { %5077 = vmatmul.mubr.msk.bf16.vlgmr.msra.gmra.mrb[104].mxu1 %vm444_vm6, %v6588_v53 }
 0x14b   : > { %v1304_v48 = vpop.f32.mrb[20].mxu0 }
 0x14c   : > { %v1359_v44 = vmax.f32 %v6788_v50, %v1304_v48  ;;  %v1306_v23 = vpop.f32.mrb[21].mxu0 }
 0x14d   : > { %v1360_v29 = vmax.f32 %v6796_v10, %v1306_v23  ;;  %v1308_v12 = vpop.f32.mrb[22].mxu0 }
 0x14e   : > { %v1309_v24 = vpop.f32.mrb[23].mxu0 }
 0x14f   : > { %v1345_v19 = vpop.f32.mrb[20].mxu1 }
 0x150   : > { %v1361_v54 = vmax.f32 %v6810_v60, %v1345_v19  ;;  %v5036_v53 = vpop.f32.mrb[21].mxu1 }
 0x151   : > { %v1348_v14 = vpop.f32.mrb[22].mxu1 }
 0x152   : > { %v5037_v28 = vpop.f32.mrb[23].mxu1 }
 0x153   : > { %v1551_v22 = vpop.f32.mrb[24].mxu0 }
 0x154   : > { %v6891_v18 = vmax.f32 %v1351_v34, %v1551_v22  ;;  %v1553_v61 = vpop.f32.mrb[25].mxu0 }
 0x155   : > { %v6893_v7 = vmax.f32 %v1352_v20, %v1553_v61  ;;  %v1555_v3 = vpop.f32.mrb[26].mxu0 }
 0x156   : > { %v1556_v57 = vpop.f32.mrb[27].mxu0 }
 0x157   : > { %v1592_v50 = vpop.f32.mrb[24].mxu1 }
 0x158   : > { %v6895_v62 = vmax.f32 %v1353_v40, %v1592_v50  ;;  %v1594_v10 = vpop.f32.mrb[25].mxu1 }
 0x159   : > { %v6897_v43 = vmax.f32 %v1354_v33, %v1594_v10  ;;  %v1596_v30 = vpop.f32.mrb[26].mxu1 }
 0x15a   : > { %v1597_v31 = vpop.f32.mrb[27].mxu1 }
 0x15b   : > { %v1633_v60 = vpop.f32.mrb[28].mxu0 }
 0x15c   : > { %v6899_v63 = vmax.f32 %v1355_v56, %v1633_v60  ;;  %v1635_v4 = vpop.f32.mrb[29].mxu0 }
 0x15d   : > { %v6901_v55 = vmax.f32 %v1356_v42, %v1635_v4  ;;  %v1637_v6 = vpop.f32.mrb[30].mxu0 }
 0x15e   : > { %v1638_v47 = vpop.f32.mrb[31].mxu0 }
 0x15f   : > { %v1674_v37 = vpop.f32.mrb[28].mxu1 }
 0x160   : > { %v6903_v32 = vmax.f32 %v1357_v51, %v1674_v37  ;;  %v1676_v17 = vpop.f32.mrb[29].mxu1 }
 0x161   : > { %v6905_v36 = vmax.f32 %v1358_v26, %v1676_v17  ;;  %v1678_v34 = vpop.f32.mrb[30].mxu1 }
 0x162   : > { %v1679_v52 = vpop.f32.mrb[31].mxu1 }
 0x163   : > { %v1715_v13 = vpop.f32.mrb[32].mxu0 }
 0x164   : > { %v6907_v20 = vmax.f32 %v1359_v44, %v1715_v13  ;;  %v1717_v59 = vpop.f32.mrb[33].mxu0 }
 0x165   : > { %v6909_v25 = vmax.f32 %v1360_v29, %v1717_v59  ;;  %v1719_v49 = vpop.f32.mrb[34].mxu0 }
 0x166   : > { %v1720_v1 = vpop.f32.mrb[35].mxu0 }
 0x167   : > { %v1756_v5 = vpop.f32.mrb[32].mxu1 }
 0x168   : > { %v6911_v46 = vmax.f32 %v1361_v54, %v1756_v5  ;;  %v5042_v58 = vpop.f32.mrb[33].mxu1 }
 0x169   : > { %v1759_v21 = vpop.f32.mrb[34].mxu1 }
 0x16a   : > { %v5043_v35 = vpop.f32.mrb[35].mxu1 }
 0x16b   : > { %v2150_v40 = vpop.f32.mrb[36].mxu0 }
 0x16c   : > { %v2361_v38 = vmax.f32 %v6891_v18, %v2150_v40  ;;  %v2152_v8 = vpop.f32.mrb[37].mxu0 }
 0x16d   : > { %v2362_v33 = vmax.f32 %v6893_v7, %v2152_v8  ;;  %v2154_v0 = vpop.f32.mrb[38].mxu0 }
 0x16e   : > { %v2155_v2 = vpop.f32.mrb[39].mxu0 }
 0x16f   : > { %v2191_v9 = vpop.f32.mrb[36].mxu1 }
 0x170   : > { %v2363_v56 = vmax.f32 %v6895_v62, %v2191_v9  ;;  %v2193_v27 = vpop.f32.mrb[37].mxu1 }
 0x171   : > { %v2364_v42 = vmax.f32 %v6897_v43, %v2193_v27  ;;  %v2195_v11 = vpop.f32.mrb[38].mxu1 }
 0x172   : > { %v2196_v45 = vpop.f32.mrb[39].mxu1 }
 0x176   : > { %v2232_v39 = vpop.f32.mrb[40].mxu0 }
 0x177   : > { %v2365_v51 = vmax.f32 %v6899_v63, %v2232_v39  ;;  %v2234_v41 = vpop.f32.mrb[41].mxu0 }
 0x178   : > { %v2366_v26 = vmax.f32 %v6901_v55, %v2234_v41  ;;  %v2236_v15 = vpop.f32.mrb[42].mxu0 }
 0x179   : > { %v2237_v16 = vpop.f32.mrb[43].mxu0 }
 0x17e   : > { %v2273_v48 = vpop.f32.mrb[40].mxu1 }
 0x17f   : > { %v2367_v44 = vmax.f32 %v6903_v32, %v2273_v48  ;;  %v2275_v23 = vpop.f32.mrb[41].mxu1 }
 0x180   : > { %v2368_v29 = vmax.f32 %v6905_v36, %v2275_v23  ;;  %v2277_v12 = vpop.f32.mrb[42].mxu1 }
 0x181   : > { %v2278_v24 = vpop.f32.mrb[43].mxu1 }
 0x185   : > { %v2314_v19 = vpop.f32.mrb[44].mxu0 }
 0x186   : > { %v2369_v54 = vmax.f32 %v6907_v20, %v2314_v19  ;;  %v2316_v53 = vpop.f32.mrb[45].mxu0 }
 0x187   : > { %v2370_v14 = vmax.f32 %v6909_v25, %v2316_v53  ;;  %v2318_v28 = vpop.f32.mrb[46].mxu0 }
 0x188   : > { %v2319_v22 = vpop.f32.mrb[47].mxu0 }
 0x189   : > { %v2355_v18 = vpop.f32.mrb[44].mxu1 }
 0x18a   : > { %v2371_v61 = vmax.f32 %v6911_v46, %v2355_v18  ;;  %v5048_v7 = vpop.f32.mrb[45].mxu1 }
 0x18b   : > { %v2358_v3 = vpop.f32.mrb[46].mxu1 }
 0x18c   : > { %v5049_v57 = vpop.f32.mrb[47].mxu1 }
 0x18d   : > { %v2550_v50 = vpop.f32.mrb[48].mxu0 }
 0x18e   : > { %v6924_v62 = vmax.f32 %v2361_v38, %v2550_v50  ;;  %v2552_v10 = vpop.f32.mrb[49].mxu0 }
 0x18f   : > { %v6926_v43 = vmax.f32 %v2362_v33, %v2552_v10  ;;  %v2554_v30 = vpop.f32.mrb[50].mxu0 }
 0x190   : > { %v2555_v31 = vpop.f32.mrb[51].mxu0 }
 0x191   : > { %v2591_v60 = vpop.f32.mrb[48].mxu1 }
 0x192   : > { %v6928_v63 = vmax.f32 %v2363_v56, %v2591_v60  ;;  %v2593_v4 = vpop.f32.mrb[49].mxu1 }
 0x193   : > { %v6930_v55 = vmax.f32 %v2364_v42, %v2593_v4  ;;  %v2595_v6 = vpop.f32.mrb[50].mxu1 }
 0x194   : > { %v2596_v47 = vpop.f32.mrb[51].mxu1 }
 0x195   : > { %v2632_v37 = vpop.f32.mrb[52].mxu0 }
 0x196   : > { %v6932_v32 = vmax.f32 %v2365_v51, %v2632_v37  ;;  %v2634_v17 = vpop.f32.mrb[53].mxu0 }
 0x197   : > { %v6934_v36 = vmax.f32 %v2366_v26, %v2634_v17  ;;  %v2636_v34 = vpop.f32.mrb[54].mxu0 }
 0x198   : > { %v2637_v52 = vpop.f32.mrb[55].mxu0 }
 0x199   : > { %v2673_v13 = vpop.f32.mrb[52].mxu1 }
 0x19a   : > { %v6936_v20 = vmax.f32 %v2367_v44, %v2673_v13  ;;  %v2675_v59 = vpop.f32.mrb[53].mxu1 }
 0x19b   : > { %v6938_v25 = vmax.f32 %v2368_v29, %v2675_v59  ;;  %v2677_v49 = vpop.f32.mrb[54].mxu1 }
 0x19c   : > { %v2678_v1 = vpop.f32.mrb[55].mxu1 }
 0x19d   : > { %v2714_v5 = vpop.f32.mrb[56].mxu0 }
 0x19e   : > { %v6940_v46 = vmax.f32 %v2369_v54, %v2714_v5  ;;  %v2716_v58 = vpop.f32.mrb[57].mxu0 }
 0x19f   : > { %v6942_v21 = vmax.f32 %v2370_v14, %v2716_v58  ;;  %v2718_v35 = vpop.f32.mrb[58].mxu0 }
 0x1a0   : > { %v2719_v40 = vpop.f32.mrb[59].mxu0 }
 0x1a1   : > { %v2755_v38 = vpop.f32.mrb[56].mxu1 }
 0x1a2   : > { %v6944_v8 = vmax.f32 %v2371_v61, %v2755_v38  ;;  %v5054_v33 = vpop.f32.mrb[57].mxu1 }
 0x1a3   : > { %v2758_v0 = vpop.f32.mrb[58].mxu1 }
 0x1a4   : > { %v5055_v2 = vpop.f32.mrb[59].mxu1 }
 0x1a5   : > { %v3092_v9 = vpop.f32.mrb[60].mxu0 }
 0x1a6   : > { %v3303_v56 = vmax.f32 %v6924_v62, %v3092_v9  ;;  %v3094_v27 = vpop.f32.mrb[61].mxu0 }
 0x1a7   : > { %v3304_v42 = vmax.f32 %v6926_v43, %v3094_v27  ;;  %v3096_v11 = vpop.f32.mrb[62].mxu0 }
 0x1a8   : > { %v3097_v45 = vpop.f32.mrb[63].mxu0 }
 0x1a9   : > { %v3133_v39 = vpop.f32.mrb[60].mxu1 }
 0x1aa   : > { %v3305_v51 = vmax.f32 %v6928_v63, %v3133_v39  ;;  %v3135_v41 = vpop.f32.mrb[61].mxu1 }
 0x1ab   : > { %v3306_v26 = vmax.f32 %v6930_v55, %v3135_v41  ;;  %v3137_v15 = vpop.f32.mrb[62].mxu1 }
 0x1ac   : > { %v3138_v16 = vpop.f32.mrb[63].mxu1 }
 0x1af   : > { %v3174_v48 = vpop.f32.mrb[64].mxu0 }
 0x1b0   : > { %v3307_v44 = vmax.f32 %v6932_v32, %v3174_v48  ;;  %v3176_v23 = vpop.f32.mrb[65].mxu0 }
 0x1b1   : > { %v3308_v29 = vmax.f32 %v6934_v36, %v3176_v23  ;;  %v3178_v12 = vpop.f32.mrb[66].mxu0 }
 0x1b2   : > { %v3179_v24 = vpop.f32.mrb[67].mxu0 }
 0x1b7   : > { %v3215_v19 = vpop.f32.mrb[64].mxu1 }
 0x1b8   : > { %v3309_v54 = vmax.f32 %v6936_v20, %v3215_v19  ;;  %v3217_v53 = vpop.f32.mrb[65].mxu1 }
 0x1b9   : > { %v3310_v14 = vmax.f32 %v6938_v25, %v3217_v53  ;;  %v3219_v28 = vpop.f32.mrb[66].mxu1 }
 0x1ba   : > { %v3220_v22 = vpop.f32.mrb[67].mxu1 }
 0x1be   : > { %v3256_v18 = vpop.f32.mrb[68].mxu0 }
 0x1bf   : > { %v3311_v61 = vmax.f32 %v6940_v46, %v3256_v18  ;;  %v3258_v7 = vpop.f32.mrb[69].mxu0 }
 0x1c0   : > { %v3312_v3 = vmax.f32 %v6942_v21, %v3258_v7  ;;  %v3260_v57 = vpop.f32.mrb[70].mxu0 }
 0x1c1   : > { %v3261_v50 = vpop.f32.mrb[71].mxu0 }
 0x1c2   : > { %v3297_v62 = vpop.f32.mrb[68].mxu1 }
 0x1c3   : > { %v3313_v10 = vmax.f32 %v6944_v8, %v3297_v62  ;;  %v5060_v43 = vpop.f32.mrb[69].mxu1 }
 0x1c4   : > { %v3300_v30 = vpop.f32.mrb[70].mxu1 }
 0x1c5   : > { %v5061_v31 = vpop.f32.mrb[71].mxu1 }
 0x1c6   : > { %v3537_v60 = vpop.f32.mrb[72].mxu0 }
 0x1c7   : > { %v6957_v63 = vmax.f32 %v3303_v56, %v3537_v60  ;;  %v3539_v4 = vpop.f32.mrb[73].mxu0 }
 0x1c8   : > { %v6959_v55 = vmax.f32 %v3304_v42, %v3539_v4  ;;  %v3541_v6 = vpop.f32.mrb[74].mxu0 }
 0x1c9   : > { %v3542_v47 = vpop.f32.mrb[75].mxu0 }
 0x1ca   : > { %v3578_v37 = vpop.f32.mrb[72].mxu1 }
 0x1cb   : > { %v6961_v32 = vmax.f32 %v3305_v51, %v3578_v37  ;;  %v3580_v17 = vpop.f32.mrb[73].mxu1 }
 0x1cc   : > { %v6963_v36 = vmax.f32 %v3306_v26, %v3580_v17  ;;  %v3582_v34 = vpop.f32.mrb[74].mxu1 }
 0x1cd   : > { %v3583_v52 = vpop.f32.mrb[75].mxu1 }
 0x1ce   : > { %v3619_v13 = vpop.f32.mrb[76].mxu0 }
 0x1cf   : > { %v6965_v20 = vmax.f32 %v3307_v44, %v3619_v13  ;;  %v3621_v59 = vpop.f32.mrb[77].mxu0 }
 0x1d0   : > { %v6967_v25 = vmax.f32 %v3308_v29, %v3621_v59  ;;  %v3623_v49 = vpop.f32.mrb[78].mxu0 }
 0x1d1   : > { %v3624_v1 = vpop.f32.mrb[79].mxu0 }
 0x1d2   : > { %v3660_v5 = vpop.f32.mrb[76].mxu1 }
 0x1d3   : > { %v6969_v46 = vmax.f32 %v3309_v54, %v3660_v5  ;;  %v3662_v58 = vpop.f32.mrb[77].mxu1 }
 0x1d4   : > { %v6971_v21 = vmax.f32 %v3310_v14, %v3662_v58  ;;  %v3664_v35 = vpop.f32.mrb[78].mxu1 }
 0x1d5   : > { %v3665_v40 = vpop.f32.mrb[79].mxu1 }
 0x1d6   : > { %v3701_v38 = vpop.f32.mrb[80].mxu0 }
 0x1d7   : > { %v6973_v8 = vmax.f32 %v3311_v61, %v3701_v38  ;;  %v3703_v33 = vpop.f32.mrb[81].mxu0 }
 0x1d8   : > { %v6975_v0 = vmax.f32 %v3312_v3, %v3703_v33  ;;  %v3705_v2 = vpop.f32.mrb[82].mxu0 }
 0x1d9   : > { %v3706_v9 = vpop.f32.mrb[83].mxu0 }
 0x1da   : > { %v3742_v56 = vpop.f32.mrb[80].mxu1 }
 0x1db   : > { %v6977_v27 = vmax.f32 %v3313_v10, %v3742_v56  ;;  %v5066_v42 = vpop.f32.mrb[81].mxu1 }
 0x1dc   : > { %v3745_v11 = vpop.f32.mrb[82].mxu1 }
 0x1dd   : > { %v5067_v45 = vpop.f32.mrb[83].mxu1 }
 0x1e1   : > { %v4024_v39 = vpop.f32.mrb[84].mxu0 }
 0x1e2   : > { %v4235_v51 = vmax.f32 %v6957_v63, %v4024_v39  ;;  %v4026_v41 = vpop.f32.mrb[85].mxu0 }
 0x1e3   : > { %v4236_v26 = vmax.f32 %v6959_v55, %v4026_v41  ;;  %v4028_v15 = vpop.f32.mrb[86].mxu0 }
 0x1e4   : > { %v4029_v16 = vpop.f32.mrb[87].mxu0 }
 0x1e8   : > { %v4065_v48 = vpop.f32.mrb[84].mxu1 }
 0x1e9   : > { %v4237_v44 = vmax.f32 %v6961_v32, %v4065_v48  ;;  %v4067_v23 = vpop.f32.mrb[85].mxu1  ;;  %v7001_v32 = vpop.permute.xlu0 %4672 }
 0x1ea   : > { %v4238_v29 = vmax.f32 %v6963_v36, %v4067_v23  ;;  %v4069_v12 = vpop.f32.mrb[86].mxu1 }
 0x1eb   : > { %v4070_v24 = vpop.f32.mrb[87].mxu1 }
 0x1f0   : > { %v4106_v19 = vpop.f32.mrb[88].mxu0 }
 0x1f1   : > { %v4239_v54 = vmax.f32 %v6965_v20, %v4106_v19  ;;  %v4108_v53 = vpop.f32.mrb[89].mxu0 }
 0x1f2   : > { %v4240_v14 = vmax.f32 %v6967_v25, %v4108_v53  ;;  %v4110_v28 = vpop.f32.mrb[90].mxu0 }
 0x1f3   : > { %v4111_v22 = vpop.f32.mrb[91].mxu0 }
 0x1f9   : > { %v4147_v18 = vpop.f32.mrb[88].mxu1 }
 0x1fa   : > { %v4241_v61 = vmax.f32 %v6969_v46, %v4147_v18  ;;  %v4149_v7 = vpop.f32.mrb[89].mxu1 }
 0x1fb   : > { %v4242_v3 = vmax.f32 %v6971_v21, %v4149_v7  ;;  %v4151_v57 = vpop.f32.mrb[90].mxu1 }
 0x1fc   : > { %v4152_v50 = vpop.f32.mrb[91].mxu1 }
 0x201   : > { %v6987_v62 = vpop.f32.mrb[92].mxu0 }
 0x202   : > { %v4243_v10 = vmax.f32 %v6973_v8, %v6987_v62  ;;  %v6993_v43 = vpop.f32.mrb[93].mxu0 }
 0x203   : > { %v4244_v30 = vmax.f32 %v6975_v0, %v6993_v43  ;;  %v4192_v31 = vpop.f32.mrb[94].mxu0 }
 0x204   : > { %v4193_v60 = vpop.f32.mrb[95].mxu0 }
 0x205   : > { %v6997_v63 = vpop.f32.mrb[92].mxu1 }
 0x206   : > { %v4245_v4 = vmax.f32 %v6977_v27, %v6997_v63  ;;  %v5072_v55 = vpop.f32.mrb[93].mxu1 }
 0x207   : > { %v4232_v6 = vpop.f32.mrb[94].mxu1 }
 0x208   : > { %v5073_v47 = vpop.f32.mrb[95].mxu1 }
 0x209   : > { %v4447_v37 = vpop.f32.mrb[96].mxu0 }
 0x20a   : > { %v4658_v17 = vmax.f32 %v4235_v51, %v4447_v37  ;;  %v4449_v36 = vpop.f32.mrb[97].mxu0 }
 0x20b   : > { %v4659_v34 = vmax.f32 %v4236_v26, %v4449_v36  ;;  %v4451_v52 = vpop.f32.mrb[98].mxu0 }
 0x20c   : > { %v4452_v13 = vpop.f32.mrb[99].mxu0  ;;  %v4675_v20 = vadd.f32 %v7001_v32, %v4658_v17 }
 0x20d   : > { %v4488_v59 = vpop.f32.mrb[96].mxu1  ;;  %v4676_v25 = vadd.f32 %v7001_v32, %v4659_v34 }
 0x20e   : > { %v4660_v49 = vmax.f32 %v4237_v44, %v4488_v59  ;;  %v4490_v1 = vpop.f32.mrb[97].mxu1  ;;  %v4686_v5 = vmax.f32 %v4675_v20, 0.0 }
 0x20f   : > { %v4661_v46 = vmax.f32 %v4238_v29, %v4490_v1  ;;  %v4492_v58 = vpop.f32.mrb[98].mxu1  ;;  %v4687_v21 = vmax.f32 %v4676_v25, 0.0 }
 0x210   : > { %v4493_v35 = vpop.f32.mrb[99].mxu1  ;;  %v4677_v40 = vadd.f32 %v7001_v32, %v4660_v49 }
 0x211   : > { %v4529_v38 = vpop.f32.mrb[100].mxu0  ;;  %v4678_v8 = vadd.f32 %v7001_v32, %v4661_v46  ;;  %v5002_v33 = vpack.c.bf16 %v4687_v21, %v4686_v5 }
 0x212   : > { %v4662_v0 = vmax.f32 %v4239_v54, %v4529_v38  ;;  %v4531_v2 = vpop.f32.mrb[101].mxu0  ;;  %v4688_v9 = vmax.f32 %v4677_v40, 0.0 }
 0x213   : > { %v4663_v56 = vmax.f32 %v4240_v14, %v4531_v2  ;;  %v4689_v42 = vmax.f32 %v4678_v8, 0.0  ;;  %4742 = vst [vmem:[%s7008_s17] sm:$0x77] %v5002_v33  ;;  %v4533_v11 = vpop.f32.mrb[102].mxu0 }
 0x214   : > { %v4679_v45 = vadd.f32 %v7001_v32, %v4662_v0  ;;  %v4534_v39 = vpop.f32.mrb[103].mxu0 }
 0x215   : > { %v4570_v51 = vpop.f32.mrb[100].mxu1  ;;  %v4680_v41 = vadd.f32 %v7001_v32, %v4663_v56  ;;  %v5003_v26 = vpack.c.bf16 %v4689_v42, %v4688_v9 }
 0x216   : > { %v4690_v15 = vmax.f32 %v4679_v45, 0.0  ;;  %v4664_v16 = vmax.f32 %v4241_v61, %v4570_v51  ;;  %v4572_v48 = vpop.f32.mrb[101].mxu1 }
 0x217   : > { %v4691_v44 = vmax.f32 %v4680_v41, 0.0  ;;  %4743 = vst [vmem:[%s7008_s17 + $0x8] sm:$0x77] %v5003_v26  ;;  %v4665_v23 = vmax.f32 %v4242_v3, %v4572_v48  ;;  %v4574_v29 = vpop.f32.mrb[102].mxu1 }
 0x218   : > { %v4681_v12 = vadd.f32 %v7001_v32, %v4664_v16  ;;  %v4575_v24 = vpop.f32.mrb[103].mxu1 }
 0x219   : > { %v5004_v19 = vpack.c.bf16 %v4691_v44, %v4690_v15  ;;  %v4682_v54 = vadd.f32 %v7001_v32, %v4665_v23  ;;  %v4611_v53 = vpop.f32.mrb[104].mxu0 }
 0x21a   : > { %v4692_v14 = vmax.f32 %v4681_v12, 0.0  ;;  %v4666_v28 = vmax.f32 %v4243_v10, %v4611_v53  ;;  %v4613_v22 = vpop.f32.mrb[105].mxu0 }
 0x21b   : > { %4744 = vst [vmem:[%s7008_s17 + $0x10] sm:$0x77] %v5004_v19  ;;  %v4693_v18 = vmax.f32 %v4682_v54, 0.0  ;;  %v4667_v7 = vmax.f32 %v4244_v30, %v4613_v22  ;;  %v4615_v61 = vpop.f32.mrb[106].mxu0 }
 0x21c   : > { %v4683_v57 = vadd.f32 %v7001_v32, %v4666_v28  ;;  %v4616_v3 = vpop.f32.mrb[107].mxu0 }
 0x21d   : > { %v5005_v50 = vpack.c.bf16 %v4693_v18, %v4692_v14  ;;  %v4652_v62 = vpop.f32.mrb[104].mxu1  ;;  %v4684_v43 = vadd.f32 %v7001_v32, %v4667_v7 }
 0x21e   : > { %v4694_v31 = vmax.f32 %v4683_v57, 0.0  ;;  %v4668_v60 = vmax.f32 %v4245_v4, %v4652_v62  ;;  %v5078_v10 = vpop.f32.mrb[105].mxu1 }
 0x21f   : > { %4745 = vst [vmem:[%s7008_s17 + $0x18] sm:$0x77] %v5005_v50  ;;  %v4695_v55 = vmax.f32 %v4684_v43, 0.0  ;;  %v4655_v6 = vpop.f32.mrb[106].mxu1 }
 0x220   : > { %v4685_v30 = vadd.f32 %v7001_v32, %v4668_v60  ;;  %v5079_v47 = vpop.f32.mrb[107].mxu1 }
 0x221   : > { %v5006_v37 = vpack.c.bf16 %v4695_v55, %v4694_v31 }
 0x222   : > { %v4696_v17 = vmax.f32 %v4685_v30, 0.0 }
 0x223   : > { %4746 = vst [vmem:[%s7008_s17 + $0x20] sm:$0x77] %v5006_v37 }
 0x224   : > { %v5007_v36 = vpack.c.bf16 %v4696_v17, %v4696_v17 }
 0x226   : > { %4747 = vst [vmem:[%s7008_s17 + $0x28] sm:$0x7] %v5007_v36 }
 0x227 PF: > { %p10_p9 = scmp.ge.s32.totalorder %s5306_s16, 4   ;;  %s7239_s12 = smov %s5259_s13 }
 0x228   : > { %s7240_s13 = smov %s5315_s19  ;;  %s7241_s14 = smov %s5306_s16 }
 0x229   :  { %12 = sbr.rel (!%p10_p9) target bundleno = 2 (0x2), region = 99 }

// kernel: pc_discriminator_forward.4
= control target key start
LH: loop header
LB: loop body
LE: loop exit
PB: predicated region body
PF: predicated region fallthrough
CT: control target
= control target key end

     0   :  { %vm154_vm0 = vcmask 1044480   ;;  %vm54_vm1 = vcmask 1045504   ;;  %vm74_vm2 = vcmask 1040384   ;;  %vm163_vm3 = vcmask 1046528   ;;  %s1610_s0 = inlined_call_operand.vmem [shape: bf16[150,256], index: 0, kind: input, shape index: {}]   ;;  %s1611_s1 = inlined_call_operand.vmem [shape: bf16[16,54], index: 1, kind: input, shape index: {}]   ;;  %s1612_s2 = inlined_call_operand.vmem [shape: f32[16,1], index: 2, kind: input, shape index: {}]   ;;  %s1613_s3 = inlined_call_operand.vmem [shape: f32[16,256], index: 3, kind: output, shape index: {}]  }
   0x1   :  { %v17_v0 = vld [vmem:[%s1610_s0] sm:$0xff]  ;;  %v1217_v1 = vld [vmem:[%s1610_s0 + $0x8] sm:$0xff]  ;;  %vm83_vm4 = vcmask 1041408   ;;  %vm101_vm5 = vcmask 1042432   ;;  %v19_v7 = vld [vmem:[%s1610_s0 + $0x10] sm:$0x11] }
   0x2   :  { %v1046_v2 = vcombine.high %v17_v0, %v1217_v1  ;;  %v1045_v3 = vcombine.low %v17_v0, %v1217_v1  ;;  %v1224_v4 = vld [vmem:[%s1610_s0 + $0x28] sm:$0xff]  ;;  %v1128_v5 = vld [vmem:[%s1610_s0 + $0x1c] ss:$8 sps:$4 sm:$0xf8]   ;;  %v1190_v10 = vmov 0   ;;  %v1048_v13 = vcombine.high %v19_v7, %v19_v7  ;;  %v1296_v53 = vld [vmem:[%s1610_s0 + $0x10] sm:$0xff] }
   0x3   :  { %v1052_v6 = vcombine.high %v1224_v4, %v1224_v4  ;;  %v1132_v8 = vld [vmem:[%s1610_s0 + $0x18] ss:$8 sps:$4 sm:$0xf8]   ;;  %v1051_v9 = vcombine.low %v1224_v4, %v1224_v4  ;;  %140 = vmatprep.mubr.bf16.mxu0 %v1190_v10  ;;  %244 = vmatprep.mubr.bf16.mxu1 %v1190_v10  ;;  %v58_v11 = vrot.slane %v1128_v5, 2  ;;  %v158_v12 = vrot.slane %v1128_v5, 3 }
   0x4   :  { %108 = vmatprep.subr.bf16.mxu0 %v1046_v2  ;;  %v1047_v14 = vcombine.low %v19_v7, %v19_v7  ;;  %v25_v15 = vld [vmem:[%s1610_s0 + $0x48] sm:$0x77]  ;;  %1125 = vset.pattern.permute.xlu0 %v1190_v10  ;;  %v155_v18 = vrot.slane %v1132_v8, 3  ;;  %v151_v20 = vld [vmem:[%s1610_s0 + $0x58] sm:$0xee]  ;;  %v55_v21 = vrot.slane %v1132_v8, 2  ;;  %v1075_v2 = vcombine.high %v1296_v53, %v1296_v53 }
   0x5   :  { %109 = vmatpush1.bf16.msra.mxu0 %v1045_v3  ;;  %v59_v16 = vrot.slane %v1052_v6, 2  ;;  %v159_v17 = vrot.slane %v1052_v6, 3  ;;  %v156_v19 = vrot.slane %v1051_v9, 3  ;;  %v56_v22 = vrot.slane %v1051_v9, 2  ;;  %v1258_v26 = vld [vmem:[%s1610_s0 + $0x60] sm:$0xff]  ;;  %v259_v9 = vld [vmem:[%s1610_s0 + $0x78] sm:$0xff] }
   0x6   :  { %v1135_v23 = vld [vmem:[%s1610_s0 + $0x3c] ss:$8 sps:$4 sm:$0xfc]   ;;  %v1251_v24 = vcombine.high %v25_v15, %v25_v15  ;;  %v1253_v25 = vcombine.low %v25_v15, %v25_v15  ;;  %v1138_v30 = vld [vmem:[%s1610_s0 + $0x38] ss:$8 sps:$4 sm:$0xfc]   ;;  %v1061_v31 = vcombine.high %v151_v20, %v1258_v26  ;;  %v1278_v43 = vcombine.low %v151_v20, %v1258_v26 }
   0x7   :  { %v160_v27 = vsel %vm154_vm0, %v158_v12, %v159_v17  ;;  %v60_v28 = vsel %vm54_vm1, %v58_v11, %v59_v16  ;;  %v157_v29 = vsel %vm154_vm0, %v155_v18, %v156_v19  ;;  %v153_v32 = vld [vmem:[%s1610_s0 + $0x68] sm:$0x33]  ;;  %v57_v34 = vsel %vm54_vm1, %v55_v21, %v56_v22  ;;  %v359_v48 = vld [vmem:[%s1610_s0] sm:$0x88]  ;;  %v363_v3 = vld [vmem:[%s1610_s0 + $0x30] sm:$0x77] }
   0x8   :  { %212 = vmatprep.subr.bf16.mxu1 %v160_v27  ;;  %v81_v33 = vsel %vm74_vm2, %v1048_v13, %v60_v28  ;;  %v167_v35 = vrot.slane %v1135_v23, 1  ;;  %v168_v36 = vrot.slane %v1251_v24, 1  ;;  %v77_v37 = vsel %vm74_vm2, %v1047_v14, %v57_v34  ;;  %v361_v62 = vld [vmem:[%s1610_s0 + $0x20] sm:$0xcc]  ;;  %v1350_v21 = vld [vmem:[%s1610_s0 + $0x48] sm:$0xff] }
   0x9   :  { %110 = vmatprep.subr.bf16.mxu0 %v81_v33  ;;  %213 = vmatpush1.bf16.msra.mxu1 %v157_v29  ;;  %v90_v38 = vsel %vm83_vm4, %v59_v16, %v1135_v23  ;;  %v164_v39 = vrot.slane %v1138_v30, 1  ;;  %v165_v40 = vrot.slane %v1253_v25, 1  ;;  %v185_v42 = vrot.slane %v1061_v31, 7  ;;  %v1326_v11 = vld [vmem:[%s1610_s0 + $0x80] sm:$0xff]  ;;  %v261_v28 = vld [vmem:[%s1610_s0 + $0x88] sm:$0x11] }
   0xa   :  { %111 = vmatpush1.bf16.msra.mxu0 %v77_v37  ;;  %v169_v41 = vsel %vm163_vm3, %v167_v35, %v168_v36  ;;  %v86_v46 = vsel %vm83_vm4, %v56_v22, %v1138_v30  ;;  %v1283_v47 = vcombine.high %v153_v32, %v153_v32  ;;  %v184_v51 = vrot.slane %v1278_v43, 7  ;;  %v1331_v12 = vld [vmem:[%s1611_s1] sm:$0xff]  }
   0xb   :  { %v196_v44 = vsel %vm74_vm2, %v159_v17, %v169_v41  ;;  %112 = vmatprep.subr.bf16.mxu0 %v90_v38  ;;  %v166_v45 = vsel %vm163_vm3, %v164_v39, %v165_v40  ;;  %v204_v50 = vsel %vm83_vm4, %v168_v36, %v185_v42  ;;  %v103_v52 = vsel %vm101_vm5, %v1253_v25, 0  ;;  %v364_v20 = vld [vmem:[%s1610_s0 + $0x40] sm:$0xee]  ;;  %v1018_v36 = vld [vmem:[%s1612_s2 + $0x8] sm:$0xff]  ;;  %v366_v41 = vld [vmem:[%s1610_s0 + $0x50] sm:$0x33] }
   0xc   :  { %214 = vmatprep.subr.bf16.mxu1 %v196_v44  ;;  %v192_v49 = vsel %vm74_vm2, %v156_v19, %v166_v45  ;;  %v188_v54 = vrot.slane %v1283_v47, 7  ;;  %v1299_v55 = vcombine.low %v153_v32, %v153_v32  ;;  %v265_v56 = vrot.slane %v1135_v23, 2  ;;  %v1017_v22 = vld [vmem:[%s1612_s2] sm:$0xff] }
   0xd   :  { %215 = vmatpush1.bf16.msra.mxu1 %v192_v49  ;;  %v266_v57 = vrot.slane %v1251_v24, 2  ;;  %v200_v58 = vsel %vm83_vm4, %v165_v40, %v184_v51  ;;  %v262_v59 = vrot.slane %v1138_v30, 2  ;;  %v263_v60 = vrot.slane %v1253_v25, 2  ;;  %1021 = vperm.xlu0 %1125, %v1017_v22  }
   0xe   :  { %113 = vmatpush1.bf16.msra.mxu0 %v86_v46  ;;  %216 = vmatprep.subr.bf16.mxu1 %v204_v50  ;;  %v1073_v61 = vcombine.high %v359_v48, %v1217_v1  ;;  %v189_v63 = vsel %vm74_vm2, %v185_v42, %v188_v54  ;;  %vm97_vm6 = vcmask 441344   ;;  %v186_v0 = vrot.slane %v1299_v55, 7 }
   0xf   :  { %1058 = vmatprep.subr.msk.bf16.mxu0 %vm101_vm5, %v1251_v24  ;;  %v267_v5 = vsel %vm54_vm1, %v265_v56, %v266_v57  ;;  %v264_v6 = vsel %vm54_vm1, %v262_v59, %v263_v60  ;;  %v1072_v8 = vcombine.low %v359_v48, %v1217_v1  ;;  %v381_v14 = vrot.slane %v1075_v2, 3 }
  0x10   :  { %v380_v7 = vrot.slane %v1073_v61, 3  ;;  %v187_v13 = vsel %vm74_vm2, %v184_v51, %v186_v0  ;;  %v296_v1 = vsel %vm74_vm2, %v266_v57, %v1061_v31  ;;  %v1074_v15 = vcombine.low %v1296_v53, %v1296_v53 }
  0x11   :  { %217 = vmatpush1.bf16.msra.mxu1 %v200_v58  ;;  %v207_v16 = vsel %vm101_vm5, %v187_v13, 0  ;;  %v377_v17 = vrot.slane %v1072_v8, 3  ;;  %v1340_v18 = vcombine.high %v361_v62, %v1224_v4  ;;  %v1342_v19 = vcombine.high %v363_v3, %v363_v3  ;;  %1026 = vperm.xlu0 %1125, %v1018_v36  }
  0x12   :  { %115 = vmatpush1.bf16.msra.mxu0 %v103_v52  ;;  %1064 = vmatprep.subr.msk.bf16.mxu1 %vm101_vm5, %v189_v63  ;;  %v382_v23 = vsel %vm154_vm0, %v380_v7, %v381_v14  ;;  %v378_v24 = vrot.slane %v1074_v15, 3  ;;  %v1067_v25 = vcombine.high %v259_v9, %v1326_v11  ;;  %v1358_v27 = vcombine.low %v361_v62, %v1224_v4 }
  0x13   :  { %312 = vmatprep.subr.bf16.mxu0 %v267_v5  ;;  %v401_v29 = vrot.slane %v1340_v18, 1  ;;  %v402_v30 = vrot.slane %v1342_v19, 1  ;;  %v1365_v31 = vcombine.low %v363_v3, %v363_v3  ;;  %v1066_v32 = vcombine.low %v259_v9, %v1326_v11  ;;  %v1417_v3 = vld [vmem:[%s1610_s0 + $0x68] sm:$0xff]  ;;  %v494_v5 = vld [vmem:[%s1610_s0 + $0x70] sm:$0x11] }
  0x14   :  { %v379_v4 = vsel %vm154_vm0, %v377_v17, %v378_v24  ;;  %v285_v33 = vrot.slane %v1067_v25, 6  ;;  %v398_v34 = vrot.slane %v1358_v27, 1  ;;  %v1373_v35 = vcombine.high %v364_v20, %v1350_v21 }
  0x15   :  { %1059 = vmatmul.mubr.msk.bf16.vlgmr.msra.gmra.mrb[0].mxu0 %vm97_vm6, %v1331_v12  ;;  %219 = vmatpush1.bf16.msra.mxu1 %v207_v16  ;;  %v403_v37 = vsel %vm163_vm3, %v401_v29, %v402_v30  ;;  %v399_v38 = vrot.slane %v1365_v31, 1  ;;  %v284_v39 = vrot.slane %v1066_v32, 6  ;;  %v1069_v40 = vcombine.high %v261_v28, %v261_v28 }
  0x16   :  { %313 = vmatpush1.bf16.msra.mxu0 %v264_v6  ;;  %445 = vmatprep.subr.bf16.mxu1 %v382_v23  ;;  %v292_v42 = vsel %vm74_vm2, %v263_v60, %v1278_v43  ;;  %v429_v44 = vsel %vm74_vm2, %v381_v14, %v403_v37  ;;  %v418_v45 = vrot.slane %v1373_v35, 7  ;;  %v1388_v46 = vcombine.low %v364_v20, %v1350_v21  ;;  %v591_v6 = vld [vmem:[%s1610_s0 + $0x78] sm:$0x88]  ;;  %v1432_v14 = vld [vmem:[%s1610_s0 + $0x88] sm:$0xff] }
  0x17   :  { %314 = vmatprep.subr.bf16.mxu0 %v296_v1  ;;  %344 = vmatprep.mubr.bf16.mxu0 %v1190_v10  ;;  %v304_v48 = vsel %vm83_vm4, %v1283_v47, %v285_v33  ;;  %v400_v49 = vsel %vm163_vm3, %v398_v34, %v399_v38  ;;  %v288_v50 = vrot.slane %v1069_v40, 6  ;;  %v1068_v51 = vcombine.low %v261_v28, %v261_v28  ;;  %v692_v40 = vld [vmem:[%s1610_s0 + $0x8] sm:$0xcc] }
  0x18   :  { %1065 = vmatmul.mubr.msk.bf16.vlgmr.msra.gmra.mrb[0].mxu1 %vm97_vm6, %v1331_v12  ;;  %v425_v43 = vsel %vm74_vm2, %v378_v24, %v400_v49  ;;  %v300_v52 = vsel %vm83_vm4, %v1299_v55, %v284_v39  ;;  %v1399_v54 = vcombine.high %v366_v41, %v366_v41  ;;  %v437_v56 = vsel %vm83_vm4, %v402_v30, %v418_v45 }
  0x19   :  { %446 = vmatpush1.bf16.msra.mxu1 %v379_v4  ;;  %477 = vmatprep.mubr.bf16.mxu1 %v1190_v10  ;;  %v417_v47 = vrot.slane %v1388_v46, 7  ;;  %v286_v57 = vrot.slane %v1068_v51, 6  ;;  %v1404_v58 = vcombine.low %v366_v41, %v366_v41  ;;  %v498_v60 = vrot.slane %v1340_v18, 2 }
  0x1a   :  { %315 = vmatpush1.bf16.msra.mxu0 %v292_v42  ;;  %447 = vmatprep.subr.bf16.mxu1 %v429_v44  ;;  %v421_v59 = vrot.slane %v1399_v54, 7  ;;  %v499_v55 = vrot.slane %v1342_v19, 2  ;;  %v495_v61 = vrot.slane %v1358_v27, 2  ;;  %v289_v62 = vsel %vm83_vm4, %v285_v33, %v288_v50 }
  0x1b   :  { %316 = vmatprep.subr.bf16.mxu0 %v304_v48  ;;  %v287_v63 = vsel %vm83_vm4, %v284_v39, %v286_v57  ;;  %v419_v0 = vrot.slane %v1404_v58, 7  ;;  %v496_v2 = vrot.slane %v1365_v31, 2  ;;  %v433_v7 = vsel %vm83_vm4, %v399_v38, %v417_v47 }
  0x1c   :  { %v596_v9 = vrot.slane %v1373_v35, 1  ;;  %v597_v13 = vrot.slane %v1399_v54, 1  ;;  %v307_v1 = vsel %vm101_vm5, %v287_v63, 0  ;;  %v422_v15 = vsel %vm74_vm2, %v418_v45, %v421_v59 }
  0x1d   :  { %448 = vmatpush1.bf16.msra.mxu1 %v425_v43  ;;  %v420_v8 = vsel %vm74_vm2, %v417_v47, %v419_v0  ;;  %v500_v16 = vsel %vm54_vm1, %v498_v60, %v499_v55  ;;  %v497_v17 = vsel %vm54_vm1, %v495_v61, %v496_v2  ;;  %v593_v18 = vrot.slane %v1388_v46, 1  ;;  %v700_v61 = vld [vmem:[%s1610_s0 + $0x58] sm:$0x11] }
  0x1e   :  { %317 = vmatpush1.bf16.msra.mxu0 %v300_v52  ;;  %449 = vmatprep.subr.bf16.mxu1 %v437_v56  ;;  %v1087_v19 = vcombine.high %v1258_v26, %v1417_v3  ;;  %v1089_v20 = vcombine.high %v494_v5, %v494_v5  ;;  %v1093_v22 = vcombine.high %v591_v6, %v1326_v11  ;;  %v440_v23 = vsel %vm101_vm5, %v420_v8, 0 }
  0x1f   :  { %1070 = vmatprep.subr.msk.bf16.mxu0 %vm101_vm5, %v289_v62  ;;  %v594_v24 = vrot.slane %v1404_v58, 1  ;;  %v1086_v25 = vcombine.low %v1258_v26, %v1417_v3  ;;  %v1095_v27 = vcombine.high %v1432_v14, %v1432_v14  ;;  %v598_v28 = vsel %vm163_vm3, %v596_v9, %v597_v13  ;;  %v1176_v9 = vld [vmem:[%s1610_s0 + $0x28] ss:$8 sps:$4 sm:$0xfe]  }
  0x20   :  { %v602_v29 = vrot.slane %v1087_v19, 7  ;;  %v517_v30 = vrot.slane %v1087_v19, 6  ;;  %v1088_v31 = vcombine.low %v494_v5, %v494_v5  ;;  %v605_v32 = vrot.slane %v1089_v20, 7  ;;  %v824_v5 = vld [vmem:[%s1610_s0 + $0x70] sm:$0xff] }
  0x21   :  { %450 = vmatpush1.bf16.msra.mxu1 %v433_v7  ;;  %v620_v4 = vrot.slane %v1093_v22, 1  ;;  %v1451_v33 = vrot.slane %v1095_v27, 1  ;;  %v1092_v34 = vcombine.low %v591_v6, %v1326_v11  ;;  %v528_v26 = vsel %vm74_vm2, %v499_v55, %v1373_v35  ;;  %v694_v11 = vld [vmem:[%s1610_s0 + $0x18] sm:$0x77]  ;;  %v699_v55 = vld [vmem:[%s1610_s0 + $0x50] sm:$0xff] }
  0x22   :  { %319 = vmatpush1.bf16.msra.mxu0 %v307_v1  ;;  %1084 = vmatprep.subr.msk.bf16.mxu1 %vm101_vm5, %v422_v15  ;;  %v595_v36 = vsel %vm163_vm3, %v593_v18, %v594_v24  ;;  %v524_v37 = vsel %vm74_vm2, %v496_v2, %v1388_v46  ;;  %v601_v38 = vrot.slane %v1086_v25, 7  ;;  %v516_v39 = vrot.slane %v1086_v25, 6  ;;  %v823_v2 = vld [vmem:[%s1610_s0 + $0x60] sm:$0x88] }
  0x23   :  { %544 = vmatprep.subr.bf16.mxu0 %v500_v16  ;;  %v629_v35 = vsel %vm74_vm2, %v597_v13, %v602_v29  ;;  %v536_v41 = vsel %vm83_vm4, %v1399_v54, %v517_v30  ;;  %v520_v42 = vrot.slane %v1089_v20, 6  ;;  %v1094_v44 = vcombine.low %v1432_v14, %v1432_v14  ;;  %v697_v54 = vld [vmem:[%s1610_s0 + $0x38] sm:$0x33] }
  0x24   :  { %v606_v45 = vsel %vm74_vm2, %v602_v29, %v605_v32  ;;  %v622_v46 = vsel %vm163_vm3, %v620_v4, %v1451_v33  ;;  %v603_v48 = vrot.slane %v1088_v31, 7  ;;  %v617_v49 = vrot.slane %v1092_v34, 1 }
  0x25   :  { %1071 = vmatmul.mubr.msk.bf16.vlgmr.msra.gmra.mrb[4].mxu0 %vm97_vm6, %v1331_v12  ;;  %452 = vmatpush1.bf16.msra.mxu1 %v440_v23  ;;  %v618_v50 = vrot.slane %v1094_v44, 1  ;;  %v518_v51 = vrot.slane %v1088_v31, 6  ;;  %v1099_v43 = vcombine.high %v692_v40, %v1296_v53  ;;  %v1101_v52 = vcombine.high %v694_v11, %v694_v11 }
  0x26   :  { %545 = vmatpush1.bf16.msra.mxu0 %v497_v17  ;;  %645 = vmatprep.subr.bf16.mxu1 %v598_v28  ;;  %v625_v56 = vsel %vm74_vm2, %v594_v24, %v601_v38  ;;  %v1098_v47 = vcombine.low %v692_v40, %v1296_v53  ;;  %v532_v57 = vsel %vm83_vm4, %v1404_v58, %v516_v39  ;;  %v1173_v58 = vld [vmem:[%s1610_s0 + $0x2c] ss:$8 sps:$4 sm:$0xfe]   ;;  %v825_v27 = vrot.slane %v1176_v9, 1 }
  0x27   :  { %546 = vmatprep.subr.bf16.mxu0 %v528_v26  ;;  %576 = vmatprep.mubr.bf16.mxu0 %v1190_v10  ;;  %v521_v59 = vsel %vm83_vm4, %v517_v30, %v520_v42  ;;  %v1100_v60 = vcombine.low %v694_v11, %v694_v11  ;;  %v637_v53 = vsel %vm83_vm4, %v606_v45, %v622_v46  ;;  %v717_v7 = vrot.slane %v1099_v43, 2  ;;  %v924_v11 = vld [vmem:[%s1610_s0 + $0x80] sm:$0xcc] }
  0x28   :  { %1085 = vmatmul.mubr.msk.bf16.vlgmr.msra.gmra.mrb[4].mxu1 %vm97_vm6, %v1331_v12  ;;  %v604_v62 = vsel %vm74_vm2, %v601_v38, %v603_v48  ;;  %v619_v63 = vsel %vm163_vm3, %v617_v49, %v618_v50  ;;  %v1105_v0 = vcombine.high %v697_v54, %v697_v54  ;;  %v519_v6 = vsel %vm83_vm4, %v516_v39, %v518_v51 }
  0x29   :  { %646 = vmatpush1.bf16.msra.mxu1 %v595_v36  ;;  %677 = vmatprep.mubr.bf16.mxu1 %v1190_v10  ;;  %v718_v8 = vrot.slane %v1101_v52, 2  ;;  %v1510_v13 = vcombine.low %v697_v54, %v697_v54  ;;  %v714_v1 = vrot.slane %v1098_v47, 2  ;;  %v1513_v15 = vcombine.high %v1350_v21, %v699_v55 }
  0x2a   :  { %547 = vmatpush1.bf16.msra.mxu0 %v524_v37  ;;  %647 = vmatprep.subr.bf16.mxu1 %v629_v35  ;;  %v1515_v16 = vcombine.high %v700_v61, %v700_v61  ;;  %v633_v17 = vsel %vm83_vm4, %v604_v62, %v619_v63  ;;  %v715_v18 = vrot.slane %v1100_v60, 2  ;;  %v1519_v19 = vcombine.high %v823_v2, %v1417_v3 }
  0x2b   :  { %548 = vmatprep.subr.bf16.mxu0 %v536_v41  ;;  %v1521_v20 = vcombine.high %v824_v5, %v824_v5  ;;  %v539_v22 = vsel %vm101_vm5, %v519_v6, 0  ;;  %v828_v23 = vrot.slane %v1173_v58, 1  ;;  %v829_v24 = vrot.slane %v1105_v0, 1 }
  0x2c   :  { %v719_v25 = vsel %vm54_vm1, %v717_v7, %v718_v8  ;;  %v826_v28 = vrot.slane %v1510_v13, 1  ;;  %v1528_v29 = vcombine.low %v1350_v21, %v699_v55  ;;  %v640_v30 = vsel %vm101_vm5, %v618_v50, 0 }
  0x2d   :  { %648 = vmatpush1.bf16.msra.mxu1 %v625_v56  ;;  %v834_v31 = vrot.slane %v1513_v15, 7  ;;  %v749_v32 = vrot.slane %v1513_v15, 6  ;;  %v837_v4 = vrot.slane %v1515_v16, 7  ;;  %v716_v34 = vsel %vm54_vm1, %v714_v1, %v715_v18  ;;  %v926_v1 = vld [vmem:[%s1610_s0 + $0x90] sm:$0x77] }
  0x2e   :  { %549 = vmatpush1.bf16.msra.mxu0 %v532_v57  ;;  %649 = vmatprep.subr.bf16.mxu1 %v637_v53  ;;  %v760_v26 = vsel %vm74_vm2, %v718_v8, %v1173_v58  ;;  %v852_v21 = vrot.slane %v1519_v19, 1  ;;  %v853_v36 = vrot.slane %v1521_v20, 1  ;;  %v830_v37 = vsel %vm163_vm3, %v828_v23, %v829_v24 }
  0x2f   :  { %1090 = vmatprep.subr.msk.bf16.mxu0 %vm101_vm5, %v521_v59  ;;  %v1108_v38 = vcombine.low %v700_v61, %v700_v61  ;;  %v1112_v39 = vcombine.low %v823_v2, %v1417_v3  ;;  %v1114_v40 = vcombine.low %v824_v5, %v824_v5  ;;  %v756_v35 = vsel %vm74_vm2, %v715_v18, %v1176_v9 }
  0x30   :  { %v833_v41 = vrot.slane %v1528_v29, 7  ;;  %v748_v42 = vrot.slane %v1528_v29, 6  ;;  %v861_v44 = vsel %vm74_vm2, %v829_v24, %v834_v31  ;;  %v768_v3 = vsel %vm83_vm4, %v1105_v0, %v749_v32 }
  0x31   :  { %650 = vmatpush1.bf16.msra.mxu1 %v633_v17  ;;  %v838_v45 = vsel %vm74_vm2, %v834_v31, %v837_v4  ;;  %v929_v46 = vrot.slane %v1112_v39, 2  ;;  %v854_v48 = vsel %vm163_vm3, %v852_v21, %v853_v36  ;;  %v933_v49 = vrot.slane %v1521_v20, 2 }
  0x32   :  { %551 = vmatpush1.bf16.msra.mxu0 %v539_v22  ;;  %1096 = vmatprep.subr.msk.bf16.mxu1 %vm101_vm5, %v1451_v33  ;;  %v827_v33 = vsel %vm163_vm3, %v825_v27, %v826_v28  ;;  %v930_v50 = vrot.slane %v1114_v40, 2  ;;  %v1119_v51 = vcombine.high %v924_v11, %v1432_v14  ;;  %v835_v43 = vrot.slane %v1108_v38, 7 }
  0x33   :  { %776 = vmatprep.subr.bf16.mxu0 %v719_v25  ;;  %v849_v52 = vrot.slane %v1112_v39, 1  ;;  %v850_v54 = vrot.slane %v1114_v40, 1  ;;  %v1118_v56 = vcombine.low %v924_v11, %v1432_v14  ;;  %v752_v47 = vrot.slane %v1515_v16, 6 }
  0x34   :  { %v750_v57 = vrot.slane %v1108_v38, 6  ;;  %v931_v59 = vsel %vm54_vm1, %v929_v46, %v930_v50  ;;  %v962_v60 = vsel %vm83_vm4, %v933_v49, %v1119_v51  ;;  %v857_v14 = vsel %vm74_vm2, %v826_v28, %v833_v41 }
  0x35   :  { %1091 = vmatmul.mubr.msk.bf16.vlgmr.msra.gmra.mrb[8].mxu0 %vm97_vm6, %v1331_v12  ;;  %652 = vmatpush1.bf16.msra.mxu1 %v640_v30  ;;  %v950_v55 = vsel %vm74_vm2, %v1108_v38, %v931_v59  ;;  %v958_v61 = vsel %vm83_vm4, %v930_v50, %v1118_v56  ;;  %v764_v53 = vsel %vm83_vm4, %v1510_v13, %v748_v42  ;;  %v932_v5 = vrot.slane %v1519_v19, 2 }
  0x36   :  { %777 = vmatpush1.bf16.msra.mxu0 %v716_v34  ;;  %877 = vmatprep.subr.bf16.mxu1 %v830_v37  ;;  %v869_v62 = vsel %vm83_vm4, %v838_v45, %v854_v48  ;;  %v836_v63 = vsel %vm74_vm2, %v833_v41, %v835_v43  ;;  %v851_v58 = vsel %vm163_vm3, %v849_v52, %v850_v54  ;;  %v872_v9 = vsel %vm101_vm5, %v850_v54, 0 }
  0x37   :  { %778 = vmatprep.subr.bf16.mxu0 %v760_v26  ;;  %808 = vmatprep.mubr.bf16.mxu0 %v1190_v10  ;;  %v753_v0 = vsel %vm83_vm4, %v749_v32, %v752_v47  ;;  %v751_v2 = vsel %vm83_vm4, %v748_v42, %v750_v57  ;;  %v865_v6 = vsel %vm83_vm4, %v836_v63, %v851_v58 }
  0x38   :  { %1097 = vmatmul.mubr.msk.bf16.vlgmr.msra.gmra.mrb[8].mxu1 %vm97_vm6, %v1331_v12  ;;  %v771_v7 = vsel %vm101_vm5, %v751_v2, 0  ;;  %v934_v8 = vsel %vm54_vm1, %v932_v5, %v933_v49 }
  0x39   :  { %878 = vmatpush1.bf16.msra.mxu1 %v827_v33  ;;  %909 = vmatprep.mubr.bf16.mxu1 %v1190_v10  ;;  %v954_v13 = vsel %vm74_vm2, %v1515_v16, %v934_v8  ;;  %v1120_v16 = vcombine.low %v926_v1, %v926_v1 }
  0x3a   :  { %779 = vmatpush1.bf16.msra.mxu0 %v756_v35  ;;  %879 = vmatprep.subr.bf16.mxu1 %v861_v44 }
  0x3b   :  { %780 = vmatprep.subr.bf16.mxu0 %v768_v3  ;;  %v965_v17 = vsel %vm101_vm5, %v1120_v16, 0 }
  0x3d   :  { %880 = vmatpush1.bf16.msra.mxu1 %v857_v14 }
  0x3e   :  { %781 = vmatpush1.bf16.msra.mxu0 %v764_v53  ;;  %881 = vmatprep.subr.bf16.mxu1 %v869_v62 }
  0x3f   :  { %1110 = vmatprep.subr.msk.bf16.mxu0 %vm101_vm5, %v753_v0 }
  0x41   :  { %882 = vmatpush1.bf16.msra.mxu1 %v865_v6 }
  0x42   :  { %783 = vmatpush1.bf16.msra.mxu0 %v771_v7  ;;  %1116 = vmatprep.subr.msk.bf16.mxu1 %vm101_vm5, %v853_v36 }
  0x43   :  { %970 = vmatprep.subr.bf16.mxu0 %v1513_v15  ;;  %v1121_v15 = vcombine.high %v926_v1, %v926_v1 }
  0x45   :  { %1111 = vmatmul.mubr.msk.bf16.vlgmr.msra.gmra.mrb[12].mxu0 %vm97_vm6, %v1331_v12  ;;  %884 = vmatpush1.bf16.msra.mxu1 %v872_v9 }
  0x46   :  { %971 = vmatpush1.bf16.msra.mxu0 %v1528_v29  ;;  %1002 = vmatprep.mubr.bf16.mxu0 %v1190_v10 }
  0x47   :  { %972 = vmatprep.subr.bf16.mxu0 %v954_v13 }
  0x48   :  { %1117 = vmatmul.mubr.msk.bf16.vlgmr.msra.gmra.mrb[12].mxu1 %vm97_vm6, %v1331_v12 }
  0x4a   :  { %973 = vmatpush1.bf16.msra.mxu0 %v950_v55 }
  0x4b   :  { %974 = vmatprep.subr.bf16.mxu0 %v962_v60 }
  0x4e   :  { %975 = vmatpush1.bf16.msra.mxu0 %v958_v61 }
  0x4f   :  { %1122 = vmatprep.subr.msk.bf16.mxu0 %vm101_vm5, %v1121_v15 }
  0x52   :  { %977 = vmatpush1.bf16.msra.mxu0 %v965_v17 }
  0x55   :  { %1123 = vmatmul.mubr.msk.bf16.vlgmr.msra.gmra.mrb[16].mxu0 %vm97_vm6, %v1331_v12 }
  0x8c   :  { %v1022_v1 = vpop.permute.xlu0 %1021 }
  0xe8   :  { %v142_v10 = vpop.f32.mrb[0].mxu0 }
  0xe9   :  { %v144_v18 = vpop.f32.mrb[1].mxu0 }
  0xea   :  { %v146_v19 = vpop.f32.mrb[2].mxu0 }
  0xeb   :  { %v148_v20 = vpop.f32.mrb[3].mxu0  ;;  %v246_v22 = vpop.f32.mrb[0].mxu1 }
  0xec   :  { %v255_v23 = vmax.f32 %v142_v10, %v246_v22  ;;  %v248_v24 = vpop.f32.mrb[1].mxu1 }
  0xed   :  { %v256_v25 = vmax.f32 %v144_v18, %v248_v24  ;;  %v250_v27 = vpop.f32.mrb[2].mxu1 }
  0xee   :  { %v257_v28 = vmax.f32 %v146_v19, %v250_v27  ;;  %v252_v29 = vpop.f32.mrb[3].mxu1 }
  0xef   :  { %v258_v30 = vmax.f32 %v148_v20, %v252_v29 }
  0xf8   :  { %v346_v31 = vpop.f32.mrb[4].mxu0 }
  0xf9   :  { %v355_v32 = vmax.f32 %v255_v23, %v346_v31  ;;  %v348_v4 = vpop.f32.mrb[5].mxu0  ;;  %v1027_v23 = vpop.permute.xlu0 %1026 }
  0xfa   :  { %v356_v34 = vmax.f32 %v256_v25, %v348_v4  ;;  %v350_v26 = vpop.f32.mrb[6].mxu0 }
  0xfb   :  { %v357_v21 = vmax.f32 %v257_v28, %v350_v26  ;;  %v352_v36 = vpop.f32.mrb[7].mxu0  ;;  %v479_v12 = vpop.f32.mrb[4].mxu1 }
  0xfc   :  { %v358_v37 = vmax.f32 %v258_v30, %v352_v36  ;;  %v488_v38 = vmax.f32 %v355_v32, %v479_v12  ;;  %v481_v39 = vpop.f32.mrb[5].mxu1 }
  0xfd   :  { %v489_v40 = vmax.f32 %v356_v34, %v481_v39  ;;  %v483_v11 = vpop.f32.mrb[6].mxu1 }
  0xfe   :  { %v490_v33 = vmax.f32 %v357_v21, %v483_v11  ;;  %v485_v35 = vpop.f32.mrb[7].mxu1 }
  0xff   :  { %v491_v41 = vmax.f32 %v358_v37, %v485_v35 }
 0x108   :  { %v578_v42 = vpop.f32.mrb[8].mxu0 }
 0x109   :  { %v587_v44 = vmax.f32 %v488_v38, %v578_v42  ;;  %v580_v3 = vpop.f32.mrb[9].mxu0 }
 0x10a   :  { %v588_v45 = vmax.f32 %v489_v40, %v580_v3  ;;  %v582_v46 = vpop.f32.mrb[10].mxu0 }
 0x10b   :  { %v589_v48 = vmax.f32 %v490_v33, %v582_v46  ;;  %v584_v49 = vpop.f32.mrb[11].mxu0  ;;  %v679_v50 = vpop.f32.mrb[8].mxu1 }
 0x10c   :  { %v590_v51 = vmax.f32 %v491_v41, %v584_v49  ;;  %v688_v43 = vmax.f32 %v587_v44, %v679_v50  ;;  %v681_v52 = vpop.f32.mrb[9].mxu1 }
 0x10d   :  { %v689_v54 = vmax.f32 %v588_v45, %v681_v52  ;;  %v683_v56 = vpop.f32.mrb[10].mxu1 }
 0x10e   :  { %v690_v47 = vmax.f32 %v589_v48, %v683_v56  ;;  %v685_v57 = vpop.f32.mrb[11].mxu1 }
 0x10f   :  { %v691_v59 = vmax.f32 %v590_v51, %v685_v57 }
 0x118   :  { %v810_v60 = vpop.f32.mrb[12].mxu0 }
 0x119   :  { %v819_v55 = vmax.f32 %v688_v43, %v810_v60  ;;  %v812_v61 = vpop.f32.mrb[13].mxu0 }
 0x11a   :  { %v820_v14 = vmax.f32 %v689_v54, %v812_v61  ;;  %v814_v53 = vpop.f32.mrb[14].mxu0 }
 0x11b   :  { %v821_v62 = vmax.f32 %v690_v47, %v814_v53  ;;  %v816_v63 = vpop.f32.mrb[15].mxu0  ;;  %v911_v58 = vpop.f32.mrb[12].mxu1 }
 0x11c   :  { %v822_v0 = vmax.f32 %v691_v59, %v816_v63  ;;  %v920_v2 = vmax.f32 %v819_v55, %v911_v58  ;;  %v913_v5 = vpop.f32.mrb[13].mxu1 }
 0x11d   :  { %v921_v6 = vmax.f32 %v820_v14, %v913_v5  ;;  %v915_v7 = vpop.f32.mrb[14].mxu1 }
 0x11e   :  { %v922_v8 = vmax.f32 %v821_v62, %v915_v7  ;;  %v917_v9 = vpop.f32.mrb[15].mxu1 }
 0x11f   :  { %v923_v13 = vmax.f32 %v822_v0, %v917_v9 }
 0x128   :  { %v1004_v15 = vpop.f32.mrb[16].mxu0 }
 0x129   :  { %v1013_v16 = vmax.f32 %v920_v2, %v1004_v15  ;;  %v1006_v17 = vpop.f32.mrb[17].mxu0 }
 0x12a   :  { %v1014_v10 = vmax.f32 %v921_v6, %v1006_v17  ;;  %v1008_v18 = vpop.f32.mrb[18].mxu0 }
 0x12b   :  { %v1029_v19 = vadd.f32 %v1022_v1, %v1013_v16  ;;  %v1015_v20 = vmax.f32 %v922_v8, %v1008_v18  ;;  %v1010_v22 = vpop.f32.mrb[19].mxu0 }
 0x12c   :  { %v1030_v24 = vadd.f32 %v1022_v1, %v1014_v10  ;;  %v1016_v25 = vmax.f32 %v923_v13, %v1010_v22 }
 0x12d   :  { %v1033_v27 = vmax.f32 %v1029_v19, 0.0  ;;  %v1031_v28 = vadd.f32 %v1027_v23, %v1015_v20 }
 0x12e   :  { %v1034_v29 = vmax.f32 %v1030_v24, 0.0  ;;  %v1032_v30 = vadd.f32 %v1027_v23, %v1016_v25 }
 0x12f   :  { %1037 = vst [vmem:[%s1613_s3] sm:$0xff] %v1033_v27  ;;  %v1035_v31 = vmax.f32 %v1031_v28, 0.0 }
 0x130   :  { %1038 = vst [vmem:[%s1613_s3 + $0x8] sm:$0xff] %v1034_v29  ;;  %v1036_v32 = vmax.f32 %v1032_v30, 0.0 }
 0x131   :  { %1039 = vst [vmem:[%s1613_s3 + $0x10] sm:$0xff] %v1035_v31 }
 0x132   :  { %1040 = vst [vmem:[%s1613_s3 + $0x18] sm:$0xff] %v1036_v32 }

// kernel: pc_discriminator_forward.5
= control target key start
LH: loop header
LB: loop body
LE: loop exit
PB: predicated region body
PF: predicated region fallthrough
CT: control target
= control target key end

     0   :  { %vm1411_vm0 = vmmov 0   ;;  %s2189_s1 = inlined_call_operand.vmem [shape: f32[1536,128], index: 1, kind: input, shape index: {}]   ;;  %s2190_s0 = inlined_call_operand.vmem [shape: f32[8,1536], index: 0, kind: input, shape index: {}]   ;;  %s2191_s3 = inlined_call_operand.vmem [shape: f32[128,128], index: 3, kind: input, shape index: {}]   ;;  %s2192_s5 = inlined_call_operand.vmem [shape: f32[128,128], index: 5, kind: input, shape index: {}]   ;;  %s2193_s2 = inlined_call_operand.vmem [shape: f32[1,128], index: 2, kind: input, shape index: {}]   ;;  %s2194_s4 = inlined_call_operand.vmem [shape: f32[1,128], index: 4, kind: input, shape index: {}]   ;;  %s2195_s6 = inlined_call_operand.vmem [shape: f32[1,128], index: 6, kind: input, shape index: {}]   ;;  %s2196_s7 = inlined_call_operand.vmem [shape: f32[8,128], index: 7, kind: output, shape index: {}]  }
   0x1   :  { %v54_v0 = vld [vmem:[%s2189_s1 + $0x80] sm:$0xff]  ;;  %v55_v1 = vld [vmem:[%s2189_s1 + $0x88] sm:$0xff]  ;;  %v56_v11 = vld [vmem:[%s2189_s1 + $0x90] sm:$0xff] }
   0x2   :  { %v38_v2 = vld [vmem:[%s2189_s1] sm:$0xff]  ;;  %v1167_v3 = vpack.c.bf16 %v55_v1, %v54_v0  ;;  %v39_v4 = vld [vmem:[%s2189_s1 + $0x8] sm:$0xff]  ;;  %v57_v13 = vld [vmem:[%s2189_s1 + $0x98] sm:$0xff] }
   0x3   :  { %v86_v5 = vld [vmem:[%s2189_s1 + $0x180] sm:$0xff]  ;;  %v87_v6 = vld [vmem:[%s2189_s1 + $0x188] sm:$0xff]  ;;  %v1169_v7 = vpack.c.bf16 %v39_v4, %v38_v2  ;;  %v40_v14 = vld [vmem:[%s2189_s1 + $0x10] sm:$0xff]  ;;  %v1171_v16 = vpack.c.bf16 %v57_v13, %v56_v11 }
   0x4   :  { %v1199_v8 = vpack.c.bf16 %v87_v6, %v86_v5  ;;  %v70_v9 = vld [vmem:[%s2189_s1 + $0x100] sm:$0xff]  ;;  %v71_v10 = vld [vmem:[%s2189_s1 + $0x108] sm:$0xff]  ;;  %1168 = vmatprep.subr.bf16.mxu0 %v1167_v3  ;;  %v41_v15 = vld [vmem:[%s2189_s1 + $0x18] sm:$0xff] }
   0x5   :  { %v1201_v12 = vpack.c.bf16 %v71_v10, %v70_v9  ;;  %1170 = vmatpush3.bf16.msra.mxu0 %v1169_v7  ;;  %v1173_v17 = vpack.c.bf16 %v41_v15, %v40_v14  ;;  %v88_v18 = vld [vmem:[%s2189_s1 + $0x190] sm:$0xff]  ;;  %v89_v19 = vld [vmem:[%s2189_s1 + $0x198] sm:$0xff]  ;;  %v58_v23 = vld [vmem:[%s2189_s1 + $0xa0] sm:$0xff] }
   0x6   :  { %1200 = vmatprep.subr.bf16.mxu1 %v1199_v8  ;;  %v72_v20 = vld [vmem:[%s2189_s1 + $0x110] sm:$0xff]  ;;  %v1203_v21 = vpack.c.bf16 %v89_v19, %v88_v18  ;;  %v73_v22 = vld [vmem:[%s2189_s1 + $0x118] sm:$0xff]  ;;  %v59_v24 = vld [vmem:[%s2189_s1 + $0xa8] sm:$0xff]  ;;  %1172 = vmatprep.subr.bf16.mxu0 %v1171_v16 }
   0x7   :  { %1202 = vmatpush3.bf16.msra.mxu1 %v1201_v12  ;;  %v1205_v25 = vpack.c.bf16 %v73_v22, %v72_v20  ;;  %v1175_v26 = vpack.c.bf16 %v59_v24, %v58_v23  ;;  %v42_v27 = vld [vmem:[%s2189_s1 + $0x20] sm:$0xff]  ;;  %v43_v28 = vld [vmem:[%s2189_s1 + $0x28] sm:$0xff]  ;;  %v60_v35 = vld [vmem:[%s2189_s1 + $0xb0] sm:$0xff] }
   0x8   :  { %v90_v29 = vld [vmem:[%s2189_s1 + $0x1a0] sm:$0xff]  ;;  %1204 = vmatprep.subr.bf16.mxu1 %v1203_v21  ;;  %v91_v30 = vld [vmem:[%s2189_s1 + $0x1a8] sm:$0xff]  ;;  %v1177_v33 = vpack.c.bf16 %v43_v28, %v42_v27  ;;  %v61_v36 = vld [vmem:[%s2189_s1 + $0xb8] sm:$0xff] }
   0x9   :  { %v74_v31 = vld [vmem:[%s2189_s1 + $0x120] sm:$0xff]  ;;  %v75_v32 = vld [vmem:[%s2189_s1 + $0x128] sm:$0xff]  ;;  %1174 = vmatpush3.bf16.msra.mxu0 %v1173_v17  ;;  %v1207_v34 = vpack.c.bf16 %v91_v30, %v90_v29  ;;  %v44_v37 = vld [vmem:[%s2189_s1 + $0x30] sm:$0xff]  ;;  %v1179_v39 = vpack.c.bf16 %v61_v36, %v60_v35 }
   0xa   :  { %1176 = vmatprep.subr.bf16.mxu0 %v1175_v26  ;;  %v1209_v38 = vpack.c.bf16 %v75_v32, %v74_v31  ;;  %v45_v40 = vld [vmem:[%s2189_s1 + $0x38] sm:$0xff]  ;;  %v92_v41 = vld [vmem:[%s2189_s1 + $0x1b0] sm:$0xff]  ;;  %v62_v46 = vld [vmem:[%s2189_s1 + $0xc0] sm:$0xff] }
   0xb   :  { %1206 = vmatpush3.bf16.msra.mxu1 %v1205_v25  ;;  %v93_v42 = vld [vmem:[%s2189_s1 + $0x1b8] sm:$0xff]  ;;  %v76_v44 = vld [vmem:[%s2189_s1 + $0x130] sm:$0xff]  ;;  %v63_v47 = vld [vmem:[%s2189_s1 + $0xc8] sm:$0xff]  ;;  %v1181_v48 = vpack.c.bf16 %v45_v40, %v44_v37 }
   0xc   :  { %1208 = vmatprep.subr.bf16.mxu1 %v1207_v34  ;;  %v1211_v43 = vpack.c.bf16 %v93_v42, %v92_v41  ;;  %v77_v45 = vld [vmem:[%s2189_s1 + $0x138] sm:$0xff]  ;;  %v94_v49 = vld [vmem:[%s2189_s1 + $0x1c0] sm:$0xff]  ;;  %v95_v50 = vld [vmem:[%s2189_s1 + $0x1c8] sm:$0xff]  ;;  %v1183_v52 = vpack.c.bf16 %v63_v47, %v62_v46 }
   0xd   :  { %1178 = vmatpush3.bf16.msra.mxu0 %v1177_v33  ;;  %v1213_v51 = vpack.c.bf16 %v77_v45, %v76_v44  ;;  %v46_v53 = vld [vmem:[%s2189_s1 + $0x40] sm:$0xff]  ;;  %v47_v54 = vld [vmem:[%s2189_s1 + $0x48] sm:$0xff]  ;;  %v1215_v56 = vpack.c.bf16 %v95_v50, %v94_v49  ;;  %v64_v58 = vld [vmem:[%s2189_s1 + $0xd0] sm:$0xff] }
   0xe   :  { %1180 = vmatprep.subr.bf16.mxu0 %v1179_v39  ;;  %v78_v55 = vld [vmem:[%s2189_s1 + $0x140] sm:$0xff]  ;;  %v79_v57 = vld [vmem:[%s2189_s1 + $0x148] sm:$0xff]  ;;  %v65_v59 = vld [vmem:[%s2189_s1 + $0xd8] sm:$0xff]  ;;  %v1185_v62 = vpack.c.bf16 %v47_v54, %v46_v53 }
   0xf   :  { %1210 = vmatpush3.bf16.msra.mxu1 %v1209_v38  ;;  %v96_v60 = vld [vmem:[%s2189_s1 + $0x1d0] sm:$0xff]  ;;  %v97_v61 = vld [vmem:[%s2189_s1 + $0x1d8] sm:$0xff]  ;;  %v1217_v63 = vpack.c.bf16 %v79_v57, %v78_v55  ;;  %v1187_v0 = vpack.c.bf16 %v65_v59, %v64_v58  ;;  %v66_v6 = vld [vmem:[%s2189_s1 + $0xe0] sm:$0xff] }
  0x10   :  { %1212 = vmatprep.subr.bf16.mxu1 %v1211_v43  ;;  %v48_v1 = vld [vmem:[%s2189_s1 + $0x50] sm:$0xff]  ;;  %v49_v2 = vld [vmem:[%s2189_s1 + $0x58] sm:$0xff]  ;;  %v1219_v4 = vpack.c.bf16 %v97_v61, %v96_v60  ;;  %v67_v7 = vld [vmem:[%s2189_s1 + $0xe8] sm:$0xff] }
  0x11   :  { %1182 = vmatpush3.bf16.msra.mxu0 %v1181_v48  ;;  %v80_v3 = vld [vmem:[%s2189_s1 + $0x150] sm:$0xff]  ;;  %v81_v5 = vld [vmem:[%s2189_s1 + $0x158] sm:$0xff]  ;;  %v98_v8 = vld [vmem:[%s2189_s1 + $0x1e0] sm:$0xff]  ;;  %v1189_v10 = vpack.c.bf16 %v49_v2, %v48_v1  ;;  %v1191_v14 = vpack.c.bf16 %v67_v7, %v66_v6 }
  0x12   :  { %1184 = vmatprep.subr.bf16.mxu0 %v1183_v52  ;;  %v99_v9 = vld [vmem:[%s2189_s1 + $0x1e8] sm:$0xff]  ;;  %v50_v11 = vld [vmem:[%s2189_s1 + $0x60] sm:$0xff]  ;;  %v1221_v13 = vpack.c.bf16 %v81_v5, %v80_v3  ;;  %v68_v19 = vld [vmem:[%s2189_s1 + $0xf0] sm:$0xff] }
  0x13   :  { %1214 = vmatpush3.bf16.msra.mxu1 %v1213_v51  ;;  %v51_v12 = vld [vmem:[%s2189_s1 + $0x68] sm:$0xff]  ;;  %v82_v15 = vld [vmem:[%s2189_s1 + $0x160] sm:$0xff]  ;;  %v1223_v18 = vpack.c.bf16 %v99_v9, %v98_v8  ;;  %v69_v20 = vld [vmem:[%s2189_s1 + $0xf8] sm:$0xff] }
  0x14   :  { %1216 = vmatprep.subr.bf16.mxu1 %v1215_v56  ;;  %v83_v16 = vld [vmem:[%s2189_s1 + $0x168] sm:$0xff]  ;;  %v29_v21 = vld [vmem:[%s2190_s0 + $0x18] sm:$0xff]  ;;  %v100_v22 = vld [vmem:[%s2189_s1 + $0x1f0] sm:$0xff]  ;;  %v1193_v24 = vpack.c.bf16 %v51_v12, %v50_v11  ;;  %v1195_v26 = vpack.c.bf16 %v69_v20, %v68_v19 }
  0x15   :  { %1186 = vmatpush3.bf16.msra.mxu0 %v1185_v62  ;;  %v27_v17 = vld [vmem:[%s2190_s0 + $0x8] sm:$0xff]  ;;  %v101_v23 = vld [vmem:[%s2189_s1 + $0x1f8] sm:$0xff]  ;;  %371 = vmatprep.mubr.f32.mxu1 %v29_v21  ;;  %v1225_v25 = vpack.c.bf16 %v83_v16, %v82_v15  ;;  %v52_v27 = vld [vmem:[%s2189_s1 + $0x70] sm:$0xff] }
  0x16   :  { %1188 = vmatprep.subr.bf16.mxu0 %v1187_v0  ;;  %301 = vmatprep.mubr.f32.mxu0 %v27_v17  ;;  %v53_v28 = vld [vmem:[%s2189_s1 + $0x78] sm:$0xff]  ;;  %v84_v29 = vld [vmem:[%s2189_s1 + $0x170] sm:$0xff]  ;;  %v1227_v30 = vpack.c.bf16 %v101_v23, %v100_v22  ;;  %v118_v32 = vld [vmem:[%s2189_s1 + $0x280] sm:$0xff] }
  0x17   :  { %1218 = vmatpush3.bf16.msra.mxu1 %v1217_v63  ;;  %v85_v31 = vld [vmem:[%s2189_s1 + $0x178] sm:$0xff]  ;;  %v119_v33 = vld [vmem:[%s2189_s1 + $0x288] sm:$0xff]  ;;  %v150_v34 = vld [vmem:[%s2189_s1 + $0x380] sm:$0xff]  ;;  %v1197_v36 = vpack.c.bf16 %v53_v28, %v52_v27 }
  0x18   :  { %1220 = vmatprep.subr.bf16.mxu1 %v1219_v4  ;;  %v151_v35 = vld [vmem:[%s2189_s1 + $0x388] sm:$0xff]  ;;  %v1229_v37 = vpack.c.bf16 %v85_v31, %v84_v29  ;;  %v1231_v38 = vpack.c.bf16 %v119_v33, %v118_v32  ;;  %v102_v39 = vld [vmem:[%s2189_s1 + $0x200] sm:$0xff]  ;;  %v120_v44 = vld [vmem:[%s2189_s1 + $0x290] sm:$0xff] }
  0x19   :  { %1190 = vmatpush3.bf16.msra.mxu0 %v1189_v10  ;;  %v103_v40 = vld [vmem:[%s2189_s1 + $0x208] sm:$0xff]  ;;  %v134_v41 = vld [vmem:[%s2189_s1 + $0x300] sm:$0xff]  ;;  %v1263_v42 = vpack.c.bf16 %v151_v35, %v150_v34  ;;  %v121_v45 = vld [vmem:[%s2189_s1 + $0x298] sm:$0xff] }
  0x1a   :  { %1192 = vmatprep.subr.bf16.mxu0 %v1191_v14  ;;  %v135_v43 = vld [vmem:[%s2189_s1 + $0x308] sm:$0xff]  ;;  %v152_v46 = vld [vmem:[%s2189_s1 + $0x390] sm:$0xff]  ;;  %v153_v47 = vld [vmem:[%s2189_s1 + $0x398] sm:$0xff]  ;;  %v1233_v49 = vpack.c.bf16 %v103_v40, %v102_v39  ;;  %v1235_v52 = vpack.c.bf16 %v121_v45, %v120_v44 }
  0x1b   :  { %1222 = vmatpush3.bf16.msra.mxu1 %v1221_v13  ;;  %v26_v48 = vld [vmem:[%s2190_s0] sm:$0xff]  ;;  %v28_v50 = vld [vmem:[%s2190_s0 + $0x10] sm:$0xff]  ;;  %v1265_v51 = vpack.c.bf16 %v135_v43, %v134_v41  ;;  %v105_v54 = vld [vmem:[%s2189_s1 + $0x218] sm:$0xff]  ;;  %v1267_v56 = vpack.c.bf16 %v153_v47, %v152_v46 }
  0x1c   :  { %1224 = vmatprep.subr.bf16.mxu1 %v1223_v18  ;;  %v104_v53 = vld [vmem:[%s2189_s1 + $0x210] sm:$0xff]  ;;  %v137_v57 = vld [vmem:[%s2189_s1 + $0x318] sm:$0xff]  ;;  %v122_v58 = vld [vmem:[%s2189_s1 + $0x2a0] sm:$0xff] }
  0x1d   :  { %1194 = vmatpush3.bf16.msra.mxu0 %v1193_v24  ;;  %v136_v55 = vld [vmem:[%s2189_s1 + $0x310] sm:$0xff]  ;;  %v123_v59 = vld [vmem:[%s2189_s1 + $0x2a8] sm:$0xff]  ;;  %v154_v60 = vld [vmem:[%s2189_s1 + $0x3a0] sm:$0xff]  ;;  %v1237_v62 = vpack.c.bf16 %v105_v54, %v104_v53 }
  0x1e   :  { %1196 = vmatprep.subr.bf16.mxu0 %v1195_v26  ;;  %v155_v61 = vld [vmem:[%s2189_s1 + $0x3a8] sm:$0xff]  ;;  %v1269_v63 = vpack.c.bf16 %v137_v57, %v136_v55  ;;  %v1239_v0 = vpack.c.bf16 %v123_v59, %v122_v58  ;;  %v106_v1 = vld [vmem:[%s2189_s1 + $0x220] sm:$0xff]  ;;  %v124_v6 = vld [vmem:[%s2189_s1 + $0x2b0] sm:$0xff] }
  0x1f   :  { %1226 = vmatpush3.bf16.msra.mxu1 %v1225_v25  ;;  %v107_v2 = vld [vmem:[%s2189_s1 + $0x228] sm:$0xff]  ;;  %v138_v3 = vld [vmem:[%s2189_s1 + $0x320] sm:$0xff]  ;;  %v1271_v4 = vpack.c.bf16 %v155_v61, %v154_v60  ;;  %v125_v7 = vld [vmem:[%s2189_s1 + $0x2b8] sm:$0xff] }
  0x20   :  { %1228 = vmatprep.subr.bf16.mxu1 %v1227_v30  ;;  %v139_v5 = vld [vmem:[%s2189_s1 + $0x328] sm:$0xff]  ;;  %v156_v8 = vld [vmem:[%s2189_s1 + $0x3b0] sm:$0xff]  ;;  %v157_v9 = vld [vmem:[%s2189_s1 + $0x3b8] sm:$0xff]  ;;  %v1241_v10 = vpack.c.bf16 %v107_v2, %v106_v1  ;;  %v1243_v12 = vpack.c.bf16 %v125_v7, %v124_v6 }
  0x21   :  { %1198 = vmatpush3.bf16.msra.mxu0 %v1197_v36  ;;  %v1273_v11 = vpack.c.bf16 %v139_v5, %v138_v3  ;;  %v108_v13 = vld [vmem:[%s2189_s1 + $0x230] sm:$0xff]  ;;  %v109_v14 = vld [vmem:[%s2189_s1 + $0x238] sm:$0xff]  ;;  %v1275_v16 = vpack.c.bf16 %v157_v9, %v156_v8  ;;  %v126_v18 = vld [vmem:[%s2189_s1 + $0x2c0] sm:$0xff] }
  0x22   :  { %1232 = vmatprep.subr.bf16.mxu0 %v1231_v38  ;;  %v140_v15 = vld [vmem:[%s2189_s1 + $0x330] sm:$0xff]  ;;  %v141_v17 = vld [vmem:[%s2189_s1 + $0x338] sm:$0xff]  ;;  %v127_v19 = vld [vmem:[%s2189_s1 + $0x2c8] sm:$0xff]  ;;  %v1245_v22 = vpack.c.bf16 %v109_v14, %v108_v13 }
  0x23   :  { %1230 = vmatpush3.bf16.msra.mxu1 %v1229_v37  ;;  %v158_v20 = vld [vmem:[%s2189_s1 + $0x3c0] sm:$0xff]  ;;  %v159_v21 = vld [vmem:[%s2189_s1 + $0x3c8] sm:$0xff]  ;;  %v1277_v25 = vpack.c.bf16 %v141_v17, %v140_v15  ;;  %v1247_v26 = vpack.c.bf16 %v127_v19, %v126_v18  ;;  %v33_v29 = vld [vmem:[%s2190_s0 + $0x38] sm:$0xff] }
  0x24   :  { %1264 = vmatprep.subr.bf16.mxu1 %v1263_v42  ;;  %302 = vmatmul.mubr.f32.vlgmr.msra.gmra.mrb[0].mxu0 %v26_v48  ;;  %v110_v23 = vld [vmem:[%s2189_s1 + $0x240] sm:$0xff]  ;;  %v31_v24 = vld [vmem:[%s2190_s0 + $0x28] sm:$0xff]  ;;  %v1279_v30 = vpack.c.bf16 %v159_v21, %v158_v20  ;;  %v128_v32 = vld [vmem:[%s2189_s1 + $0x2d0] sm:$0xff] }
  0x25   :  { %1234 = vmatpush3.bf16.msra.mxu0 %v1233_v49  ;;  %v111_v27 = vld [vmem:[%s2189_s1 + $0x248] sm:$0xff]  ;;  %v142_v28 = vld [vmem:[%s2189_s1 + $0x340] sm:$0xff]  ;;  %v129_v33 = vld [vmem:[%s2189_s1 + $0x2d8] sm:$0xff]  ;;  %441 = vmatprep.mubr.f32.mxu0 %v31_v24 }
  0x26   :  { %372 = vmatmul.mubr.f32.vlgmr.msra.gmra.mrb[0].mxu1 %v28_v50  ;;  %1236 = vmatprep.subr.bf16.mxu0 %v1235_v52  ;;  %v143_v31 = vld [vmem:[%s2189_s1 + $0x348] sm:$0xff]  ;;  %v160_v34 = vld [vmem:[%s2189_s1 + $0x3d0] sm:$0xff]  ;;  %v161_v35 = vld [vmem:[%s2189_s1 + $0x3d8] sm:$0xff]  ;;  %v1249_v36 = vpack.c.bf16 %v111_v27, %v110_v23  ;;  %v1251_v38 = vpack.c.bf16 %v129_v33, %v128_v32 }
  0x27   :  { %1266 = vmatpush3.bf16.msra.mxu1 %v1265_v51  ;;  %511 = vmatprep.mubr.f32.mxu1 %v33_v29  ;;  %v1281_v37 = vpack.c.bf16 %v143_v31, %v142_v28  ;;  %v112_v39 = vld [vmem:[%s2189_s1 + $0x250] sm:$0xff]  ;;  %v113_v40 = vld [vmem:[%s2189_s1 + $0x258] sm:$0xff]  ;;  %v1283_v42 = vpack.c.bf16 %v161_v35, %v160_v34  ;;  %v130_v44 = vld [vmem:[%s2189_s1 + $0x2e0] sm:$0xff] }
  0x28   :  { %1268 = vmatprep.subr.bf16.mxu1 %v1267_v56  ;;  %v144_v41 = vld [vmem:[%s2189_s1 + $0x350] sm:$0xff]  ;;  %v145_v43 = vld [vmem:[%s2189_s1 + $0x358] sm:$0xff]  ;;  %v131_v45 = vld [vmem:[%s2189_s1 + $0x2e8] sm:$0xff]  ;;  %v1253_v48 = vpack.c.bf16 %v113_v40, %v112_v39 }
  0x29   :  { %1238 = vmatpush3.bf16.msra.mxu0 %v1237_v62  ;;  %v162_v46 = vld [vmem:[%s2189_s1 + $0x3e0] sm:$0xff]  ;;  %v163_v47 = vld [vmem:[%s2189_s1 + $0x3e8] sm:$0xff]  ;;  %v1285_v49 = vpack.c.bf16 %v145_v43, %v144_v41  ;;  %v1255_v50 = vpack.c.bf16 %v131_v45, %v130_v44  ;;  %v132_v56 = vld [vmem:[%s2189_s1 + $0x2f0] sm:$0xff] }
  0x2a   :  { %1240 = vmatprep.subr.bf16.mxu0 %v1239_v0  ;;  %v114_v51 = vld [vmem:[%s2189_s1 + $0x260] sm:$0xff]  ;;  %v115_v52 = vld [vmem:[%s2189_s1 + $0x268] sm:$0xff]  ;;  %v1287_v54 = vpack.c.bf16 %v163_v47, %v162_v46  ;;  %v133_v57 = vld [vmem:[%s2189_s1 + $0x2f8] sm:$0xff] }
  0x2b   :  { %1270 = vmatpush3.bf16.msra.mxu1 %v1269_v63  ;;  %v146_v53 = vld [vmem:[%s2189_s1 + $0x360] sm:$0xff]  ;;  %v147_v55 = vld [vmem:[%s2189_s1 + $0x368] sm:$0xff]  ;;  %v164_v58 = vld [vmem:[%s2189_s1 + $0x3f0] sm:$0xff]  ;;  %v1257_v60 = vpack.c.bf16 %v115_v52, %v114_v51  ;;  %v1259_v62 = vpack.c.bf16 %v133_v57, %v132_v56 }
  0x2c   :  { %1272 = vmatprep.subr.bf16.mxu1 %v1271_v4  ;;  %v165_v59 = vld [vmem:[%s2189_s1 + $0x3f8] sm:$0xff]  ;;  %v1289_v61 = vpack.c.bf16 %v147_v55, %v146_v53  ;;  %v116_v63 = vld [vmem:[%s2189_s1 + $0x270] sm:$0xff]  ;;  %v182_v4 = vld [vmem:[%s2189_s1 + $0x480] sm:$0xff] }
  0x2d   :  { %1242 = vmatpush3.bf16.msra.mxu0 %v1241_v10  ;;  %v117_v0 = vld [vmem:[%s2189_s1 + $0x278] sm:$0xff]  ;;  %v148_v1 = vld [vmem:[%s2189_s1 + $0x370] sm:$0xff]  ;;  %v1291_v2 = vpack.c.bf16 %v165_v59, %v164_v58  ;;  %v183_v5 = vld [vmem:[%s2189_s1 + $0x488] sm:$0xff] }
  0x2e   :  { %1244 = vmatprep.subr.bf16.mxu0 %v1243_v12  ;;  %v149_v3 = vld [vmem:[%s2189_s1 + $0x378] sm:$0xff]  ;;  %v214_v6 = vld [vmem:[%s2189_s1 + $0x580] sm:$0xff]  ;;  %v215_v7 = vld [vmem:[%s2189_s1 + $0x588] sm:$0xff]  ;;  %v1261_v8 = vpack.c.bf16 %v117_v0, %v116_v63  ;;  %v1295_v10 = vpack.c.bf16 %v183_v5, %v182_v4 }
  0x2f   :  { %1274 = vmatpush3.bf16.msra.mxu1 %v1273_v11  ;;  %v1293_v9 = vpack.c.bf16 %v149_v3, %v148_v1  ;;  %v166_v11 = vld [vmem:[%s2189_s1 + $0x400] sm:$0xff]  ;;  %v167_v12 = vld [vmem:[%s2189_s1 + $0x408] sm:$0xff]  ;;  %v1327_v14 = vpack.c.bf16 %v215_v7, %v214_v6  ;;  %v185_v17 = vld [vmem:[%s2189_s1 + $0x498] sm:$0xff] }
  0x30   :  { %1276 = vmatprep.subr.bf16.mxu1 %v1275_v16  ;;  %v198_v13 = vld [vmem:[%s2189_s1 + $0x500] sm:$0xff]  ;;  %v199_v15 = vld [vmem:[%s2189_s1 + $0x508] sm:$0xff]  ;;  %v184_v16 = vld [vmem:[%s2189_s1 + $0x490] sm:$0xff]  ;;  %v1297_v21 = vpack.c.bf16 %v167_v12, %v166_v11 }
  0x31   :  { %1246 = vmatpush3.bf16.msra.mxu0 %v1245_v22  ;;  %v216_v18 = vld [vmem:[%s2189_s1 + $0x590] sm:$0xff]  ;;  %v217_v19 = vld [vmem:[%s2189_s1 + $0x598] sm:$0xff]  ;;  %v30_v20 = vld [vmem:[%s2190_s0 + $0x20] sm:$0xff]  ;;  %v1329_v23 = vpack.c.bf16 %v199_v15, %v198_v13  ;;  %v1299_v24 = vpack.c.bf16 %v185_v17, %v184_v16 }
  0x32   :  { %1248 = vmatprep.subr.bf16.mxu0 %v1247_v26  ;;  %v32_v22 = vld [vmem:[%s2190_s0 + $0x30] sm:$0xff]  ;;  %v169_v26 = vld [vmem:[%s2189_s1 + $0x418] sm:$0xff]  ;;  %v1331_v28 = vpack.c.bf16 %v217_v19, %v216_v18  ;;  %v187_v31 = vld [vmem:[%s2189_s1 + $0x4a8] sm:$0xff] }
  0x33   :  { %1278 = vmatpush3.bf16.msra.mxu1 %v1277_v25  ;;  %v168_v25 = vld [vmem:[%s2189_s1 + $0x410] sm:$0xff]  ;;  %v201_v29 = vld [vmem:[%s2189_s1 + $0x518] sm:$0xff]  ;;  %v218_v32 = vld [vmem:[%s2189_s1 + $0x5a0] sm:$0xff] }
  0x34   :  { %1280 = vmatprep.subr.bf16.mxu1 %v1279_v30  ;;  %v200_v27 = vld [vmem:[%s2189_s1 + $0x510] sm:$0xff]  ;;  %v186_v30 = vld [vmem:[%s2189_s1 + $0x4a0] sm:$0xff]  ;;  %v219_v33 = vld [vmem:[%s2189_s1 + $0x5a8] sm:$0xff]  ;;  %v1301_v35 = vpack.c.bf16 %v169_v26, %v168_v25 }
  0x35   :  { %1250 = vmatpush3.bf16.msra.mxu0 %v1249_v36  ;;  %v35_v34 = vld [vmem:[%s2190_s0 + $0x48] sm:$0xff]  ;;  %v37_v36 = vld [vmem:[%s2190_s0 + $0x58] sm:$0xff]  ;;  %v170_v39 = vld [vmem:[%s2189_s1 + $0x420] sm:$0xff] }
  0x36   :  { %1252 = vmatprep.subr.bf16.mxu0 %v1251_v38  ;;  %v1303_v38 = vpack.c.bf16 %v187_v31, %v186_v30  ;;  %v171_v40 = vld [vmem:[%s2189_s1 + $0x428] sm:$0xff]  ;;  %v202_v41 = vld [vmem:[%s2189_s1 + $0x520] sm:$0xff]  ;;  %v188_v44 = vld [vmem:[%s2189_s1 + $0x4b0] sm:$0xff] }
  0x37   :  { %1282 = vmatpush3.bf16.msra.mxu1 %v1281_v37  ;;  %v1333_v37 = vpack.c.bf16 %v201_v29, %v200_v27  ;;  %v203_v43 = vld [vmem:[%s2189_s1 + $0x528] sm:$0xff]  ;;  %v189_v45 = vld [vmem:[%s2189_s1 + $0x4b8] sm:$0xff]  ;;  %v220_v46 = vld [vmem:[%s2189_s1 + $0x5b0] sm:$0xff] }
  0x38   :  { %1284 = vmatprep.subr.bf16.mxu1 %v1283_v42  ;;  %v1335_v42 = vpack.c.bf16 %v219_v33, %v218_v32  ;;  %v221_v47 = vld [vmem:[%s2189_s1 + $0x5b8] sm:$0xff]  ;;  %v172_v51 = vld [vmem:[%s2189_s1 + $0x430] sm:$0xff]  ;;  %v190_v56 = vld [vmem:[%s2189_s1 + $0x4c0] sm:$0xff] }
  0x39   :  { %1254 = vmatpush3.bf16.msra.mxu0 %v1253_v48  ;;  %v1305_v48 = vpack.c.bf16 %v171_v40, %v170_v39  ;;  %v173_v52 = vld [vmem:[%s2189_s1 + $0x438] sm:$0xff]  ;;  %v204_v53 = vld [vmem:[%s2189_s1 + $0x530] sm:$0xff]  ;;  %v191_v57 = vld [vmem:[%s2189_s1 + $0x4c8] sm:$0xff] }
  0x3a   :  { %1256 = vmatprep.subr.bf16.mxu0 %v1255_v50  ;;  %v1307_v50 = vpack.c.bf16 %v189_v45, %v188_v44  ;;  %v205_v55 = vld [vmem:[%s2189_s1 + $0x538] sm:$0xff]  ;;  %v222_v58 = vld [vmem:[%s2189_s1 + $0x5c0] sm:$0xff]  ;;  %v223_v59 = vld [vmem:[%s2189_s1 + $0x5c8] sm:$0xff]  ;;  %v1410_v44 = vmov 0.0|0.0  }
  0x3b   :  { %1286 = vmatpush3.bf16.msra.mxu1 %v1285_v49  ;;  %v1337_v49 = vpack.c.bf16 %v203_v43, %v202_v41  ;;  %v174_v63 = vld [vmem:[%s2189_s1 + $0x440] sm:$0xff]  ;;  %v175_v0 = vld [vmem:[%s2189_s1 + $0x448] sm:$0xff]  ;;  %v192_v4 = vld [vmem:[%s2189_s1 + $0x4d0] sm:$0xff] }
  0x3c   :  { %1288 = vmatprep.subr.bf16.mxu1 %v1287_v54  ;;  %v1339_v54 = vpack.c.bf16 %v221_v47, %v220_v46  ;;  %v206_v1 = vld [vmem:[%s2189_s1 + $0x540] sm:$0xff]  ;;  %v207_v3 = vld [vmem:[%s2189_s1 + $0x548] sm:$0xff]  ;;  %v193_v5 = vld [vmem:[%s2189_s1 + $0x4d8] sm:$0xff] }
  0x3d   :  { %1258 = vmatpush3.bf16.msra.mxu0 %v1257_v60  ;;  %v1309_v60 = vpack.c.bf16 %v173_v52, %v172_v51  ;;  %v224_v6 = vld [vmem:[%s2189_s1 + $0x5d0] sm:$0xff]  ;;  %v225_v7 = vld [vmem:[%s2189_s1 + $0x5d8] sm:$0xff]  ;;  %v194_v16 = vld [vmem:[%s2189_s1 + $0x4e0] sm:$0xff] }
  0x3e   :  { %1260 = vmatprep.subr.bf16.mxu0 %v1259_v62  ;;  %v1311_v62 = vpack.c.bf16 %v191_v57, %v190_v56  ;;  %v176_v11 = vld [vmem:[%s2189_s1 + $0x450] sm:$0xff]  ;;  %v177_v12 = vld [vmem:[%s2189_s1 + $0x458] sm:$0xff]  ;;  %v195_v17 = vld [vmem:[%s2189_s1 + $0x4e8] sm:$0xff] }
  0x3f   :  { %1290 = vmatpush3.bf16.msra.mxu1 %v1289_v61  ;;  %v1341_v61 = vpack.c.bf16 %v205_v55, %v204_v53  ;;  %v208_v13 = vld [vmem:[%s2189_s1 + $0x550] sm:$0xff]  ;;  %v209_v15 = vld [vmem:[%s2189_s1 + $0x558] sm:$0xff]  ;;  %v226_v18 = vld [vmem:[%s2189_s1 + $0x5e0] sm:$0xff] }
  0x40   :  { %1292 = vmatprep.subr.bf16.mxu1 %v1291_v2  ;;  %v1343_v2 = vpack.c.bf16 %v223_v59, %v222_v58  ;;  %v227_v19 = vld [vmem:[%s2189_s1 + $0x5e8] sm:$0xff]  ;;  %v210_v25 = vld [vmem:[%s2189_s1 + $0x560] sm:$0xff]  ;;  %v197_v29 = vld [vmem:[%s2189_s1 + $0x4f8] sm:$0xff] }
  0x41   :  { %1262 = vmatpush3.bf16.msra.mxu0 %v1261_v8  ;;  %v1313_v8 = vpack.c.bf16 %v175_v0, %v174_v63  ;;  %v1351_v26 = vpack.c.bf16 %v227_v19, %v226_v18  ;;  %v211_v27 = vld [vmem:[%s2189_s1 + $0x568] sm:$0xff]  ;;  %v228_v30 = vld [vmem:[%s2189_s1 + $0x5f0] sm:$0xff]  ;;  %v229_v31 = vld [vmem:[%s2189_s1 + $0x5f8] sm:$0xff] }
  0x42   :  { %1296 = vmatprep.subr.bf16.mxu0 %v1295_v10  ;;  %v1315_v10 = vpack.c.bf16 %v193_v5, %v192_v4  ;;  %v1353_v33 = vpack.c.bf16 %v211_v27, %v210_v25  ;;  %v213_v39 = vld [vmem:[%s2189_s1 + $0x578] sm:$0xff]  ;;  %v36_v43 = vld [vmem:[%s2190_s0 + $0x50] sm:$0xff]  ;;  %v658_v45 = vld [vmem:[%s2191_s3] sm:$0xff]  ;;  %v1412_v5 = vmov 0.0  }
  0x43   :  { %1294 = vmatpush3.bf16.msra.mxu1 %v1293_v9  ;;  %v1345_v9 = vpack.c.bf16 %v207_v3, %v206_v1  ;;  %v659_v46 = vld [vmem:[%s2191_s3 + $0x8] sm:$0xff]  ;;  %v660_v47 = vld [vmem:[%s2191_s3 + $0x10] sm:$0xff]  ;;  %v662_v51 = vld [vmem:[%s2191_s3 + $0x20] sm:$0xff] }
  0x44   :  { %1328 = vmatprep.subr.bf16.mxu1 %v1327_v14  ;;  %442 = vmatmul.mubr.f32.vlgmr.msra.gmra.mrb[2].mxu0 %v30_v20  ;;  %v1347_v14 = vpack.c.bf16 %v225_v7, %v224_v6  ;;  %v1317_v20 = vpack.c.bf16 %v177_v12, %v176_v11  ;;  %v663_v52 = vld [vmem:[%s2191_s3 + $0x28] sm:$0xff]  ;;  %v665_v55 = vld [vmem:[%s2191_s3 + $0x38] sm:$0xff]  ;;  %v666_v57 = vld [vmem:[%s2191_s3 + $0x40] sm:$0xff] }
  0x45   :  { %1298 = vmatpush3.bf16.msra.mxu0 %v1297_v21  ;;  %581 = vmatprep.mubr.f32.mxu0 %v35_v34  ;;  %v1349_v21 = vpack.c.bf16 %v209_v15, %v208_v13  ;;  %v1366_v53 = vpack.c.bf16 %v663_v52, %v662_v51  ;;  %v667_v58 = vld [vmem:[%s2191_s3 + $0x48] sm:$0xff]  ;;  %v670_v63 = vld [vmem:[%s2191_s3 + $0x60] sm:$0xff]  ;;  %v673_v3 = vld [vmem:[%s2191_s3 + $0x78] sm:$0xff] }
  0x46   :  { %512 = vmatmul.mubr.f32.vlgmr.msra.gmra.mrb[2].mxu1 %v32_v22  ;;  %1300 = vmatprep.subr.bf16.mxu0 %v1299_v24  ;;  %v1319_v22 = vpack.c.bf16 %v195_v17, %v194_v16  ;;  %v179_v24 = vld [vmem:[%s2189_s1 + $0x468] sm:$0xff]  ;;  %v1372_v59 = vpack.c.bf16 %v667_v58, %v666_v57  ;;  %v752_v6 = vld [vmem:[%s2192_s5] sm:$0xff]  ;;  %v758_v15 = vld [vmem:[%s2192_s5 + $0x30] sm:$0xff] }
  0x47   :  { %1330 = vmatpush3.bf16.msra.mxu1 %v1329_v23  ;;  %651 = vmatprep.mubr.f32.mxu1 %v37_v36  ;;  %v178_v23 = vld [vmem:[%s2189_s1 + $0x460] sm:$0xff]  ;;  %v181_v36 = vld [vmem:[%s2189_s1 + $0x478] sm:$0xff]  ;;  %v671_v0 = vld [vmem:[%s2191_s3 + $0x68] sm:$0xff] }
  0x48   :  { %1332 = vmatprep.subr.bf16.mxu1 %v1331_v28  ;;  %v196_v28 = vld [vmem:[%s2189_s1 + $0x4f0] sm:$0xff]  ;;  %v1321_v32 = vpack.c.bf16 %v179_v24, %v178_v23  ;;  %v1378_v1 = vpack.c.bf16 %v671_v0, %v670_v63  ;;  %v753_v7 = vld [vmem:[%s2192_s5 + $0x8] sm:$0xff]  ;;  %v756_v12 = vld [vmem:[%s2192_s5 + $0x20] sm:$0xff] }
  0x49   :  { %1302 = vmatpush3.bf16.msra.mxu0 %v1301_v35  ;;  %v1323_v34 = vpack.c.bf16 %v197_v29, %v196_v28  ;;  %v180_v35 = vld [vmem:[%s2189_s1 + $0x470] sm:$0xff]  ;;  %v757_v13 = vld [vmem:[%s2192_s5 + $0x28] sm:$0xff]  ;;  %v759_v16 = vld [vmem:[%s2192_s5 + $0x38] sm:$0xff] }
  0x4a   :  { %1304 = vmatprep.subr.bf16.mxu0 %v1303_v38  ;;  %v212_v38 = vld [vmem:[%s2189_s1 + $0x570] sm:$0xff]  ;;  %v1325_v40 = vpack.c.bf16 %v181_v36, %v180_v35  ;;  %v1393_v17 = vpack.c.bf16 %v759_v16, %v758_v15  ;;  %v760_v18 = vld [vmem:[%s2192_s5 + $0x40] sm:$0xff]  ;;  %v761_v19 = vld [vmem:[%s2192_s5 + $0x48] sm:$0xff] }
  0x4b   :  { %1334 = vmatpush3.bf16.msra.mxu1 %v1333_v37  ;;  %v1355_v37 = vpack.c.bf16 %v229_v31, %v228_v30  ;;  %v1357_v41 = vpack.c.bf16 %v213_v39, %v212_v38  ;;  %v764_v24 = vld [vmem:[%s2192_s5 + $0x60] sm:$0xff]  ;;  %v765_v25 = vld [vmem:[%s2192_s5 + $0x68] sm:$0xff] }
  0x4c   :  { %1336 = vmatprep.subr.bf16.mxu1 %v1335_v42  ;;  %v34_v42 = vld [vmem:[%s2190_s0 + $0x40] sm:$0xff] }
  0x4d   :  { %1306 = vmatpush3.bf16.msra.mxu0 %v1305_v48  ;;  %v1360_v48 = vpack.c.bf16 %v659_v46, %v658_v45  ;;  %v850_v28 = vld [vmem:[%s2193_s2] ss:$0 sm:$0xff] }
  0x4e   :  { %1308 = vmatprep.subr.bf16.mxu0 %v1307_v50 }
  0x4f   :  { %1338 = vmatpush3.bf16.msra.mxu1 %v1337_v49  ;;  %v661_v49 = vld [vmem:[%s2191_s3 + $0x18] sm:$0xff] }
  0x50   :  { %1340 = vmatprep.subr.bf16.mxu1 %v1339_v54  ;;  %v1363_v50 = vpack.c.bf16 %v661_v49, %v660_v47  ;;  %v664_v54 = vld [vmem:[%s2191_s3 + $0x30] sm:$0xff] }
  0x51   :  { %1310 = vmatpush3.bf16.msra.mxu0 %v1309_v60  ;;  %v1369_v56 = vpack.c.bf16 %v665_v55, %v664_v54  ;;  %v668_v60 = vld [vmem:[%s2191_s3 + $0x50] sm:$0xff]  ;;  %v767_v54 = vld [vmem:[%s2192_s5 + $0x78] sm:$0xff] }
  0x52   :  { %1312 = vmatprep.subr.bf16.mxu0 %v1311_v62 }
  0x53   :  { %1342 = vmatpush3.bf16.msra.mxu1 %v1341_v61  ;;  %v669_v61 = vld [vmem:[%s2191_s3 + $0x58] sm:$0xff] }
  0x54   :  { %1344 = vmatprep.subr.bf16.mxu1 %v1343_v2  ;;  %v1375_v62 = vpack.c.bf16 %v669_v61, %v668_v60  ;;  %v672_v2 = vld [vmem:[%s2191_s3 + $0x70] sm:$0xff]  ;;  %v852_v61 = vld [vmem:[%s2195_s6] ss:$0 sm:$0xff] }
  0x55   :  { %1314 = vmatpush3.bf16.msra.mxu0 %v1313_v8  ;;  %v1381_v4 = vpack.c.bf16 %v673_v3, %v672_v2  ;;  %v754_v8 = vld [vmem:[%s2192_s5 + $0x10] sm:$0xff] }
  0x56   :  { %1316 = vmatprep.subr.bf16.mxu0 %v1315_v10  ;;  %v755_v10 = vld [vmem:[%s2192_s5 + $0x18] sm:$0xff] }
  0x57   :  { %1346 = vmatpush3.bf16.msra.mxu1 %v1345_v9  ;;  %v1384_v9 = vpack.c.bf16 %v753_v7, %v752_v6  ;;  %v1387_v11 = vpack.c.bf16 %v755_v10, %v754_v8 }
  0x58   :  { %1348 = vmatprep.subr.bf16.mxu1 %v1347_v14  ;;  %v1390_v14 = vpack.c.bf16 %v757_v13, %v756_v12 }
  0x59   :  { %1318 = vmatpush3.bf16.msra.mxu0 %v1317_v20  ;;  %v1396_v20 = vpack.c.bf16 %v761_v19, %v760_v18 }
  0x5a   :  { %1320 = vmatprep.subr.bf16.mxu0 %v1319_v22  ;;  %v763_v22 = vld [vmem:[%s2192_s5 + $0x58] sm:$0xff] }
  0x5b   :  { %1350 = vmatpush3.bf16.msra.mxu1 %v1349_v21  ;;  %v762_v21 = vld [vmem:[%s2192_s5 + $0x50] sm:$0xff] }
  0x5c   :  { %1352 = vmatprep.subr.bf16.mxu1 %v1351_v26  ;;  %v1399_v23 = vpack.c.bf16 %v763_v22, %v762_v21  ;;  %v1402_v26 = vpack.c.bf16 %v765_v25, %v764_v24 }
  0x5d   :  { %1322 = vmatpush3.bf16.msra.mxu0 %v1321_v32 }
  0x5e   :  { %1324 = vmatprep.subr.bf16.mxu0 %v1323_v34 }
  0x5f   :  { %1354 = vmatpush3.bf16.msra.mxu1 %v1353_v33 }
  0x60   :  { %1356 = vmatprep.subr.bf16.mxu1 %v1355_v37 }
  0x61   :  { %1326 = vmatpush3.bf16.msra.mxu0 %v1325_v40 }
  0x62   :  { %1359 = vmatprep.subr.bf16.mxu0 %v1410_v44 }
  0x63   :  { %1358 = vmatpush3.bf16.msra.mxu1 %v1357_v41 }
  0x64   :  { %582 = vmatmul.mubr.f32.vlgmr.msra.gmra.mrb[4].mxu0 %v34_v42  ;;  %1383 = vmatprep.subr.bf16.mxu1 %v1410_v44 }
  0x65   :  { %1361 = vmatpush3.bf16.msra.mxu0 %v1360_v48  ;;  %1129 = vmatprep.mubr.msk.f32.mxu0 %vm1411_vm0, %v1412_v5 }
  0x66   :  { %652 = vmatmul.mubr.f32.vlgmr.msra.gmra.mrb[4].mxu1 %v36_v43  ;;  %1362 = vmatprep.subr.bf16.mxu0 %v1410_v44 }
  0x67   :  { %1164 = vmatprep.mubr.msk.f32.mxu1 %vm1411_vm0, %v1412_v5  ;;  %1385 = vmatpush3.bf16.msra.mxu1 %v1384_v9 }
  0x68   :  { %1386 = vmatprep.subr.bf16.mxu1 %v1410_v44 }
  0x69   :  { %1364 = vmatpush3.bf16.msra.mxu0 %v1363_v50 }
  0x6a   :  { %1365 = vmatprep.subr.bf16.mxu0 %v1410_v44 }
  0x6b   :  { %1388 = vmatpush3.bf16.msra.mxu1 %v1387_v11 }
  0x6c   :  { %1389 = vmatprep.subr.bf16.mxu1 %v1410_v44 }
  0x6d   :  { %1367 = vmatpush3.bf16.msra.mxu0 %v1366_v53  ;;  %v766_v53 = vld [vmem:[%s2192_s5 + $0x70] sm:$0xff] }
  0x6e   :  { %1368 = vmatprep.subr.bf16.mxu0 %v1410_v44  ;;  %v1405_v55 = vpack.c.bf16 %v767_v54, %v766_v53 }
  0x6f   :  { %1391 = vmatpush3.bf16.msra.mxu1 %v1390_v14 }
  0x70   :  { %1392 = vmatprep.subr.bf16.mxu1 %v1410_v44 }
  0x71   :  { %1370 = vmatpush3.bf16.msra.mxu0 %v1369_v56  ;;  %v851_v56 = vld [vmem:[%s2194_s4] ss:$0 sm:$0xff] }
  0x72   :  { %1371 = vmatprep.subr.bf16.mxu0 %v1410_v44 }
  0x73   :  { %1394 = vmatpush3.bf16.msra.mxu1 %v1393_v17 }
  0x74   :  { %1395 = vmatprep.subr.bf16.mxu1 %v1410_v44 }
  0x75   :  { %1373 = vmatpush3.bf16.msra.mxu0 %v1372_v59 }
  0x76   :  { %1374 = vmatprep.subr.bf16.mxu0 %v1410_v44 }
  0x77   :  { %1397 = vmatpush3.bf16.msra.mxu1 %v1396_v20 }
  0x78   :  { %1398 = vmatprep.subr.bf16.mxu1 %v1410_v44 }
  0x79   :  { %1376 = vmatpush3.bf16.msra.mxu0 %v1375_v62 }
  0x7a   :  { %1377 = vmatprep.subr.bf16.mxu0 %v1410_v44 }
  0x7b   :  { %1400 = vmatpush3.bf16.msra.mxu1 %v1399_v23 }
  0x7c   :  { %1401 = vmatprep.subr.bf16.mxu1 %v1410_v44 }
  0x7d   :  { %1379 = vmatpush3.bf16.msra.mxu0 %v1378_v1 }
  0x7e   :  { %1380 = vmatprep.subr.bf16.mxu0 %v1410_v44 }
  0x7f   :  { %1403 = vmatpush3.bf16.msra.mxu1 %v1402_v26 }
  0x80   :  { %1404 = vmatprep.subr.bf16.mxu1 %v1410_v44 }
  0x81   :  { %1382 = vmatpush3.bf16.msra.mxu0 %v1381_v4 }
  0x83   :  { %1406 = vmatpush3.bf16.msra.mxu1 %v1405_v55 }
  0xf7   :  { %v885_v27 = vpop.f32.mrb[0].mxu0 }
  0xf8   :  { %v886_v29 = vpop.f32.mrb[1].mxu0 }
  0xf9   :  { %v920_v30 = vpop.f32.mrb[0].mxu1  ;;  %v887_v31 = vadd.f32 %v886_v29, %v885_v27 }
  0xfa   :  { %v921_v32 = vpop.f32.mrb[1].mxu1 }
  0xfb   :  { %v922_v33 = vadd.f32 %v921_v32, %v920_v30  ;;  %v304_v34 = vadd.f32 %v887_v31, %v850_v28 }
  0xfd   :  { %v374_v35 = vadd.f32 %v922_v33, %v304_v34 }
 0x117   :  { %v955_v36 = vpop.f32.mrb[2].mxu0 }
 0x118   :  { %v956_v37 = vpop.f32.mrb[3].mxu0 }
 0x119   :  { %v990_v38 = vpop.f32.mrb[2].mxu1  ;;  %v957_v39 = vadd.f32 %v956_v37, %v955_v36 }
 0x11a   :  { %v991_v40 = vpop.f32.mrb[3].mxu1 }
 0x11b   :  { %v992_v41 = vadd.f32 %v991_v40, %v990_v38  ;;  %v444_v42 = vadd.f32 %v957_v39, %v374_v35 }
 0x11d   :  { %v514_v43 = vadd.f32 %v992_v41, %v444_v42 }
 0x137   :  { %v1025_v44 = vpop.f32.mrb[4].mxu0 }
 0x138   :  { %v1026_v45 = vpop.f32.mrb[5].mxu0 }
 0x139   :  { %v1060_v46 = vpop.f32.mrb[4].mxu1  ;;  %v1027_v47 = vadd.f32 %v1026_v45, %v1025_v44 }
 0x13a   :  { %v1061_v48 = vpop.f32.mrb[5].mxu1 }
 0x13b   :  { %v1062_v49 = vadd.f32 %v1061_v48, %v1060_v46  ;;  %v584_v50 = vadd.f32 %v1027_v47, %v514_v43 }
 0x13d   :  { %v654_v51 = vadd.f32 %v1062_v49, %v584_v50 }
 0x13f   :  { %v657_v52 = vmax.f32 %v654_v51, 0.0 }
 0x141   :  { %1130 = vmatmul.mubr.f32.vlgmr.msra.gmra.mrb[6].mxu0 %v657_v52 }
 0x214   :  { %v747_v57 = vpop.f32.mrb[6].mxu0 }
 0x215   :  { %v748_v58 = vadd.f32 %v851_v56, %v747_v57  ;;  %v1131_v59 = vpop.f32.mrb[7].mxu0 }
 0x217   :  { %v751_v60 = vmax.f32 %v748_v58, 0.0 }
 0x219   :  { %1165 = vmatmul.mubr.f32.vlgmr.msra.gmra.mrb[6].mxu1 %v751_v60 }
 0x2ec   :  { %v841_v62 = vpop.f32.mrb[6].mxu1 }
 0x2ed   :  { %v842_v63 = vadd.f32 %v852_v61, %v841_v62  ;;  %v1166_v0 = vpop.f32.mrb[7].mxu1 }
 0x2ef   :  { %845 = vst [vmem:[%s2196_s7] sm:$0xff] %v842_v63 }

</bundles_post_ra>
